<compile_context>
chip_gen: v6e
topology: v6e:2x2x1
jax: 0.10.0
libtpu: 0.0.40
codegen_flags: <defaults>
</compile_context>

<pallas_src>
import functools

import jax
import jax.numpy as jnp
from jax.experimental import pallas as pl
from jax.experimental.pallas import tpu as pltpu


def _round_up(x, m):
    return ((x + m - 1) // m) * m


# ----------------------------------------------------------------------------
# Fused kernel: all LSTM blocks + classifier head in one dispatch.
# Ref order: x, [per layer: Wih, Whh, bias, (Wr, br), gamma, beta], Whead, bhead,
#            out (B, C), scratch slab (T,B,Hp) f32, scratch gates (T,B,4Hp) f32.
# PyTorch gate order: i, f, g, o.  LayerNorm eps = 1e-5, biased variance.
# ----------------------------------------------------------------------------
def _lstm_stack_kernel(*refs, T, B, H, Hp, proj_flags):
    n_layers = len(proj_flags)
    it = iter(refs)
    x_ref = next(it)
    layers = []
    for has_proj in proj_flags:
        wih = next(it); whh = next(it); bias = next(it)
        wr = next(it) if has_proj else None
        br = next(it) if has_proj else None
        gamma = next(it); beta = next(it)
        layers.append((has_proj, wih, whh, bias, wr, br, gamma, beta))
    whead_ref = next(it)
    bhead_ref = next(it)
    out_ref = next(it)           # (B, C) logits
    slab = next(it)              # (T, B, Hp) f32 activation/residual slab (in-place)
    gx_scr = next(it)            # (T, B, 4*Hp) f32 hoisted input-projection gates

    if H != Hp:
        lane = jax.lax.broadcasted_iota(jnp.int32, (1, Hp), 1)
        valid = (lane < H).astype(jnp.float32)       # lane mask, hoisted once
    inv_h = 1.0 / H

    for li, (has_proj, wih, whh, bias, wr, br, gamma, beta) in enumerate(layers):
        is_first = li == 0
        is_last = li == n_layers - 1

        # (A) Hoisted input projection: one MXU pass over all T*B rows, f32 acc.
        x = x_ref[...] if is_first else slab[...]
        x2 = x.reshape(T * B, x.shape[-1]).astype(jnp.bfloat16)
        gx = jnp.dot(x2, wih[...], preferred_element_type=jnp.float32) + bias[...]
        gx_scr[...] = gx.reshape(T, B, 4 * Hp)

        # (B) Residual source.  Projection: hoisted GEMM written into the slab
        #     (read per step, then overwritten with the layer output in place).
        #     Identity: read the layer input directly -- no copy, no extra scratch.
        if has_proj:
            r = jnp.dot(x2, wr[...], preferred_element_type=jnp.float32) + br[...]
            slab[...] = r.reshape(T, B, Hp)
            resid_ref = slab
        else:
            resid_ref = x_ref if is_first else slab

        whh_v = whh[...]                               # (Hp, 4Hp) bf16, resident
        gamma_v = gamma[...]
        beta_v = beta[...]

        def layer_norm(y, gamma_v=gamma_v, beta_v=beta_v):
            if H == Hp:
                mean = jnp.mean(y, axis=-1, keepdims=True)
                d = y - mean
                var = jnp.mean(d * d, axis=-1, keepdims=True)
            else:
                mean = jnp.sum(y * valid, axis=-1, keepdims=True) * inv_h
                d = (y - mean) * valid                 # padded lanes forced to 0
                var = jnp.sum(d * d, axis=-1, keepdims=True) * inv_h
            return d * jax.lax.rsqrt(var + 1e-5) * gamma_v + beta_v

        # (C) Sequential recurrence.  Only h @ Whh sits on the carry critical path;
        #     the residual add + LayerNorm of step t are off that path and write the
        #     slab row in place.  Gate slices are 128-lane aligned (Hp multiple of 128).
        def step(t, carry, resid_ref=resid_ref, whh_v=whh_v,
                 is_last=is_last, layer_norm=layer_norm):
            h, c = carry
            gates = gx_scr[t] + jnp.dot(h.astype(jnp.bfloat16), whh_v,
                                        preferred_element_type=jnp.float32)  # (B,4Hp)
            i_g = jax.nn.sigmoid(gates[:, 0 * Hp:1 * Hp])
            f_g = jax.nn.sigmoid(gates[:, 1 * Hp:2 * Hp])
            g_g = jnp.tanh(gates[:, 2 * Hp:3 * Hp])
            o_g = jax.nn.sigmoid(gates[:, 3 * Hp:4 * Hp])
            c_new = f_g * c + i_g * g_g
            h_new = o_g * jnp.tanh(c_new)
            if not is_last:
                slab[t] = layer_norm(h_new + resid_ref[t])   # unmasked (B, Hp) store
            return h_new, c_new

        init = (jnp.zeros((B, Hp), jnp.float32), jnp.zeros((B, Hp), jnp.float32))
        h_last, _ = jax.lax.fori_loop(0, T, step, init, unroll=min(T, 8))

        if is_last:
            # (D) Fused epilogue: residual + LN of the final timestep + head GEMM.
            y_last = layer_norm(h_last + resid_ref[T - 1])
            out_ref[...] = (jnp.dot(y_last.astype(jnp.bfloat16), whead_ref[...],
                                    preferred_element_type=jnp.float32)
                            + bhead_ref[...])


def lstm_stack_apply(xt, prep, *, hidden_size, num_batch_chunks=1):
    """xt: (T, B_pad, in_w) f32 time-major, B_pad = num_batch_chunks * chunk with
    chunk a multiple of 8.  Returns (B_pad, num_classes) f32 logits."""
    T, B_pad, in_w = xt.shape
    Hp = prep["blocks"][0]["whh_t"].shape[0]
    C = prep["head_b"].shape[-1]
    chunk = B_pad // num_batch_chunks

    inputs = [xt]
    in_specs = [pl.BlockSpec((T, chunk, in_w), lambda b: (0, b, 0))]
    proj_flags = []
    for pblk in prep["blocks"]:
        has_proj = "wr_t" in pblk
        proj_flags.append(has_proj)
        ws = [pblk["wih_t"], pblk["whh_t"], pblk["bias"]]
        if has_proj:
            ws += [pblk["wr_t"], pblk["br"]]
        ws += [pblk["gamma"], pblk["beta"]]
        inputs += ws
    inputs += [prep["head_w_t"], prep["head_b"]]
    # Weights / biases: full-array blocks with a constant block index (loaded once).
    in_specs += [pl.BlockSpec(w.shape, lambda b: (0, 0)) for w in inputs[1:]]

    kernel = functools.partial(_lstm_stack_kernel, T=T, B=chunk, H=hidden_size,
                               Hp=Hp, proj_flags=tuple(proj_flags))

    scratch = [pltpu.VMEM((T, chunk, Hp), jnp.float32),       # activation/residual slab
               pltpu.VMEM((T, chunk, 4 * Hp), jnp.float32)]   # hoisted gates

    in_bytes = sum(int(a.size) * a.dtype.itemsize for a in inputs)
    scr_bytes = (T * chunk * Hp + T * chunk * 4 * Hp) * 4
    out_bytes = B_pad * C * 4
    vmem_limit = int(min(64 << 20,
                         max(2 * (in_bytes + out_bytes) + scr_bytes + (4 << 20),
                             8 << 20)))

    return pl.pallas_call(
        kernel,
        out_shape=jax.ShapeDtypeStruct((B_pad, C), jnp.float32),
        grid=(num_batch_chunks,),                 # =2 on v7x to use both TensorCores
        in_specs=in_specs,
        out_specs=pl.BlockSpec((chunk, C), lambda b: (b, 0)),
        scratch_shapes=scratch,
        compiler_params=pltpu.CompilerParams(
            dimension_semantics=("parallel",),
            vmem_limit_bytes=vmem_limit),
    )(*inputs)


# ----------------------------------------------------------------------------
# Parameters (PyTorch layout, f32) + kernel-ready preparation (transposed,
# lane-padded to Hp = round_up(H, 128), bf16 MXU operands).
# ----------------------------------------------------------------------------
def init_params(key, input_size, hidden_size, num_layers, num_classes):
    params = {"blocks": []}
    sizes = [input_size] + [hidden_size] * (num_layers - 1)
    for d_in in sizes:
        key, *ks = jax.random.split(key, 7)
        scale = 1.0 / jnp.sqrt(hidden_size)
        blk = {
            "w_ih": jax.random.uniform(ks[0], (4 * hidden_size, d_in),
                                       minval=-scale, maxval=scale),
            "w_hh": jax.random.uniform(ks[1], (4 * hidden_size, hidden_size),
                                       minval=-scale, maxval=scale),
            "b_ih": jax.random.uniform(ks[2], (4 * hidden_size,),
                                       minval=-scale, maxval=scale),
            "b_hh": jax.random.uniform(ks[3], (4 * hidden_size,),
                                       minval=-scale, maxval=scale),
            "ln_gamma": jnp.ones((hidden_size,), jnp.float32),
            "ln_beta": jnp.zeros((hidden_size,), jnp.float32),
        }
        if d_in != hidden_size:          # residual_proj = Linear; else nn.Identity
            pscale = 1.0 / jnp.sqrt(d_in)
            blk["w_r"] = jax.random.uniform(ks[4], (hidden_size, d_in),
                                            minval=-pscale, maxval=pscale)
            blk["b_r"] = jax.random.uniform(ks[5], (hidden_size,),
                                            minval=-pscale, maxval=pscale)
        params["blocks"].append(blk)

    key, k_w, k_b = jax.random.split(key, 3)
    hscale = 1.0 / jnp.sqrt(hidden_size)
    params["head_w"] = jax.random.uniform(k_w, (num_classes, hidden_size),
                                          minval=-hscale, maxval=hscale)
    params["head_b"] = jax.random.uniform(k_b, (num_classes,),
                                          minval=-hscale, maxval=hscale)
    return params


def _pad_rows(w, rows):
    r, c = w.shape
    if r == rows:
        return w
    return jnp.concatenate([w, jnp.zeros((rows - r, c), w.dtype)], axis=0)


def _pad_cols(w, cols):
    r, c = w.shape
    if c == cols:
        return w
    return jnp.concatenate([w, jnp.zeros((r, cols - c), w.dtype)], axis=1)


def _pad_gate_cols(w, H, Hp):
    # (rows, 4H) -> (rows, 4Hp): gate k occupies lanes [k*Hp, k*Hp + H), rest zero.
    if H == Hp:
        return w
    rows = w.shape[0]
    out = jnp.zeros((rows, 4 * Hp), w.dtype)
    for k in range(4):
        out = out.at[:, k * Hp:k * Hp + H].set(w[:, k * H:(k + 1) * H])
    return out


def prepare_params(params):
    """One-time preprocessing: transpose to (row, col) GEMM layout, combine LSTM
    biases, pad hidden dim to a 128-lane multiple with exact zeros (gates grouped
    on 128-lane boundaries), cast MXU operands to bf16 (accumulation stays f32)."""
    H = params["blocks"][0]["w_hh"].shape[1]
    Hp = _round_up(H, 128)
    prep = {"blocks": []}
    for li, blk in enumerate(params["blocks"]):
        has_proj = "w_r" in blk
        wih_t = blk["w_ih"].T                      # (d_in, 4H)
        whh_t = blk["w_hh"].T                      # (H, 4H)
        bias = (blk["b_ih"] + blk["b_hh"]).reshape(1, 4 * H)
        in_is_hidden = (li > 0) or (not has_proj)  # layer input is the padded slab
        if in_is_hidden:
            wih_t = _pad_rows(wih_t, Hp)
        p = {
            "wih_t": _pad_gate_cols(wih_t, H, Hp).astype(jnp.bfloat16),
            "whh_t": _pad_gate_cols(_pad_rows(whh_t, Hp), H, Hp).astype(jnp.bfloat16),
            "bias": _pad_gate_cols(bias, H, Hp),
            "gamma": _pad_cols(blk["ln_gamma"].reshape(1, H), Hp),
            "beta": _pad_cols(blk["ln_beta"].reshape(1, H), Hp),
        }
        if has_proj:
            p["wr_t"] = _pad_cols(blk["w_r"].T, Hp).astype(jnp.bfloat16)
            p["br"] = _pad_cols(blk["b_r"].reshape(1, H), Hp)
        prep["blocks"].append(p)
    C = params["head_w"].shape[0]
    prep["head_w_t"] = _pad_rows(params["head_w"].T, Hp).astype(jnp.bfloat16)
    prep["head_b"] = params["head_b"].reshape(1, C)
    return prep


def _forward(prep, x, *, hidden_size, num_batch_chunks=1):
    """x: (B, T, input_size), batch_first=True (as in the PyTorch module).
    Returns (B, num_classes) logits."""
    B, T, Din = x.shape
    in_w = prep["blocks"][0]["wih_t"].shape[0]     # Din, or Hp for an Identity block 0
    chunk = _round_up(-(-B // num_batch_chunks), 8)
    B_pad = chunk * num_batch_chunks
    xt = jnp.transpose(x, (1, 0, 2))               # single transpose to time-major
    pad_b, pad_f = B_pad - B, in_w - Din
    if pad_b or pad_f:
        xt = jnp.pad(xt, ((0, 0), (0, pad_b), (0, pad_f)))
    logits = lstm_stack_apply(xt, prep, hidden_size=hidden_size,
                              num_batch_chunks=num_batch_chunks)
    return logits[:B]                              # drop batch padding


lstm_forward = jax.jit(_forward, static_argnames=("hidden_size", "num_batch_chunks"))


# ----------------------------------------------------------------------------
# Pure-JAX reference (mirrors the bf16-operand / f32-accumulate matmul path).
# ----------------------------------------------------------------------------
def _reference_forward(params, x):
    bf = lambda a: a.astype(jnp.bfloat16)
    mm = lambda a, b: jnp.dot(bf(a), bf(b), preferred_element_type=jnp.float32)
    B, T, _ = x.shape
    for blk in params["blocks"]:
        H = blk["w_hh"].shape[1]
        gates_x = mm(x, blk["w_ih"].T) + (blk["b_ih"] + blk["b_hh"])   # (B,T,4H)
        h = jnp.zeros((B, H), jnp.float32)
        c = jnp.zeros((B, H), jnp.float32)
        outs = []
        for t in range(T):
            g = gates_x[:, t, :] + mm(h, blk["w_hh"].T)
            i_g = jax.nn.sigmoid(g[:, 0 * H:1 * H])
            f_g = jax.nn.sigmoid(g[:, 1 * H:2 * H])
            g_g = jnp.tanh(g[:, 2 * H:3 * H])
            o_g = jax.nn.sigmoid(g[:, 3 * H:4 * H])
            c = f_g * c + i_g * g_g
            h = o_g * jnp.tanh(c)
            outs.append(h)
        lstm_out = jnp.stack(outs, axis=1)                              # (B,T,H)
        resid = (mm(x, blk["w_r"].T) + blk["b_r"]) if "w_r" in blk else x
        y = lstm_out + resid
        mean = jnp.mean(y, -1, keepdims=True)
        var = jnp.mean((y - mean) ** 2, -1, keepdims=True)
        x = (y - mean) * jax.lax.rsqrt(var + 1e-5) * blk["ln_gamma"] + blk["ln_beta"]
    last = x[:, -1, :]
    return mm(last, params["head_w"].T) + params["head_b"]


if __name__ == "__main__":
    batch, seq, input_size, hidden_size = 2, 8, 16, 32
    num_layers, num_classes = 2, 10

    key = jax.random.PRNGKey(0)
    key, k_x, k_p = jax.random.split(key, 3)
    x = jax.random.normal(k_x, (batch, seq, input_size), dtype=jnp.float32)
    params = init_params(k_p, input_size, hidden_size, num_layers, num_classes)
    prep = prepare_params(params)

    logits = lstm_forward(prep, x, hidden_size=hidden_size)
    jax.block_until_ready(logits)

    ref = _reference_forward(params, x)
    assert logits.shape == (batch, num_classes)
    # Tolerance accounts for bf16 MXU operands (f32 accumulation) vs the XLA path.
    err = float(jnp.max(jnp.abs(logits - ref)))
    assert jnp.allclose(logits, ref, atol=2e-2), (
        f"mismatch vs JAX reference: max abs diff = {err}")

    print("KERNEL_OK")
</pallas_src>

<mosaic_0001>
module attributes {stable_mosaic.version = 11 : i64} {
  func.func @_lstm_stack_kernel(%arg0: i32, %arg1: memref<8x8x16xf32, #tpu.memory_space<vmem>>, %arg2: memref<16x512xbf16, #tpu.memory_space<vmem>>, %arg3: memref<128x512xbf16, #tpu.memory_space<vmem>>, %arg4: memref<1x512xf32, #tpu.memory_space<vmem>>, %arg5: memref<16x128xbf16, #tpu.memory_space<vmem>>, %arg6: memref<1x128xf32, #tpu.memory_space<vmem>>, %arg7: memref<1x128xf32, #tpu.memory_space<vmem>>, %arg8: memref<1x128xf32, #tpu.memory_space<vmem>>, %arg9: memref<128x512xbf16, #tpu.memory_space<vmem>>, %arg10: memref<128x512xbf16, #tpu.memory_space<vmem>>, %arg11: memref<1x512xf32, #tpu.memory_space<vmem>>, %arg12: memref<1x128xf32, #tpu.memory_space<vmem>>, %arg13: memref<1x128xf32, #tpu.memory_space<vmem>>, %arg14: memref<128x10xbf16, #tpu.memory_space<vmem>>, %arg15: memref<1x10xf32, #tpu.memory_space<vmem>>, %arg16: memref<8x10xf32, #tpu.memory_space<vmem>>, %arg17: memref<8x8x128xf32, #tpu.memory_space<vmem>>, %arg18: memref<8x8x512xf32, #tpu.memory_space<vmem>>) attributes {dimension_semantics = [#tpu.dimension_semantics<parallel>], iteration_bounds = array<i64: 1>, scalar_prefetch = 0 : i64, scratch_operands = 2 : i64, tpu.core_type = #tpu.core_type<tc>, window_params = [{transform_indices = @transform_0, window_bounds = array<i64: 8, 8, 16>}, {pipeline_mode = #tpu.pipeline_mode<synchronous>, transform_indices = @transform_1, window_bounds = array<i64: 16, 512>}, {pipeline_mode = #tpu.pipeline_mode<synchronous>, transform_indices = @transform_2, window_bounds = array<i64: 128, 512>}, {pipeline_mode = #tpu.pipeline_mode<synchronous>, transform_indices = @transform_3, window_bounds = array<i64: 1, 512>}, {pipeline_mode = #tpu.pipeline_mode<synchronous>, transform_indices = @transform_4, window_bounds = array<i64: 16, 128>}, {pipeline_mode = #tpu.pipeline_mode<synchronous>, transform_indices = @transform_5, window_bounds = array<i64: 1, 128>}, {pipeline_mode = #tpu.pipeline_mode<synchronous>, transform_indices = @transform_6, window_bounds = array<i64: 1, 128>}, {pipeline_mode = #tpu.pipeline_mode<synchronous>, transform_indices = @transform_7, window_bounds = array<i64: 1, 128>}, {pipeline_mode = #tpu.pipeline_mode<synchronous>, transform_indices = @transform_8, window_bounds = array<i64: 128, 512>}, {pipeline_mode = #tpu.pipeline_mode<synchronous>, transform_indices = @transform_9, window_bounds = array<i64: 128, 512>}, {pipeline_mode = #tpu.pipeline_mode<synchronous>, transform_indices = @transform_10, window_bounds = array<i64: 1, 512>}, {pipeline_mode = #tpu.pipeline_mode<synchronous>, transform_indices = @transform_11, window_bounds = array<i64: 1, 128>}, {pipeline_mode = #tpu.pipeline_mode<synchronous>, transform_indices = @transform_12, window_bounds = array<i64: 1, 128>}, {pipeline_mode = #tpu.pipeline_mode<synchronous>, transform_indices = @transform_13, window_bounds = array<i64: 128, 10>}, {pipeline_mode = #tpu.pipeline_mode<synchronous>, transform_indices = @transform_14, window_bounds = array<i64: 1, 10>}, {transform_indices = @transform_15, window_bounds = array<i64: 8, 10>}]} {
    %0 = tpu.iota {dimensions = array<i32: 1>} : vector<1x128xi32>
    %c32_i32 = arith.constant 32 : i32
    %1 = vector.broadcast %c32_i32 : i32 to vector<1x128xi32>
    %2 = arith.cmpi slt, %0, %1 : vector<1x128xi32>
    %3 = arith.extui %2 : vector<1x128xi1> to vector<1x128xi32>
    %4 = arith.sitofp %3 : vector<1x128xi32> to vector<1x128xf32>
    %c0 = arith.constant 0 : index
    %c0_0 = arith.constant 0 : index
    %c0_1 = arith.constant 0 : index
    %5 = vector.load %arg1[%c0, %c0_0, %c0_1] : memref<8x8x16xf32, #tpu.memory_space<vmem>>, vector<8x8x16xf32>
    %6 = vector.shape_cast %5 : vector<8x8x16xf32> to vector<64x16xf32>
    %7 = arith.truncf %6 : vector<64x16xf32> to vector<64x16xbf16>
    %c0_2 = arith.constant 0 : index
    %c0_3 = arith.constant 0 : index
    %8 = vector.load %arg2[%c0_2, %c0_3] : memref<16x512xbf16, #tpu.memory_space<vmem>>, vector<16x512xbf16>
    %cst = arith.constant dense<0.000000e+00> : vector<64x512xf32>
    %9 = tpu.matmul %7, %8, %cst {dimension_numbers = #tpu.dot_dimension_numbers<[1], [0], [0], [1], [0, 0, 1, 1], [], []>} : vector<64x16xbf16>, vector<16x512xbf16>, vector<64x512xf32> -> vector<64x512xf32>
    %c0_4 = arith.constant 0 : index
    %c0_5 = arith.constant 0 : index
    %10 = vector.load %arg4[%c0_4, %c0_5] : memref<1x512xf32, #tpu.memory_space<vmem>>, vector<1x512xf32>
    %11 = vector.broadcast %10 : vector<1x512xf32> to vector<64x512xf32>
    %12 = arith.addf %9, %11 : vector<64x512xf32>
    %13 = vector.shape_cast %12 : vector<64x512xf32> to vector<8x8x512xf32>
    %c0_6 = arith.constant 0 : index
    %c0_7 = arith.constant 0 : index
    %c0_8 = arith.constant 0 : index
    %14 = vector.load %arg18[%c0_6, %c0_7, %c0_8] : memref<8x8x512xf32, #tpu.memory_space<vmem>>, vector<8x8x512xf32>
    tpu.vector_store %arg18[%c0_6, %c0_7, %c0_8], %13 {strides = array<i32>} : memref<8x8x512xf32, #tpu.memory_space<vmem>>, vector<8x8x512xf32>,
    %c0_9 = arith.constant 0 : index
    %c0_10 = arith.constant 0 : index
    %15 = vector.load %arg5[%c0_9, %c0_10] : memref<16x128xbf16, #tpu.memory_space<vmem>>, vector<16x128xbf16>
    %cst_11 = arith.constant dense<0.000000e+00> : vector<64x128xf32>
    %16 = tpu.matmul %7, %15, %cst_11 {dimension_numbers = #tpu.dot_dimension_numbers<[1], [0], [0], [1], [0, 0, 1, 1], [], []>} : vector<64x16xbf16>, vector<16x128xbf16>, vector<64x128xf32> -> vector<64x128xf32>
    %c0_12 = arith.constant 0 : index
    %c0_13 = arith.constant 0 : index
    %17 = vector.load %arg6[%c0_12, %c0_13] : memref<1x128xf32, #tpu.memory_space<vmem>>, vector<1x128xf32>
    %18 = vector.broadcast %17 : vector<1x128xf32> to vector<64x128xf32>
    %19 = arith.addf %16, %18 : vector<64x128xf32>
    %20 = vector.shape_cast %19 : vector<64x128xf32> to vector<8x8x128xf32>
    %c0_14 = arith.constant 0 : index
    %c0_15 = arith.constant 0 : index
    %c0_16 = arith.constant 0 : index
    %21 = vector.load %arg17[%c0_14, %c0_15, %c0_16] : memref<8x8x128xf32, #tpu.memory_space<vmem>>, vector<8x8x128xf32>
    tpu.vector_store %arg17[%c0_14, %c0_15, %c0_16], %20 {strides = array<i32>} : memref<8x8x128xf32, #tpu.memory_space<vmem>>, vector<8x8x128xf32>,
    %c0_17 = arith.constant 0 : index
    %c0_18 = arith.constant 0 : index
    %22 = vector.load %arg3[%c0_17, %c0_18] : memref<128x512xbf16, #tpu.memory_space<vmem>>, vector<128x512xbf16>
    %c0_19 = arith.constant 0 : index
    %c0_20 = arith.constant 0 : index
    %23 = vector.load %arg7[%c0_19, %c0_20] : memref<1x128xf32, #tpu.memory_space<vmem>>, vector<1x128xf32>
    %c0_21 = arith.constant 0 : index
    %c0_22 = arith.constant 0 : index
    %24 = vector.load %arg8[%c0_21, %c0_22] : memref<1x128xf32, #tpu.memory_space<vmem>>, vector<1x128xf32>
    %cst_23 = arith.constant 0.000000e+00 : f32
    %25 = vector.broadcast %cst_23 : f32 to vector<8x128xf32>
    %cst_24 = arith.constant 0.000000e+00 : f32
    %26 = vector.broadcast %cst_24 : f32 to vector<8x128xf32>
    %c0_i32 = arith.constant 0 : i32
    %27 = arith.index_cast %c0_i32 : i32 to index
    %c0_25 = arith.constant 0 : index
    %c0_26 = arith.constant 0 : index
    %28 = vector.load %arg18[%27, %c0_25, %c0_26] : memref<8x8x512xf32, #tpu.memory_space<vmem>>, vector<1x8x512xf32>
    %29 = vector.shape_cast %28 : vector<1x8x512xf32> to vector<8x512xf32>
    %30 = arith.truncf %25 : vector<8x128xf32> to vector<8x128xbf16>
    %cst_27 = arith.constant dense<0.000000e+00> : vector<8x512xf32>
    %31 = tpu.matmul %30, %22, %cst_27 {dimension_numbers = #tpu.dot_dimension_numbers<[1], [0], [0], [1], [0, 0, 1, 1], [], []>} : vector<8x128xbf16>, vector<128x512xbf16>, vector<8x512xf32> -> vector<8x512xf32>
    %32 = arith.addf %29, %31 : vector<8x512xf32>
    %33 = vector.extract_strided_slice %32 {offsets = [0, 0], sizes = [8, 128], strides = [1, 1]} : vector<8x512xf32> to vector<8x128xf32>
    %34 = arith.negf %33 : vector<8x128xf32>
    %35 = math.exp %34 : vector<8x128xf32>
    %cst_28 = arith.constant 1.000000e+00 : f32
    %36 = vector.broadcast %cst_28 : f32 to vector<8x128xf32>
    %37 = arith.addf %36, %35 : vector<8x128xf32>
    %38 = arith.divf %36, %37 : vector<8x128xf32>
    %39 = vector.extract_strided_slice %32 {offsets = [0, 128], sizes = [8, 128], strides = [1, 1]} : vector<8x512xf32> to vector<8x128xf32>
    %40 = arith.negf %39 : vector<8x128xf32>
    %41 = math.exp %40 : vector<8x128xf32>
    %cst_29 = arith.constant 1.000000e+00 : f32
    %42 = vector.broadcast %cst_29 : f32 to vector<8x128xf32>
    %43 = arith.addf %42, %41 : vector<8x128xf32>
    %44 = arith.divf %42, %43 : vector<8x128xf32>
    %45 = vector.extract_strided_slice %32 {offsets = [0, 256], sizes = [8, 128], strides = [1, 1]} : vector<8x512xf32> to vector<8x128xf32>
    %46 = math.tanh %45 : vector<8x128xf32>
    %47 = vector.extract_strided_slice %32 {offsets = [0, 384], sizes = [8, 128], strides = [1, 1]} : vector<8x512xf32> to vector<8x128xf32>
    %48 = arith.negf %47 : vector<8x128xf32>
    %49 = math.exp %48 : vector<8x128xf32>
    %cst_30 = arith.constant 1.000000e+00 : f32
    %50 = vector.broadcast %cst_30 : f32 to vector<8x128xf32>
    %51 = arith.addf %50, %49 : vector<8x128xf32>
    %52 = arith.divf %50, %51 : vector<8x128xf32>
    %53 = arith.mulf %44, %26 : vector<8x128xf32>
    %54 = arith.mulf %38, %46 : vector<8x128xf32>
    %55 = arith.addf %53, %54 : vector<8x128xf32>
    %56 = math.tanh %55 : vector<8x128xf32>
    %57 = arith.mulf %52, %56 : vector<8x128xf32>
    %58 = arith.index_cast %c0_i32 : i32 to index
    %c0_31 = arith.constant 0 : index
    %c0_32 = arith.constant 0 : index
    %59 = vector.load %arg17[%58, %c0_31, %c0_32] : memref<8x8x128xf32, #tpu.memory_space<vmem>>, vector<1x8x128xf32>
    %60 = vector.shape_cast %59 : vector<1x8x128xf32> to vector<8x128xf32>
    %61 = arith.addf %57, %60 : vector<8x128xf32>
    %62 = vector.broadcast %4 : vector<1x128xf32> to vector<8x128xf32>
    %63 = arith.mulf %61, %62 : vector<8x128xf32>
    %cst_33 = arith.constant dense<0.000000e+00> : vector<8xf32>
    %64 = vector.multi_reduction <add>, %63, %cst_33 [1] : vector<8x128xf32> to vector<8xf32>
    %65 = vector.shape_cast %64 : vector<8xf32> to vector<8x1xf32>
    %cst_34 = arith.constant 3.125000e-02 : f32
    %66 = vector.broadcast %cst_34 : f32 to vector<8x1xf32>
    %67 = arith.mulf %65, %66 : vector<8x1xf32>
    %68 = vector.broadcast %67 : vector<8x1xf32> to vector<8x128xf32>
    %69 = arith.subf %61, %68 : vector<8x128xf32>
    %70 = vector.broadcast %4 : vector<1x128xf32> to vector<8x128xf32>
    %71 = arith.mulf %69, %70 : vector<8x128xf32>
    %72 = arith.mulf %71, %71 : vector<8x128xf32>
    %cst_35 = arith.constant dense<0.000000e+00> : vector<8xf32>
    %73 = vector.multi_reduction <add>, %72, %cst_35 [1] : vector<8x128xf32> to vector<8xf32>
    %74 = vector.shape_cast %73 : vector<8xf32> to vector<8x1xf32>
    %cst_36 = arith.constant 3.125000e-02 : f32
    %75 = vector.broadcast %cst_36 : f32 to vector<8x1xf32>
    %76 = arith.mulf %74, %75 : vector<8x1xf32>
    %cst_37 = arith.constant 9.99999974E-6 : f32
    %77 = vector.broadcast %cst_37 : f32 to vector<8x1xf32>
    %78 = arith.addf %76, %77 : vector<8x1xf32>
    %79 = math.rsqrt %78 : vector<8x1xf32>
    %80 = vector.broadcast %79 : vector<8x1xf32> to vector<8x128xf32>
    %81 = arith.mulf %71, %80 : vector<8x128xf32>
    %82 = vector.broadcast %23 : vector<1x128xf32> to vector<8x128xf32>
    %83 = arith.mulf %81, %82 : vector<8x128xf32>
    %84 = vector.broadcast %24 : vector<1x128xf32> to vector<8x128xf32>
    %85 = arith.addf %83, %84 : vector<8x128xf32>
    %86 = arith.index_cast %c0_i32 : i32 to index
    %c0_38 = arith.constant 0 : index
    %c0_39 = arith.constant 0 : index
    %87 = vector.load %arg17[%86, %c0_38, %c0_39] : memref<8x8x128xf32, #tpu.memory_space<vmem>>, vector<1x8x128xf32>
    %88 = vector.shape_cast %87 : vector<1x8x128xf32> to vector<8x128xf32>
    %89 = vector.shape_cast %85 : vector<8x128xf32> to vector<1x8x128xf32>
    tpu.vector_store %arg17[%86, %c0_38, %c0_39], %89 {strides = array<i32>} : memref<8x8x128xf32, #tpu.memory_space<vmem>>, vector<1x8x128xf32>,
    %c1_i32 = arith.constant 1 : i32
    %90 = arith.index_cast %c1_i32 : i32 to index
    %c0_40 = arith.constant 0 : index
    %c0_41 = arith.constant 0 : index
    %91 = vector.load %arg18[%90, %c0_40, %c0_41] : memref<8x8x512xf32, #tpu.memory_space<vmem>>, vector<1x8x512xf32>
    %92 = vector.shape_cast %91 : vector<1x8x512xf32> to vector<8x512xf32>
    %93 = arith.truncf %57 : vector<8x128xf32> to vector<8x128xbf16>
    %cst_42 = arith.constant dense<0.000000e+00> : vector<8x512xf32>
    %94 = tpu.matmul %93, %22, %cst_42 {dimension_numbers = #tpu.dot_dimension_numbers<[1], [0], [0], [1], [0, 0, 1, 1], [], []>} : vector<8x128xbf16>, vector<128x512xbf16>, vector<8x512xf32> -> vector<8x512xf32>
    %95 = arith.addf %92, %94 : vector<8x512xf32>
    %96 = vector.extract_strided_slice %95 {offsets = [0, 0], sizes = [8, 128], strides = [1, 1]} : vector<8x512xf32> to vector<8x128xf32>
    %97 = arith.negf %96 : vector<8x128xf32>
    %98 = math.exp %97 : vector<8x128xf32>
    %cst_43 = arith.constant 1.000000e+00 : f32
    %99 = vector.broadcast %cst_43 : f32 to vector<8x128xf32>
    %100 = arith.addf %99, %98 : vector<8x128xf32>
    %101 = arith.divf %99, %100 : vector<8x128xf32>
    %102 = vector.extract_strided_slice %95 {offsets = [0, 128], sizes = [8, 128], strides = [1, 1]} : vector<8x512xf32> to vector<8x128xf32>
    %103 = arith.negf %102 : vector<8x128xf32>
    %104 = math.exp %103 : vector<8x128xf32>
    %cst_44 = arith.constant 1.000000e+00 : f32
    %105 = vector.broadcast %cst_44 : f32 to vector<8x128xf32>
    %106 = arith.addf %105, %104 : vector<8x128xf32>
    %107 = arith.divf %105, %106 : vector<8x128xf32>
    %108 = vector.extract_strided_slice %95 {offsets = [0, 256], sizes = [8, 128], strides = [1, 1]} : vector<8x512xf32> to vector<8x128xf32>
    %109 = math.tanh %108 : vector<8x128xf32>
    %110 = vector.extract_strided_slice %95 {offsets = [0, 384], sizes = [8, 128], strides = [1, 1]} : vector<8x512xf32> to vector<8x128xf32>
    %111 = arith.negf %110 : vector<8x128xf32>
    %112 = math.exp %111 : vector<8x128xf32>
    %cst_45 = arith.constant 1.000000e+00 : f32
    %113 = vector.broadcast %cst_45 : f32 to vector<8x128xf32>
    %114 = arith.addf %113, %112 : vector<8x128xf32>
    %115 = arith.divf %113, %114 : vector<8x128xf32>
    %116 = arith.mulf %107, %55 : vector<8x128xf32>
    %117 = arith.mulf %101, %109 : vector<8x128xf32>
    %118 = arith.addf %116, %117 : vector<8x128xf32>
    %119 = math.tanh %118 : vector<8x128xf32>
    %120 = arith.mulf %115, %119 : vector<8x128xf32>
    %121 = arith.index_cast %c1_i32 : i32 to index
    %c0_46 = arith.constant 0 : index
    %c0_47 = arith.constant 0 : index
    %122 = vector.load %arg17[%121, %c0_46, %c0_47] : memref<8x8x128xf32, #tpu.memory_space<vmem>>, vector<1x8x128xf32>
    %123 = vector.shape_cast %122 : vector<1x8x128xf32> to vector<8x128xf32>
    %124 = arith.addf %120, %123 : vector<8x128xf32>
    %125 = vector.broadcast %4 : vector<1x128xf32> to vector<8x128xf32>
    %126 = arith.mulf %124, %125 : vector<8x128xf32>
    %cst_48 = arith.constant dense<0.000000e+00> : vector<8xf32>
    %127 = vector.multi_reduction <add>, %126, %cst_48 [1] : vector<8x128xf32> to vector<8xf32>
    %128 = vector.shape_cast %127 : vector<8xf32> to vector<8x1xf32>
    %cst_49 = arith.constant 3.125000e-02 : f32
    %129 = vector.broadcast %cst_49 : f32 to vector<8x1xf32>
    %130 = arith.mulf %128, %129 : vector<8x1xf32>
    %131 = vector.broadcast %130 : vector<8x1xf32> to vector<8x128xf32>
    %132 = arith.subf %124, %131 : vector<8x128xf32>
    %133 = vector.broadcast %4 : vector<1x128xf32> to vector<8x128xf32>
    %134 = arith.mulf %132, %133 : vector<8x128xf32>
    %135 = arith.mulf %134, %134 : vector<8x128xf32>
    %cst_50 = arith.constant dense<0.000000e+00> : vector<8xf32>
    %136 = vector.multi_reduction <add>, %135, %cst_50 [1] : vector<8x128xf32> to vector<8xf32>
    %137 = vector.shape_cast %136 : vector<8xf32> to vector<8x1xf32>
    %cst_51 = arith.constant 3.125000e-02 : f32
    %138 = vector.broadcast %cst_51 : f32 to vector<8x1xf32>
    %139 = arith.mulf %137, %138 : vector<8x1xf32>
    %cst_52 = arith.constant 9.99999974E-6 : f32
    %140 = vector.broadcast %cst_52 : f32 to vector<8x1xf32>
    %141 = arith.addf %139, %140 : vector<8x1xf32>
    %142 = math.rsqrt %141 : vector<8x1xf32>
    %143 = vector.broadcast %142 : vector<8x1xf32> to vector<8x128xf32>
    %144 = arith.mulf %134, %143 : vector<8x128xf32>
    %145 = vector.broadcast %23 : vector<1x128xf32> to vector<8x128xf32>
    %146 = arith.mulf %144, %145 : vector<8x128xf32>
    %147 = vector.broadcast %24 : vector<1x128xf32> to vector<8x128xf32>
    %148 = arith.addf %146, %147 : vector<8x128xf32>
    %149 = arith.index_cast %c1_i32 : i32 to index
    %c0_53 = arith.constant 0 : index
    %c0_54 = arith.constant 0 : index
    %150 = vector.load %arg17[%149, %c0_53, %c0_54] : memref<8x8x128xf32, #tpu.memory_space<vmem>>, vector<1x8x128xf32>
    %151 = vector.shape_cast %150 : vector<1x8x128xf32> to vector<8x128xf32>
    %152 = vector.shape_cast %148 : vector<8x128xf32> to vector<1x8x128xf32>
    tpu.vector_store %arg17[%149, %c0_53, %c0_54], %152 {strides = array<i32>} : memref<8x8x128xf32, #tpu.memory_space<vmem>>, vector<1x8x128xf32>,
    %c2_i32 = arith.constant 2 : i32
    %153 = arith.index_cast %c2_i32 : i32 to index
    %c0_55 = arith.constant 0 : index
    %c0_56 = arith.constant 0 : index
    %154 = vector.load %arg18[%153, %c0_55, %c0_56] : memref<8x8x512xf32, #tpu.memory_space<vmem>>, vector<1x8x512xf32>
    %155 = vector.shape_cast %154 : vector<1x8x512xf32> to vector<8x512xf32>
    %156 = arith.truncf %120 : vector<8x128xf32> to vector<8x128xbf16>
    %cst_57 = arith.constant dense<0.000000e+00> : vector<8x512xf32>
    %157 = tpu.matmul %156, %22, %cst_57 {dimension_numbers = #tpu.dot_dimension_numbers<[1], [0], [0], [1], [0, 0, 1, 1], [], []>} : vector<8x128xbf16>, vector<128x512xbf16>, vector<8x512xf32> -> vector<8x512xf32>
    %158 = arith.addf %155, %157 : vector<8x512xf32>
    %159 = vector.extract_strided_slice %158 {offsets = [0, 0], sizes = [8, 128], strides = [1, 1]} : vector<8x512xf32> to vector<8x128xf32>
    %160 = arith.negf %159 : vector<8x128xf32>
    %161 = math.exp %160 : vector<8x128xf32>
    %cst_58 = arith.constant 1.000000e+00 : f32
    %162 = vector.broadcast %cst_58 : f32 to vector<8x128xf32>
    %163 = arith.addf %162, %161 : vector<8x128xf32>
    %164 = arith.divf %162, %163 : vector<8x128xf32>
    %165 = vector.extract_strided_slice %158 {offsets = [0, 128], sizes = [8, 128], strides = [1, 1]} : vector<8x512xf32> to vector<8x128xf32>
    %166 = arith.negf %165 : vector<8x128xf32>
    %167 = math.exp %166 : vector<8x128xf32>
    %cst_59 = arith.constant 1.000000e+00 : f32
    %168 = vector.broadcast %cst_59 : f32 to vector<8x128xf32>
    %169 = arith.addf %168, %167 : vector<8x128xf32>
    %170 = arith.divf %168, %169 : vector<8x128xf32>
    %171 = vector.extract_strided_slice %158 {offsets = [0, 256], sizes = [8, 128], strides = [1, 1]} : vector<8x512xf32> to vector<8x128xf32>
    %172 = math.tanh %171 : vector<8x128xf32>
    %173 = vector.extract_strided_slice %158 {offsets = [0, 384], sizes = [8, 128], strides = [1, 1]} : vector<8x512xf32> to vector<8x128xf32>
    %174 = arith.negf %173 : vector<8x128xf32>
    %175 = math.exp %174 : vector<8x128xf32>
    %cst_60 = arith.constant 1.000000e+00 : f32
    %176 = vector.broadcast %cst_60 : f32 to vector<8x128xf32>
    %177 = arith.addf %176, %175 : vector<8x128xf32>
    %178 = arith.divf %176, %177 : vector<8x128xf32>
    %179 = arith.mulf %170, %118 : vector<8x128xf32>
    %180 = arith.mulf %164, %172 : vector<8x128xf32>
    %181 = arith.addf %179, %180 : vector<8x128xf32>
    %182 = math.tanh %181 : vector<8x128xf32>
    %183 = arith.mulf %178, %182 : vector<8x128xf32>
    %184 = arith.index_cast %c2_i32 : i32 to index
    %c0_61 = arith.constant 0 : index
    %c0_62 = arith.constant 0 : index
    %185 = vector.load %arg17[%184, %c0_61, %c0_62] : memref<8x8x128xf32, #tpu.memory_space<vmem>>, vector<1x8x128xf32>
    %186 = vector.shape_cast %185 : vector<1x8x128xf32> to vector<8x128xf32>
    %187 = arith.addf %183, %186 : vector<8x128xf32>
    %188 = vector.broadcast %4 : vector<1x128xf32> to vector<8x128xf32>
    %189 = arith.mulf %187, %188 : vector<8x128xf32>
    %cst_63 = arith.constant dense<0.000000e+00> : vector<8xf32>
    %190 = vector.multi_reduction <add>, %189, %cst_63 [1] : vector<8x128xf32> to vector<8xf32>
    %191 = vector.shape_cast %190 : vector<8xf32> to vector<8x1xf32>
    %cst_64 = arith.constant 3.125000e-02 : f32
    %192 = vector.broadcast %cst_64 : f32 to vector<8x1xf32>
    %193 = arith.mulf %191, %192 : vector<8x1xf32>
    %194 = vector.broadcast %193 : vector<8x1xf32> to vector<8x128xf32>
    %195 = arith.subf %187, %194 : vector<8x128xf32>
    %196 = vector.broadcast %4 : vector<1x128xf32> to vector<8x128xf32>
    %197 = arith.mulf %195, %196 : vector<8x128xf32>
    %198 = arith.mulf %197, %197 : vector<8x128xf32>
    %cst_65 = arith.constant dense<0.000000e+00> : vector<8xf32>
    %199 = vector.multi_reduction <add>, %198, %cst_65 [1] : vector<8x128xf32> to vector<8xf32>
    %200 = vector.shape_cast %199 : vector<8xf32> to vector<8x1xf32>
    %cst_66 = arith.constant 3.125000e-02 : f32
    %201 = vector.broadcast %cst_66 : f32 to vector<8x1xf32>
    %202 = arith.mulf %200, %201 : vector<8x1xf32>
    %cst_67 = arith.constant 9.99999974E-6 : f32
    %203 = vector.broadcast %cst_67 : f32 to vector<8x1xf32>
    %204 = arith.addf %202, %203 : vector<8x1xf32>
    %205 = math.rsqrt %204 : vector<8x1xf32>
    %206 = vector.broadcast %205 : vector<8x1xf32> to vector<8x128xf32>
    %207 = arith.mulf %197, %206 : vector<8x128xf32>
    %208 = vector.broadcast %23 : vector<1x128xf32> to vector<8x128xf32>
    %209 = arith.mulf %207, %208 : vector<8x128xf32>
    %210 = vector.broadcast %24 : vector<1x128xf32> to vector<8x128xf32>
    %211 = arith.addf %209, %210 : vector<8x128xf32>
    %212 = arith.index_cast %c2_i32 : i32 to index
    %c0_68 = arith.constant 0 : index
    %c0_69 = arith.constant 0 : index
    %213 = vector.load %arg17[%212, %c0_68, %c0_69] : memref<8x8x128xf32, #tpu.memory_space<vmem>>, vector<1x8x128xf32>
    %214 = vector.shape_cast %213 : vector<1x8x128xf32> to vector<8x128xf32>
    %215 = vector.shape_cast %211 : vector<8x128xf32> to vector<1x8x128xf32>
    tpu.vector_store %arg17[%212, %c0_68, %c0_69], %215 {strides = array<i32>} : memref<8x8x128xf32, #tpu.memory_space<vmem>>, vector<1x8x128xf32>,
    %c3_i32 = arith.constant 3 : i32
    %216 = arith.index_cast %c3_i32 : i32 to index
    %c0_70 = arith.constant 0 : index
    %c0_71 = arith.constant 0 : index
    %217 = vector.load %arg18[%216, %c0_70, %c0_71] : memref<8x8x512xf32, #tpu.memory_space<vmem>>, vector<1x8x512xf32>
    %218 = vector.shape_cast %217 : vector<1x8x512xf32> to vector<8x512xf32>
    %219 = arith.truncf %183 : vector<8x128xf32> to vector<8x128xbf16>
    %cst_72 = arith.constant dense<0.000000e+00> : vector<8x512xf32>
    %220 = tpu.matmul %219, %22, %cst_72 {dimension_numbers = #tpu.dot_dimension_numbers<[1], [0], [0], [1], [0, 0, 1, 1], [], []>} : vector<8x128xbf16>, vector<128x512xbf16>, vector<8x512xf32> -> vector<8x512xf32>
    %221 = arith.addf %218, %220 : vector<8x512xf32>
    %222 = vector.extract_strided_slice %221 {offsets = [0, 0], sizes = [8, 128], strides = [1, 1]} : vector<8x512xf32> to vector<8x128xf32>
    %223 = arith.negf %222 : vector<8x128xf32>
    %224 = math.exp %223 : vector<8x128xf32>
    %cst_73 = arith.constant 1.000000e+00 : f32
    %225 = vector.broadcast %cst_73 : f32 to vector<8x128xf32>
    %226 = arith.addf %225, %224 : vector<8x128xf32>
    %227 = arith.divf %225, %226 : vector<8x128xf32>
    %228 = vector.extract_strided_slice %221 {offsets = [0, 128], sizes = [8, 128], strides = [1, 1]} : vector<8x512xf32> to vector<8x128xf32>
    %229 = arith.negf %228 : vector<8x128xf32>
    %230 = math.exp %229 : vector<8x128xf32>
    %cst_74 = arith.constant 1.000000e+00 : f32
    %231 = vector.broadcast %cst_74 : f32 to vector<8x128xf32>
    %232 = arith.addf %231, %230 : vector<8x128xf32>
    %233 = arith.divf %231, %232 : vector<8x128xf32>
    %234 = vector.extract_strided_slice %221 {offsets = [0, 256], sizes = [8, 128], strides = [1, 1]} : vector<8x512xf32> to vector<8x128xf32>
    %235 = math.tanh %234 : vector<8x128xf32>
    %236 = vector.extract_strided_slice %221 {offsets = [0, 384], sizes = [8, 128], strides = [1, 1]} : vector<8x512xf32> to vector<8x128xf32>
    %237 = arith.negf %236 : vector<8x128xf32>
    %238 = math.exp %237 : vector<8x128xf32>
    %cst_75 = arith.constant 1.000000e+00 : f32
    %239 = vector.broadcast %cst_75 : f32 to vector<8x128xf32>
    %240 = arith.addf %239, %238 : vector<8x128xf32>
    %241 = arith.divf %239, %240 : vector<8x128xf32>
    %242 = arith.mulf %233, %181 : vector<8x128xf32>
    %243 = arith.mulf %227, %235 : vector<8x128xf32>
    %244 = arith.addf %242, %243 : vector<8x128xf32>
    %245 = math.tanh %244 : vector<8x128xf32>
    %246 = arith.mulf %241, %245 : vector<8x128xf32>
    %247 = arith.index_cast %c3_i32 : i32 to index
    %c0_76 = arith.constant 0 : index
    %c0_77 = arith.constant 0 : index
    %248 = vector.load %arg17[%247, %c0_76, %c0_77] : memref<8x8x128xf32, #tpu.memory_space<vmem>>, vector<1x8x128xf32>
    %249 = vector.shape_cast %248 : vector<1x8x128xf32> to vector<8x128xf32>
    %250 = arith.addf %246, %249 : vector<8x128xf32>
    %251 = vector.broadcast %4 : vector<1x128xf32> to vector<8x128xf32>
    %252 = arith.mulf %250, %251 : vector<8x128xf32>
    %cst_78 = arith.constant dense<0.000000e+00> : vector<8xf32>
    %253 = vector.multi_reduction <add>, %252, %cst_78 [1] : vector<8x128xf32> to vector<8xf32>
    %254 = vector.shape_cast %253 : vector<8xf32> to vector<8x1xf32>
    %cst_79 = arith.constant 3.125000e-02 : f32
    %255 = vector.broadcast %cst_79 : f32 to vector<8x1xf32>
    %256 = arith.mulf %254, %255 : vector<8x1xf32>
    %257 = vector.broadcast %256 : vector<8x1xf32> to vector<8x128xf32>
    %258 = arith.subf %250, %257 : vector<8x128xf32>
    %259 = vector.broadcast %4 : vector<1x128xf32> to vector<8x128xf32>
    %260 = arith.mulf %258, %259 : vector<8x128xf32>
    %261 = arith.mulf %260, %260 : vector<8x128xf32>
    %cst_80 = arith.constant dense<0.000000e+00> : vector<8xf32>
    %262 = vector.multi_reduction <add>, %261, %cst_80 [1] : vector<8x128xf32> to vector<8xf32>
    %263 = vector.shape_cast %262 : vector<8xf32> to vector<8x1xf32>
    %cst_81 = arith.constant 3.125000e-02 : f32
    %264 = vector.broadcast %cst_81 : f32 to vector<8x1xf32>
    %265 = arith.mulf %263, %264 : vector<8x1xf32>
    %cst_82 = arith.constant 9.99999974E-6 : f32
    %266 = vector.broadcast %cst_82 : f32 to vector<8x1xf32>
    %267 = arith.addf %265, %266 : vector<8x1xf32>
    %268 = math.rsqrt %267 : vector<8x1xf32>
    %269 = vector.broadcast %268 : vector<8x1xf32> to vector<8x128xf32>
    %270 = arith.mulf %260, %269 : vector<8x128xf32>
    %271 = vector.broadcast %23 : vector<1x128xf32> to vector<8x128xf32>
    %272 = arith.mulf %270, %271 : vector<8x128xf32>
    %273 = vector.broadcast %24 : vector<1x128xf32> to vector<8x128xf32>
    %274 = arith.addf %272, %273 : vector<8x128xf32>
    %275 = arith.index_cast %c3_i32 : i32 to index
    %c0_83 = arith.constant 0 : index
    %c0_84 = arith.constant 0 : index
    %276 = vector.load %arg17[%275, %c0_83, %c0_84] : memref<8x8x128xf32, #tpu.memory_space<vmem>>, vector<1x8x128xf32>
    %277 = vector.shape_cast %276 : vector<1x8x128xf32> to vector<8x128xf32>
    %278 = vector.shape_cast %274 : vector<8x128xf32> to vector<1x8x128xf32>
    tpu.vector_store %arg17[%275, %c0_83, %c0_84], %278 {strides = array<i32>} : memref<8x8x128xf32, #tpu.memory_space<vmem>>, vector<1x8x128xf32>,
    %c4_i32 = arith.constant 4 : i32
    %279 = arith.index_cast %c4_i32 : i32 to index
    %c0_85 = arith.constant 0 : index
    %c0_86 = arith.constant 0 : index
    %280 = vector.load %arg18[%279, %c0_85, %c0_86] : memref<8x8x512xf32, #tpu.memory_space<vmem>>, vector<1x8x512xf32>
    %281 = vector.shape_cast %280 : vector<1x8x512xf32> to vector<8x512xf32>
    %282 = arith.truncf %246 : vector<8x128xf32> to vector<8x128xbf16>
    %cst_87 = arith.constant dense<0.000000e+00> : vector<8x512xf32>
    %283 = tpu.matmul %282, %22, %cst_87 {dimension_numbers = #tpu.dot_dimension_numbers<[1], [0], [0], [1], [0, 0, 1, 1], [], []>} : vector<8x128xbf16>, vector<128x512xbf16>, vector<8x512xf32> -> vector<8x512xf32>
    %284 = arith.addf %281, %283 : vector<8x512xf32>
    %285 = vector.extract_strided_slice %284 {offsets = [0, 0], sizes = [8, 128], strides = [1, 1]} : vector<8x512xf32> to vector<8x128xf32>
    %286 = arith.negf %285 : vector<8x128xf32>
    %287 = math.exp %286 : vector<8x128xf32>
    %cst_88 = arith.constant 1.000000e+00 : f32
    %288 = vector.broadcast %cst_88 : f32 to vector<8x128xf32>
    %289 = arith.addf %288, %287 : vector<8x128xf32>
    %290 = arith.divf %288, %289 : vector<8x128xf32>
    %291 = vector.extract_strided_slice %284 {offsets = [0, 128], sizes = [8, 128], strides = [1, 1]} : vector<8x512xf32> to vector<8x128xf32>
    %292 = arith.negf %291 : vector<8x128xf32>
    %293 = math.exp %292 : vector<8x128xf32>
    %cst_89 = arith.constant 1.000000e+00 : f32
    %294 = vector.broadcast %cst_89 : f32 to vector<8x128xf32>
    %295 = arith.addf %294, %293 : vector<8x128xf32>
    %296 = arith.divf %294, %295 : vector<8x128xf32>
    %297 = vector.extract_strided_slice %284 {offsets = [0, 256], sizes = [8, 128], strides = [1, 1]} : vector<8x512xf32> to vector<8x128xf32>
    %298 = math.tanh %297 : vector<8x128xf32>
    %299 = vector.extract_strided_slice %284 {offsets = [0, 384], sizes = [8, 128], strides = [1, 1]} : vector<8x512xf32> to vector<8x128xf32>
    %300 = arith.negf %299 : vector<8x128xf32>
    %301 = math.exp %300 : vector<8x128xf32>
    %cst_90 = arith.constant 1.000000e+00 : f32
    %302 = vector.broadcast %cst_90 : f32 to vector<8x128xf32>
    %303 = arith.addf %302, %301 : vector<8x128xf32>
    %304 = arith.divf %302, %303 : vector<8x128xf32>
    %305 = arith.mulf %296, %244 : vector<8x128xf32>
    %306 = arith.mulf %290, %298 : vector<8x128xf32>
    %307 = arith.addf %305, %306 : vector<8x128xf32>
    %308 = math.tanh %307 : vector<8x128xf32>
    %309 = arith.mulf %304, %308 : vector<8x128xf32>
    %310 = arith.index_cast %c4_i32 : i32 to index
    %c0_91 = arith.constant 0 : index
    %c0_92 = arith.constant 0 : index
    %311 = vector.load %arg17[%310, %c0_91, %c0_92] : memref<8x8x128xf32, #tpu.memory_space<vmem>>, vector<1x8x128xf32>
    %312 = vector.shape_cast %311 : vector<1x8x128xf32> to vector<8x128xf32>
    %313 = arith.addf %309, %312 : vector<8x128xf32>
    %314 = vector.broadcast %4 : vector<1x128xf32> to vector<8x128xf32>
    %315 = arith.mulf %313, %314 : vector<8x128xf32>
    %cst_93 = arith.constant dense<0.000000e+00> : vector<8xf32>
    %316 = vector.multi_reduction <add>, %315, %cst_93 [1] : vector<8x128xf32> to vector<8xf32>
    %317 = vector.shape_cast %316 : vector<8xf32> to vector<8x1xf32>
    %cst_94 = arith.constant 3.125000e-02 : f32
    %318 = vector.broadcast %cst_94 : f32 to vector<8x1xf32>
    %319 = arith.mulf %317, %318 : vector<8x1xf32>
    %320 = vector.broadcast %319 : vector<8x1xf32> to vector<8x128xf32>
    %321 = arith.subf %313, %320 : vector<8x128xf32>
    %322 = vector.broadcast %4 : vector<1x128xf32> to vector<8x128xf32>
    %323 = arith.mulf %321, %322 : vector<8x128xf32>
    %324 = arith.mulf %323, %323 : vector<8x128xf32>
    %cst_95 = arith.constant dense<0.000000e+00> : vector<8xf32>
    %325 = vector.multi_reduction <add>, %324, %cst_95 [1] : vector<8x128xf32> to vector<8xf32>
    %326 = vector.shape_cast %325 : vector<8xf32> to vector<8x1xf32>
    %cst_96 = arith.constant 3.125000e-02 : f32
    %327 = vector.broadcast %cst_96 : f32 to vector<8x1xf32>
    %328 = arith.mulf %326, %327 : vector<8x1xf32>
    %cst_97 = arith.constant 9.99999974E-6 : f32
    %329 = vector.broadcast %cst_97 : f32 to vector<8x1xf32>
    %330 = arith.addf %328, %329 : vector<8x1xf32>
    %331 = math.rsqrt %330 : vector<8x1xf32>
    %332 = vector.broadcast %331 : vector<8x1xf32> to vector<8x128xf32>
    %333 = arith.mulf %323, %332 : vector<8x128xf32>
    %334 = vector.broadcast %23 : vector<1x128xf32> to vector<8x128xf32>
    %335 = arith.mulf %333, %334 : vector<8x128xf32>
    %336 = vector.broadcast %24 : vector<1x128xf32> to vector<8x128xf32>
    %337 = arith.addf %335, %336 : vector<8x128xf32>
    %338 = arith.index_cast %c4_i32 : i32 to index
    %c0_98 = arith.constant 0 : index
    %c0_99 = arith.constant 0 : index
    %339 = vector.load %arg17[%338, %c0_98, %c0_99] : memref<8x8x128xf32, #tpu.memory_space<vmem>>, vector<1x8x128xf32>
    %340 = vector.shape_cast %339 : vector<1x8x128xf32> to vector<8x128xf32>
    %341 = vector.shape_cast %337 : vector<8x128xf32> to vector<1x8x128xf32>
    tpu.vector_store %arg17[%338, %c0_98, %c0_99], %341 {strides = array<i32>} : memref<8x8x128xf32, #tpu.memory_space<vmem>>, vector<1x8x128xf32>,
    %c5_i32 = arith.constant 5 : i32
    %342 = arith.index_cast %c5_i32 : i32 to index
    %c0_100 = arith.constant 0 : index
    %c0_101 = arith.constant 0 : index
    %343 = vector.load %arg18[%342, %c0_100, %c0_101] : memref<8x8x512xf32, #tpu.memory_space<vmem>>, vector<1x8x512xf32>
    %344 = vector.shape_cast %343 : vector<1x8x512xf32> to vector<8x512xf32>
    %345 = arith.truncf %309 : vector<8x128xf32> to vector<8x128xbf16>
    %cst_102 = arith.constant dense<0.000000e+00> : vector<8x512xf32>
    %346 = tpu.matmul %345, %22, %cst_102 {dimension_numbers = #tpu.dot_dimension_numbers<[1], [0], [0], [1], [0, 0, 1, 1], [], []>} : vector<8x128xbf16>, vector<128x512xbf16>, vector<8x512xf32> -> vector<8x512xf32>
    %347 = arith.addf %344, %346 : vector<8x512xf32>
    %348 = vector.extract_strided_slice %347 {offsets = [0, 0], sizes = [8, 128], strides = [1, 1]} : vector<8x512xf32> to vector<8x128xf32>
    %349 = arith.negf %348 : vector<8x128xf32>
    %350 = math.exp %349 : vector<8x128xf32>
    %cst_103 = arith.constant 1.000000e+00 : f32
    %351 = vector.broadcast %cst_103 : f32 to vector<8x128xf32>
    %352 = arith.addf %351, %350 : vector<8x128xf32>
    %353 = arith.divf %351, %352 : vector<8x128xf32>
    %354 = vector.extract_strided_slice %347 {offsets = [0, 128], sizes = [8, 128], strides = [1, 1]} : vector<8x512xf32> to vector<8x128xf32>
    %355 = arith.negf %354 : vector<8x128xf32>
    %356 = math.exp %355 : vector<8x128xf32>
    %cst_104 = arith.constant 1.000000e+00 : f32
    %357 = vector.broadcast %cst_104 : f32 to vector<8x128xf32>
    %358 = arith.addf %357, %356 : vector<8x128xf32>
    %359 = arith.divf %357, %358 : vector<8x128xf32>
    %360 = vector.extract_strided_slice %347 {offsets = [0, 256], sizes = [8, 128], strides = [1, 1]} : vector<8x512xf32> to vector<8x128xf32>
    %361 = math.tanh %360 : vector<8x128xf32>
    %362 = vector.extract_strided_slice %347 {offsets = [0, 384], sizes = [8, 128], strides = [1, 1]} : vector<8x512xf32> to vector<8x128xf32>
    %363 = arith.negf %362 : vector<8x128xf32>
    %364 = math.exp %363 : vector<8x128xf32>
    %cst_105 = arith.constant 1.000000e+00 : f32
    %365 = vector.broadcast %cst_105 : f32 to vector<8x128xf32>
    %366 = arith.addf %365, %364 : vector<8x128xf32>
    %367 = arith.divf %365, %366 : vector<8x128xf32>
    %368 = arith.mulf %359, %307 : vector<8x128xf32>
    %369 = arith.mulf %353, %361 : vector<8x128xf32>
    %370 = arith.addf %368, %369 : vector<8x128xf32>
    %371 = math.tanh %370 : vector<8x128xf32>
    %372 = arith.mulf %367, %371 : vector<8x128xf32>
    %373 = arith.index_cast %c5_i32 : i32 to index
    %c0_106 = arith.constant 0 : index
    %c0_107 = arith.constant 0 : index
    %374 = vector.load %arg17[%373, %c0_106, %c0_107] : memref<8x8x128xf32, #tpu.memory_space<vmem>>, vector<1x8x128xf32>
    %375 = vector.shape_cast %374 : vector<1x8x128xf32> to vector<8x128xf32>
    %376 = arith.addf %372, %375 : vector<8x128xf32>
    %377 = vector.broadcast %4 : vector<1x128xf32> to vector<8x128xf32>
    %378 = arith.mulf %376, %377 : vector<8x128xf32>
    %cst_108 = arith.constant dense<0.000000e+00> : vector<8xf32>
    %379 = vector.multi_reduction <add>, %378, %cst_108 [1] : vector<8x128xf32> to vector<8xf32>
    %380 = vector.shape_cast %379 : vector<8xf32> to vector<8x1xf32>
    %cst_109 = arith.constant 3.125000e-02 : f32
    %381 = vector.broadcast %cst_109 : f32 to vector<8x1xf32>
    %382 = arith.mulf %380, %381 : vector<8x1xf32>
    %383 = vector.broadcast %382 : vector<8x1xf32> to vector<8x128xf32>
    %384 = arith.subf %376, %383 : vector<8x128xf32>
    %385 = vector.broadcast %4 : vector<1x128xf32> to vector<8x128xf32>
    %386 = arith.mulf %384, %385 : vector<8x128xf32>
    %387 = arith.mulf %386, %386 : vector<8x128xf32>
    %cst_110 = arith.constant dense<0.000000e+00> : vector<8xf32>
    %388 = vector.multi_reduction <add>, %387, %cst_110 [1] : vector<8x128xf32> to vector<8xf32>
    %389 = vector.shape_cast %388 : vector<8xf32> to vector<8x1xf32>
    %cst_111 = arith.constant 3.125000e-02 : f32
    %390 = vector.broadcast %cst_111 : f32 to vector<8x1xf32>
    %391 = arith.mulf %389, %390 : vector<8x1xf32>
    %cst_112 = arith.constant 9.99999974E-6 : f32
    %392 = vector.broadcast %cst_112 : f32 to vector<8x1xf32>
    %393 = arith.addf %391, %392 : vector<8x1xf32>
    %394 = math.rsqrt %393 : vector<8x1xf32>
    %395 = vector.broadcast %394 : vector<8x1xf32> to vector<8x128xf32>
    %396 = arith.mulf %386, %395 : vector<8x128xf32>
    %397 = vector.broadcast %23 : vector<1x128xf32> to vector<8x128xf32>
    %398 = arith.mulf %396, %397 : vector<8x128xf32>
    %399 = vector.broadcast %24 : vector<1x128xf32> to vector<8x128xf32>
    %400 = arith.addf %398, %399 : vector<8x128xf32>
    %401 = arith.index_cast %c5_i32 : i32 to index
    %c0_113 = arith.constant 0 : index
    %c0_114 = arith.constant 0 : index
    %402 = vector.load %arg17[%401, %c0_113, %c0_114] : memref<8x8x128xf32, #tpu.memory_space<vmem>>, vector<1x8x128xf32>
    %403 = vector.shape_cast %402 : vector<1x8x128xf32> to vector<8x128xf32>
    %404 = vector.shape_cast %400 : vector<8x128xf32> to vector<1x8x128xf32>
    tpu.vector_store %arg17[%401, %c0_113, %c0_114], %404 {strides = array<i32>} : memref<8x8x128xf32, #tpu.memory_space<vmem>>, vector<1x8x128xf32>,
    %c6_i32 = arith.constant 6 : i32
    %405 = arith.index_cast %c6_i32 : i32 to index
    %c0_115 = arith.constant 0 : index
    %c0_116 = arith.constant 0 : index
    %406 = vector.load %arg18[%405, %c0_115, %c0_116] : memref<8x8x512xf32, #tpu.memory_space<vmem>>, vector<1x8x512xf32>
    %407 = vector.shape_cast %406 : vector<1x8x512xf32> to vector<8x512xf32>
    %408 = arith.truncf %372 : vector<8x128xf32> to vector<8x128xbf16>
    %cst_117 = arith.constant dense<0.000000e+00> : vector<8x512xf32>
    %409 = tpu.matmul %408, %22, %cst_117 {dimension_numbers = #tpu.dot_dimension_numbers<[1], [0], [0], [1], [0, 0, 1, 1], [], []>} : vector<8x128xbf16>, vector<128x512xbf16>, vector<8x512xf32> -> vector<8x512xf32>
    %410 = arith.addf %407, %409 : vector<8x512xf32>
    %411 = vector.extract_strided_slice %410 {offsets = [0, 0], sizes = [8, 128], strides = [1, 1]} : vector<8x512xf32> to vector<8x128xf32>
    %412 = arith.negf %411 : vector<8x128xf32>
    %413 = math.exp %412 : vector<8x128xf32>
    %cst_118 = arith.constant 1.000000e+00 : f32
    %414 = vector.broadcast %cst_118 : f32 to vector<8x128xf32>
    %415 = arith.addf %414, %413 : vector<8x128xf32>
    %416 = arith.divf %414, %415 : vector<8x128xf32>
    %417 = vector.extract_strided_slice %410 {offsets = [0, 128], sizes = [8, 128], strides = [1, 1]} : vector<8x512xf32> to vector<8x128xf32>
    %418 = arith.negf %417 : vector<8x128xf32>
    %419 = math.exp %418 : vector<8x128xf32>
    %cst_119 = arith.constant 1.000000e+00 : f32
    %420 = vector.broadcast %cst_119 : f32 to vector<8x128xf32>
    %421 = arith.addf %420, %419 : vector<8x128xf32>
    %422 = arith.divf %420, %421 : vector<8x128xf32>
    %423 = vector.extract_strided_slice %410 {offsets = [0, 256], sizes = [8, 128], strides = [1, 1]} : vector<8x512xf32> to vector<8x128xf32>
    %424 = math.tanh %423 : vector<8x128xf32>
    %425 = vector.extract_strided_slice %410 {offsets = [0, 384], sizes = [8, 128], strides = [1, 1]} : vector<8x512xf32> to vector<8x128xf32>
    %426 = arith.negf %425 : vector<8x128xf32>
    %427 = math.exp %426 : vector<8x128xf32>
    %cst_120 = arith.constant 1.000000e+00 : f32
    %428 = vector.broadcast %cst_120 : f32 to vector<8x128xf32>
    %429 = arith.addf %428, %427 : vector<8x128xf32>
    %430 = arith.divf %428, %429 : vector<8x128xf32>
    %431 = arith.mulf %422, %370 : vector<8x128xf32>
    %432 = arith.mulf %416, %424 : vector<8x128xf32>
    %433 = arith.addf %431, %432 : vector<8x128xf32>
    %434 = math.tanh %433 : vector<8x128xf32>
    %435 = arith.mulf %430, %434 : vector<8x128xf32>
    %436 = arith.index_cast %c6_i32 : i32 to index
    %c0_121 = arith.constant 0 : index
    %c0_122 = arith.constant 0 : index
    %437 = vector.load %arg17[%436, %c0_121, %c0_122] : memref<8x8x128xf32, #tpu.memory_space<vmem>>, vector<1x8x128xf32>
    %438 = vector.shape_cast %437 : vector<1x8x128xf32> to vector<8x128xf32>
    %439 = arith.addf %435, %438 : vector<8x128xf32>
    %440 = vector.broadcast %4 : vector<1x128xf32> to vector<8x128xf32>
    %441 = arith.mulf %439, %440 : vector<8x128xf32>
    %cst_123 = arith.constant dense<0.000000e+00> : vector<8xf32>
    %442 = vector.multi_reduction <add>, %441, %cst_123 [1] : vector<8x128xf32> to vector<8xf32>
    %443 = vector.shape_cast %442 : vector<8xf32> to vector<8x1xf32>
    %cst_124 = arith.constant 3.125000e-02 : f32
    %444 = vector.broadcast %cst_124 : f32 to vector<8x1xf32>
    %445 = arith.mulf %443, %444 : vector<8x1xf32>
    %446 = vector.broadcast %445 : vector<8x1xf32> to vector<8x128xf32>
    %447 = arith.subf %439, %446 : vector<8x128xf32>
    %448 = vector.broadcast %4 : vector<1x128xf32> to vector<8x128xf32>
    %449 = arith.mulf %447, %448 : vector<8x128xf32>
    %450 = arith.mulf %449, %449 : vector<8x128xf32>
    %cst_125 = arith.constant dense<0.000000e+00> : vector<8xf32>
    %451 = vector.multi_reduction <add>, %450, %cst_125 [1] : vector<8x128xf32> to vector<8xf32>
    %452 = vector.shape_cast %451 : vector<8xf32> to vector<8x1xf32>
    %cst_126 = arith.constant 3.125000e-02 : f32
    %453 = vector.broadcast %cst_126 : f32 to vector<8x1xf32>
    %454 = arith.mulf %452, %453 : vector<8x1xf32>
    %cst_127 = arith.constant 9.99999974E-6 : f32
    %455 = vector.broadcast %cst_127 : f32 to vector<8x1xf32>
    %456 = arith.addf %454, %455 : vector<8x1xf32>
    %457 = math.rsqrt %456 : vector<8x1xf32>
    %458 = vector.broadcast %457 : vector<8x1xf32> to vector<8x128xf32>
    %459 = arith.mulf %449, %458 : vector<8x128xf32>
    %460 = vector.broadcast %23 : vector<1x128xf32> to vector<8x128xf32>
    %461 = arith.mulf %459, %460 : vector<8x128xf32>
    %462 = vector.broadcast %24 : vector<1x128xf32> to vector<8x128xf32>
    %463 = arith.addf %461, %462 : vector<8x128xf32>
    %464 = arith.index_cast %c6_i32 : i32 to index
    %c0_128 = arith.constant 0 : index
    %c0_129 = arith.constant 0 : index
    %465 = vector.load %arg17[%464, %c0_128, %c0_129] : memref<8x8x128xf32, #tpu.memory_space<vmem>>, vector<1x8x128xf32>
    %466 = vector.shape_cast %465 : vector<1x8x128xf32> to vector<8x128xf32>
    %467 = vector.shape_cast %463 : vector<8x128xf32> to vector<1x8x128xf32>
    tpu.vector_store %arg17[%464, %c0_128, %c0_129], %467 {strides = array<i32>} : memref<8x8x128xf32, #tpu.memory_space<vmem>>, vector<1x8x128xf32>,
    %c7_i32 = arith.constant 7 : i32
    %468 = arith.index_cast %c7_i32 : i32 to index
    %c0_130 = arith.constant 0 : index
    %c0_131 = arith.constant 0 : index
    %469 = vector.load %arg18[%468, %c0_130, %c0_131] : memref<8x8x512xf32, #tpu.memory_space<vmem>>, vector<1x8x512xf32>
    %470 = vector.shape_cast %469 : vector<1x8x512xf32> to vector<8x512xf32>
    %471 = arith.truncf %435 : vector<8x128xf32> to vector<8x128xbf16>
    %cst_132 = arith.constant dense<0.000000e+00> : vector<8x512xf32>
    %472 = tpu.matmul %471, %22, %cst_132 {dimension_numbers = #tpu.dot_dimension_numbers<[1], [0], [0], [1], [0, 0, 1, 1], [], []>} : vector<8x128xbf16>, vector<128x512xbf16>, vector<8x512xf32> -> vector<8x512xf32>
    %473 = arith.addf %470, %472 : vector<8x512xf32>
    %474 = vector.extract_strided_slice %473 {offsets = [0, 0], sizes = [8, 128], strides = [1, 1]} : vector<8x512xf32> to vector<8x128xf32>
    %475 = arith.negf %474 : vector<8x128xf32>
    %476 = math.exp %475 : vector<8x128xf32>
    %cst_133 = arith.constant 1.000000e+00 : f32
    %477 = vector.broadcast %cst_133 : f32 to vector<8x128xf32>
    %478 = arith.addf %477, %476 : vector<8x128xf32>
    %479 = arith.divf %477, %478 : vector<8x128xf32>
    %480 = vector.extract_strided_slice %473 {offsets = [0, 128], sizes = [8, 128], strides = [1, 1]} : vector<8x512xf32> to vector<8x128xf32>
    %481 = arith.negf %480 : vector<8x128xf32>
    %482 = math.exp %481 : vector<8x128xf32>
    %cst_134 = arith.constant 1.000000e+00 : f32
    %483 = vector.broadcast %cst_134 : f32 to vector<8x128xf32>
    %484 = arith.addf %483, %482 : vector<8x128xf32>
    %485 = arith.divf %483, %484 : vector<8x128xf32>
    %486 = vector.extract_strided_slice %473 {offsets = [0, 256], sizes = [8, 128], strides = [1, 1]} : vector<8x512xf32> to vector<8x128xf32>
    %487 = math.tanh %486 : vector<8x128xf32>
    %488 = vector.extract_strided_slice %473 {offsets = [0, 384], sizes = [8, 128], strides = [1, 1]} : vector<8x512xf32> to vector<8x128xf32>
    %489 = arith.negf %488 : vector<8x128xf32>
    %490 = math.exp %489 : vector<8x128xf32>
    %cst_135 = arith.constant 1.000000e+00 : f32
    %491 = vector.broadcast %cst_135 : f32 to vector<8x128xf32>
    %492 = arith.addf %491, %490 : vector<8x128xf32>
    %493 = arith.divf %491, %492 : vector<8x128xf32>
    %494 = arith.mulf %485, %433 : vector<8x128xf32>
    %495 = arith.mulf %479, %487 : vector<8x128xf32>
    %496 = arith.addf %494, %495 : vector<8x128xf32>
    %497 = math.tanh %496 : vector<8x128xf32>
    %498 = arith.mulf %493, %497 : vector<8x128xf32>
    %499 = arith.index_cast %c7_i32 : i32 to index
    %c0_136 = arith.constant 0 : index
    %c0_137 = arith.constant 0 : index
    %500 = vector.load %arg17[%499, %c0_136, %c0_137] : memref<8x8x128xf32, #tpu.memory_space<vmem>>, vector<1x8x128xf32>
    %501 = vector.shape_cast %500 : vector<1x8x128xf32> to vector<8x128xf32>
    %502 = arith.addf %498, %501 : vector<8x128xf32>
    %503 = vector.broadcast %4 : vector<1x128xf32> to vector<8x128xf32>
    %504 = arith.mulf %502, %503 : vector<8x128xf32>
    %cst_138 = arith.constant dense<0.000000e+00> : vector<8xf32>
    %505 = vector.multi_reduction <add>, %504, %cst_138 [1] : vector<8x128xf32> to vector<8xf32>
    %506 = vector.shape_cast %505 : vector<8xf32> to vector<8x1xf32>
    %cst_139 = arith.constant 3.125000e-02 : f32
    %507 = vector.broadcast %cst_139 : f32 to vector<8x1xf32>
    %508 = arith.mulf %506, %507 : vector<8x1xf32>
    %509 = vector.broadcast %508 : vector<8x1xf32> to vector<8x128xf32>
    %510 = arith.subf %502, %509 : vector<8x128xf32>
    %511 = vector.broadcast %4 : vector<1x128xf32> to vector<8x128xf32>
    %512 = arith.mulf %510, %511 : vector<8x128xf32>
    %513 = arith.mulf %512, %512 : vector<8x128xf32>
    %cst_140 = arith.constant dense<0.000000e+00> : vector<8xf32>
    %514 = vector.multi_reduction <add>, %513, %cst_140 [1] : vector<8x128xf32> to vector<8xf32>
    %515 = vector.shape_cast %514 : vector<8xf32> to vector<8x1xf32>
    %cst_141 = arith.constant 3.125000e-02 : f32
    %516 = vector.broadcast %cst_141 : f32 to vector<8x1xf32>
    %517 = arith.mulf %515, %516 : vector<8x1xf32>
    %cst_142 = arith.constant 9.99999974E-6 : f32
    %518 = vector.broadcast %cst_142 : f32 to vector<8x1xf32>
    %519 = arith.addf %517, %518 : vector<8x1xf32>
    %520 = math.rsqrt %519 : vector<8x1xf32>
    %521 = vector.broadcast %520 : vector<8x1xf32> to vector<8x128xf32>
    %522 = arith.mulf %512, %521 : vector<8x128xf32>
    %523 = vector.broadcast %23 : vector<1x128xf32> to vector<8x128xf32>
    %524 = arith.mulf %522, %523 : vector<8x128xf32>
    %525 = vector.broadcast %24 : vector<1x128xf32> to vector<8x128xf32>
    %526 = arith.addf %524, %525 : vector<8x128xf32>
    %527 = arith.index_cast %c7_i32 : i32 to index
    %c0_143 = arith.constant 0 : index
    %c0_144 = arith.constant 0 : index
    %528 = vector.load %arg17[%527, %c0_143, %c0_144] : memref<8x8x128xf32, #tpu.memory_space<vmem>>, vector<1x8x128xf32>
    %529 = vector.shape_cast %528 : vector<1x8x128xf32> to vector<8x128xf32>
    %530 = vector.shape_cast %526 : vector<8x128xf32> to vector<1x8x128xf32>
    tpu.vector_store %arg17[%527, %c0_143, %c0_144], %530 {strides = array<i32>} : memref<8x8x128xf32, #tpu.memory_space<vmem>>, vector<1x8x128xf32>,
    %c8_i32 = arith.constant 8 : i32
    %c0_145 = arith.constant 0 : index
    %c0_146 = arith.constant 0 : index
    %c0_147 = arith.constant 0 : index
    %531 = vector.load %arg17[%c0_145, %c0_146, %c0_147] : memref<8x8x128xf32, #tpu.memory_space<vmem>>, vector<8x8x128xf32>
    %532 = vector.shape_cast %531 : vector<8x8x128xf32> to vector<64x128xf32>
    %533 = arith.truncf %532 : vector<64x128xf32> to vector<64x128xbf16>
    %c0_148 = arith.constant 0 : index
    %c0_149 = arith.constant 0 : index
    %534 = vector.load %arg9[%c0_148, %c0_149] : memref<128x512xbf16, #tpu.memory_space<vmem>>, vector<128x512xbf16>
    %cst_150 = arith.constant dense<0.000000e+00> : vector<64x512xf32>
    %535 = tpu.matmul %533, %534, %cst_150 {dimension_numbers = #tpu.dot_dimension_numbers<[1], [0], [0], [1], [0, 0, 1, 1], [], []>} : vector<64x128xbf16>, vector<128x512xbf16>, vector<64x512xf32> -> vector<64x512xf32>
    %c0_151 = arith.constant 0 : index
    %c0_152 = arith.constant 0 : index
    %536 = vector.load %arg11[%c0_151, %c0_152] : memref<1x512xf32, #tpu.memory_space<vmem>>, vector<1x512xf32>
    %537 = vector.broadcast %536 : vector<1x512xf32> to vector<64x512xf32>
    %538 = arith.addf %535, %537 : vector<64x512xf32>
    %539 = vector.shape_cast %538 : vector<64x512xf32> to vector<8x8x512xf32>
    %c0_153 = arith.constant 0 : index
    %c0_154 = arith.constant 0 : index
    %c0_155 = arith.constant 0 : index
    %540 = vector.load %arg18[%c0_153, %c0_154, %c0_155] : memref<8x8x512xf32, #tpu.memory_space<vmem>>, vector<8x8x512xf32>
    tpu.vector_store %arg18[%c0_153, %c0_154, %c0_155], %539 {strides = array<i32>} : memref<8x8x512xf32, #tpu.memory_space<vmem>>, vector<8x8x512xf32>,
    %c0_156 = arith.constant 0 : index
    %c0_157 = arith.constant 0 : index
    %541 = vector.load %arg10[%c0_156, %c0_157] : memref<128x512xbf16, #tpu.memory_space<vmem>>, vector<128x512xbf16>
    %c0_158 = arith.constant 0 : index
    %c0_159 = arith.constant 0 : index
    %542 = vector.load %arg12[%c0_158, %c0_159] : memref<1x128xf32, #tpu.memory_space<vmem>>, vector<1x128xf32>
    %c0_160 = arith.constant 0 : index
    %c0_161 = arith.constant 0 : index
    %543 = vector.load %arg13[%c0_160, %c0_161] : memref<1x128xf32, #tpu.memory_space<vmem>>, vector<1x128xf32>
    %cst_162 = arith.constant 0.000000e+00 : f32
    %544 = vector.broadcast %cst_162 : f32 to vector<8x128xf32>
    %cst_163 = arith.constant 0.000000e+00 : f32
    %545 = vector.broadcast %cst_163 : f32 to vector<8x128xf32>
    %c0_i32_164 = arith.constant 0 : i32
    %546 = arith.index_cast %c0_i32_164 : i32 to index
    %c0_165 = arith.constant 0 : index
    %c0_166 = arith.constant 0 : index
    %547 = vector.load %arg18[%546, %c0_165, %c0_166] : memref<8x8x512xf32, #tpu.memory_space<vmem>>, vector<1x8x512xf32>
    %548 = vector.shape_cast %547 : vector<1x8x512xf32> to vector<8x512xf32>
    %549 = arith.truncf %544 : vector<8x128xf32> to vector<8x128xbf16>
    %cst_167 = arith.constant dense<0.000000e+00> : vector<8x512xf32>
    %550 = tpu.matmul %549, %541, %cst_167 {dimension_numbers = #tpu.dot_dimension_numbers<[1], [0], [0], [1], [0, 0, 1, 1], [], []>} : vector<8x128xbf16>, vector<128x512xbf16>, vector<8x512xf32> -> vector<8x512xf32>
    %551 = arith.addf %548, %550 : vector<8x512xf32>
    %552 = vector.extract_strided_slice %551 {offsets = [0, 0], sizes = [8, 128], strides = [1, 1]} : vector<8x512xf32> to vector<8x128xf32>
    %553 = arith.negf %552 : vector<8x128xf32>
    %554 = math.exp %553 : vector<8x128xf32>
    %cst_168 = arith.constant 1.000000e+00 : f32
    %555 = vector.broadcast %cst_168 : f32 to vector<8x128xf32>
    %556 = arith.addf %555, %554 : vector<8x128xf32>
    %557 = arith.divf %555, %556 : vector<8x128xf32>
    %558 = vector.extract_strided_slice %551 {offsets = [0, 128], sizes = [8, 128], strides = [1, 1]} : vector<8x512xf32> to vector<8x128xf32>
    %559 = arith.negf %558 : vector<8x128xf32>
    %560 = math.exp %559 : vector<8x128xf32>
    %cst_169 = arith.constant 1.000000e+00 : f32
    %561 = vector.broadcast %cst_169 : f32 to vector<8x128xf32>
    %562 = arith.addf %561, %560 : vector<8x128xf32>
    %563 = arith.divf %561, %562 : vector<8x128xf32>
    %564 = vector.extract_strided_slice %551 {offsets = [0, 256], sizes = [8, 128], strides = [1, 1]} : vector<8x512xf32> to vector<8x128xf32>
    %565 = math.tanh %564 : vector<8x128xf32>
    %566 = vector.extract_strided_slice %551 {offsets = [0, 384], sizes = [8, 128], strides = [1, 1]} : vector<8x512xf32> to vector<8x128xf32>
    %567 = arith.negf %566 : vector<8x128xf32>
    %568 = math.exp %567 : vector<8x128xf32>
    %cst_170 = arith.constant 1.000000e+00 : f32
    %569 = vector.broadcast %cst_170 : f32 to vector<8x128xf32>
    %570 = arith.addf %569, %568 : vector<8x128xf32>
    %571 = arith.divf %569, %570 : vector<8x128xf32>
    %572 = arith.mulf %563, %545 : vector<8x128xf32>
    %573 = arith.mulf %557, %565 : vector<8x128xf32>
    %574 = arith.addf %572, %573 : vector<8x128xf32>
    %575 = math.tanh %574 : vector<8x128xf32>
    %576 = arith.mulf %571, %575 : vector<8x128xf32>
    %c1_i32_171 = arith.constant 1 : i32
    %577 = arith.index_cast %c1_i32_171 : i32 to index
    %c0_172 = arith.constant 0 : index
    %c0_173 = arith.constant 0 : index
    %578 = vector.load %arg18[%577, %c0_172, %c0_173] : memref<8x8x512xf32, #tpu.memory_space<vmem>>, vector<1x8x512xf32>
    %579 = vector.shape_cast %578 : vector<1x8x512xf32> to vector<8x512xf32>
    %580 = arith.truncf %576 : vector<8x128xf32> to vector<8x128xbf16>
    %cst_174 = arith.constant dense<0.000000e+00> : vector<8x512xf32>
    %581 = tpu.matmul %580, %541, %cst_174 {dimension_numbers = #tpu.dot_dimension_numbers<[1], [0], [0], [1], [0, 0, 1, 1], [], []>} : vector<8x128xbf16>, vector<128x512xbf16>, vector<8x512xf32> -> vector<8x512xf32>
    %582 = arith.addf %579, %581 : vector<8x512xf32>
    %583 = vector.extract_strided_slice %582 {offsets = [0, 0], sizes = [8, 128], strides = [1, 1]} : vector<8x512xf32> to vector<8x128xf32>
    %584 = arith.negf %583 : vector<8x128xf32>
    %585 = math.exp %584 : vector<8x128xf32>
    %cst_175 = arith.constant 1.000000e+00 : f32
    %586 = vector.broadcast %cst_175 : f32 to vector<8x128xf32>
    %587 = arith.addf %586, %585 : vector<8x128xf32>
    %588 = arith.divf %586, %587 : vector<8x128xf32>
    %589 = vector.extract_strided_slice %582 {offsets = [0, 128], sizes = [8, 128], strides = [1, 1]} : vector<8x512xf32> to vector<8x128xf32>
    %590 = arith.negf %589 : vector<8x128xf32>
    %591 = math.exp %590 : vector<8x128xf32>
    %cst_176 = arith.constant 1.000000e+00 : f32
    %592 = vector.broadcast %cst_176 : f32 to vector<8x128xf32>
    %593 = arith.addf %592, %591 : vector<8x128xf32>
    %594 = arith.divf %592, %593 : vector<8x128xf32>
    %595 = vector.extract_strided_slice %582 {offsets = [0, 256], sizes = [8, 128], strides = [1, 1]} : vector<8x512xf32> to vector<8x128xf32>
    %596 = math.tanh %595 : vector<8x128xf32>
    %597 = vector.extract_strided_slice %582 {offsets = [0, 384], sizes = [8, 128], strides = [1, 1]} : vector<8x512xf32> to vector<8x128xf32>
    %598 = arith.negf %597 : vector<8x128xf32>
    %599 = math.exp %598 : vector<8x128xf32>
    %cst_177 = arith.constant 1.000000e+00 : f32
    %600 = vector.broadcast %cst_177 : f32 to vector<8x128xf32>
    %601 = arith.addf %600, %599 : vector<8x128xf32>
    %602 = arith.divf %600, %601 : vector<8x128xf32>
    %603 = arith.mulf %594, %574 : vector<8x128xf32>
    %604 = arith.mulf %588, %596 : vector<8x128xf32>
    %605 = arith.addf %603, %604 : vector<8x128xf32>
    %606 = math.tanh %605 : vector<8x128xf32>
    %607 = arith.mulf %602, %606 : vector<8x128xf32>
    %c2_i32_178 = arith.constant 2 : i32
    %608 = arith.index_cast %c2_i32_178 : i32 to index
    %c0_179 = arith.constant 0 : index
    %c0_180 = arith.constant 0 : index
    %609 = vector.load %arg18[%608, %c0_179, %c0_180] : memref<8x8x512xf32, #tpu.memory_space<vmem>>, vector<1x8x512xf32>
    %610 = vector.shape_cast %609 : vector<1x8x512xf32> to vector<8x512xf32>
    %611 = arith.truncf %607 : vector<8x128xf32> to vector<8x128xbf16>
    %cst_181 = arith.constant dense<0.000000e+00> : vector<8x512xf32>
    %612 = tpu.matmul %611, %541, %cst_181 {dimension_numbers = #tpu.dot_dimension_numbers<[1], [0], [0], [1], [0, 0, 1, 1], [], []>} : vector<8x128xbf16>, vector<128x512xbf16>, vector<8x512xf32> -> vector<8x512xf32>
    %613 = arith.addf %610, %612 : vector<8x512xf32>
    %614 = vector.extract_strided_slice %613 {offsets = [0, 0], sizes = [8, 128], strides = [1, 1]} : vector<8x512xf32> to vector<8x128xf32>
    %615 = arith.negf %614 : vector<8x128xf32>
    %616 = math.exp %615 : vector<8x128xf32>
    %cst_182 = arith.constant 1.000000e+00 : f32
    %617 = vector.broadcast %cst_182 : f32 to vector<8x128xf32>
    %618 = arith.addf %617, %616 : vector<8x128xf32>
    %619 = arith.divf %617, %618 : vector<8x128xf32>
    %620 = vector.extract_strided_slice %613 {offsets = [0, 128], sizes = [8, 128], strides = [1, 1]} : vector<8x512xf32> to vector<8x128xf32>
    %621 = arith.negf %620 : vector<8x128xf32>
    %622 = math.exp %621 : vector<8x128xf32>
    %cst_183 = arith.constant 1.000000e+00 : f32
    %623 = vector.broadcast %cst_183 : f32 to vector<8x128xf32>
    %624 = arith.addf %623, %622 : vector<8x128xf32>
    %625 = arith.divf %623, %624 : vector<8x128xf32>
    %626 = vector.extract_strided_slice %613 {offsets = [0, 256], sizes = [8, 128], strides = [1, 1]} : vector<8x512xf32> to vector<8x128xf32>
    %627 = math.tanh %626 : vector<8x128xf32>
    %628 = vector.extract_strided_slice %613 {offsets = [0, 384], sizes = [8, 128], strides = [1, 1]} : vector<8x512xf32> to vector<8x128xf32>
    %629 = arith.negf %628 : vector<8x128xf32>
    %630 = math.exp %629 : vector<8x128xf32>
    %cst_184 = arith.constant 1.000000e+00 : f32
    %631 = vector.broadcast %cst_184 : f32 to vector<8x128xf32>
    %632 = arith.addf %631, %630 : vector<8x128xf32>
    %633 = arith.divf %631, %632 : vector<8x128xf32>
    %634 = arith.mulf %625, %605 : vector<8x128xf32>
    %635 = arith.mulf %619, %627 : vector<8x128xf32>
    %636 = arith.addf %634, %635 : vector<8x128xf32>
    %637 = math.tanh %636 : vector<8x128xf32>
    %638 = arith.mulf %633, %637 : vector<8x128xf32>
    %c3_i32_185 = arith.constant 3 : i32
    %639 = arith.index_cast %c3_i32_185 : i32 to index
    %c0_186 = arith.constant 0 : index
    %c0_187 = arith.constant 0 : index
    %640 = vector.load %arg18[%639, %c0_186, %c0_187] : memref<8x8x512xf32, #tpu.memory_space<vmem>>, vector<1x8x512xf32>
    %641 = vector.shape_cast %640 : vector<1x8x512xf32> to vector<8x512xf32>
    %642 = arith.truncf %638 : vector<8x128xf32> to vector<8x128xbf16>
    %cst_188 = arith.constant dense<0.000000e+00> : vector<8x512xf32>
    %643 = tpu.matmul %642, %541, %cst_188 {dimension_numbers = #tpu.dot_dimension_numbers<[1], [0], [0], [1], [0, 0, 1, 1], [], []>} : vector<8x128xbf16>, vector<128x512xbf16>, vector<8x512xf32> -> vector<8x512xf32>
    %644 = arith.addf %641, %643 : vector<8x512xf32>
    %645 = vector.extract_strided_slice %644 {offsets = [0, 0], sizes = [8, 128], strides = [1, 1]} : vector<8x512xf32> to vector<8x128xf32>
    %646 = arith.negf %645 : vector<8x128xf32>
    %647 = math.exp %646 : vector<8x128xf32>
    %cst_189 = arith.constant 1.000000e+00 : f32
    %648 = vector.broadcast %cst_189 : f32 to vector<8x128xf32>
    %649 = arith.addf %648, %647 : vector<8x128xf32>
    %650 = arith.divf %648, %649 : vector<8x128xf32>
    %651 = vector.extract_strided_slice %644 {offsets = [0, 128], sizes = [8, 128], strides = [1, 1]} : vector<8x512xf32> to vector<8x128xf32>
    %652 = arith.negf %651 : vector<8x128xf32>
    %653 = math.exp %652 : vector<8x128xf32>
    %cst_190 = arith.constant 1.000000e+00 : f32
    %654 = vector.broadcast %cst_190 : f32 to vector<8x128xf32>
    %655 = arith.addf %654, %653 : vector<8x128xf32>
    %656 = arith.divf %654, %655 : vector<8x128xf32>
    %657 = vector.extract_strided_slice %644 {offsets = [0, 256], sizes = [8, 128], strides = [1, 1]} : vector<8x512xf32> to vector<8x128xf32>
    %658 = math.tanh %657 : vector<8x128xf32>
    %659 = vector.extract_strided_slice %644 {offsets = [0, 384], sizes = [8, 128], strides = [1, 1]} : vector<8x512xf32> to vector<8x128xf32>
    %660 = arith.negf %659 : vector<8x128xf32>
    %661 = math.exp %660 : vector<8x128xf32>
    %cst_191 = arith.constant 1.000000e+00 : f32
    %662 = vector.broadcast %cst_191 : f32 to vector<8x128xf32>
    %663 = arith.addf %662, %661 : vector<8x128xf32>
    %664 = arith.divf %662, %663 : vector<8x128xf32>
    %665 = arith.mulf %656, %636 : vector<8x128xf32>
    %666 = arith.mulf %650, %658 : vector<8x128xf32>
    %667 = arith.addf %665, %666 : vector<8x128xf32>
    %668 = math.tanh %667 : vector<8x128xf32>
    %669 = arith.mulf %664, %668 : vector<8x128xf32>
    %c4_i32_192 = arith.constant 4 : i32
    %670 = arith.index_cast %c4_i32_192 : i32 to index
    %c0_193 = arith.constant 0 : index
    %c0_194 = arith.constant 0 : index
    %671 = vector.load %arg18[%670, %c0_193, %c0_194] : memref<8x8x512xf32, #tpu.memory_space<vmem>>, vector<1x8x512xf32>
    %672 = vector.shape_cast %671 : vector<1x8x512xf32> to vector<8x512xf32>
    %673 = arith.truncf %669 : vector<8x128xf32> to vector<8x128xbf16>
    %cst_195 = arith.constant dense<0.000000e+00> : vector<8x512xf32>
    %674 = tpu.matmul %673, %541, %cst_195 {dimension_numbers = #tpu.dot_dimension_numbers<[1], [0], [0], [1], [0, 0, 1, 1], [], []>} : vector<8x128xbf16>, vector<128x512xbf16>, vector<8x512xf32> -> vector<8x512xf32>
    %675 = arith.addf %672, %674 : vector<8x512xf32>
    %676 = vector.extract_strided_slice %675 {offsets = [0, 0], sizes = [8, 128], strides = [1, 1]} : vector<8x512xf32> to vector<8x128xf32>
    %677 = arith.negf %676 : vector<8x128xf32>
    %678 = math.exp %677 : vector<8x128xf32>
    %cst_196 = arith.constant 1.000000e+00 : f32
    %679 = vector.broadcast %cst_196 : f32 to vector<8x128xf32>
    %680 = arith.addf %679, %678 : vector<8x128xf32>
    %681 = arith.divf %679, %680 : vector<8x128xf32>
    %682 = vector.extract_strided_slice %675 {offsets = [0, 128], sizes = [8, 128], strides = [1, 1]} : vector<8x512xf32> to vector<8x128xf32>
    %683 = arith.negf %682 : vector<8x128xf32>
    %684 = math.exp %683 : vector<8x128xf32>
    %cst_197 = arith.constant 1.000000e+00 : f32
    %685 = vector.broadcast %cst_197 : f32 to vector<8x128xf32>
    %686 = arith.addf %685, %684 : vector<8x128xf32>
    %687 = arith.divf %685, %686 : vector<8x128xf32>
    %688 = vector.extract_strided_slice %675 {offsets = [0, 256], sizes = [8, 128], strides = [1, 1]} : vector<8x512xf32> to vector<8x128xf32>
    %689 = math.tanh %688 : vector<8x128xf32>
    %690 = vector.extract_strided_slice %675 {offsets = [0, 384], sizes = [8, 128], strides = [1, 1]} : vector<8x512xf32> to vector<8x128xf32>
    %691 = arith.negf %690 : vector<8x128xf32>
    %692 = math.exp %691 : vector<8x128xf32>
    %cst_198 = arith.constant 1.000000e+00 : f32
    %693 = vector.broadcast %cst_198 : f32 to vector<8x128xf32>
    %694 = arith.addf %693, %692 : vector<8x128xf32>
    %695 = arith.divf %693, %694 : vector<8x128xf32>
    %696 = arith.mulf %687, %667 : vector<8x128xf32>
    %697 = arith.mulf %681, %689 : vector<8x128xf32>
    %698 = arith.addf %696, %697 : vector<8x128xf32>
    %699 = math.tanh %698 : vector<8x128xf32>
    %700 = arith.mulf %695, %699 : vector<8x128xf32>
    %c5_i32_199 = arith.constant 5 : i32
    %701 = arith.index_cast %c5_i32_199 : i32 to index
    %c0_200 = arith.constant 0 : index
    %c0_201 = arith.constant 0 : index
    %702 = vector.load %arg18[%701, %c0_200, %c0_201] : memref<8x8x512xf32, #tpu.memory_space<vmem>>, vector<1x8x512xf32>
    %703 = vector.shape_cast %702 : vector<1x8x512xf32> to vector<8x512xf32>
    %704 = arith.truncf %700 : vector<8x128xf32> to vector<8x128xbf16>
    %cst_202 = arith.constant dense<0.000000e+00> : vector<8x512xf32>
    %705 = tpu.matmul %704, %541, %cst_202 {dimension_numbers = #tpu.dot_dimension_numbers<[1], [0], [0], [1], [0, 0, 1, 1], [], []>} : vector<8x128xbf16>, vector<128x512xbf16>, vector<8x512xf32> -> vector<8x512xf32>
    %706 = arith.addf %703, %705 : vector<8x512xf32>
    %707 = vector.extract_strided_slice %706 {offsets = [0, 0], sizes = [8, 128], strides = [1, 1]} : vector<8x512xf32> to vector<8x128xf32>
    %708 = arith.negf %707 : vector<8x128xf32>
    %709 = math.exp %708 : vector<8x128xf32>
    %cst_203 = arith.constant 1.000000e+00 : f32
    %710 = vector.broadcast %cst_203 : f32 to vector<8x128xf32>
    %711 = arith.addf %710, %709 : vector<8x128xf32>
    %712 = arith.divf %710, %711 : vector<8x128xf32>
    %713 = vector.extract_strided_slice %706 {offsets = [0, 128], sizes = [8, 128], strides = [1, 1]} : vector<8x512xf32> to vector<8x128xf32>
    %714 = arith.negf %713 : vector<8x128xf32>
    %715 = math.exp %714 : vector<8x128xf32>
    %cst_204 = arith.constant 1.000000e+00 : f32
    %716 = vector.broadcast %cst_204 : f32 to vector<8x128xf32>
    %717 = arith.addf %716, %715 : vector<8x128xf32>
    %718 = arith.divf %716, %717 : vector<8x128xf32>
    %719 = vector.extract_strided_slice %706 {offsets = [0, 256], sizes = [8, 128], strides = [1, 1]} : vector<8x512xf32> to vector<8x128xf32>
    %720 = math.tanh %719 : vector<8x128xf32>
    %721 = vector.extract_strided_slice %706 {offsets = [0, 384], sizes = [8, 128], strides = [1, 1]} : vector<8x512xf32> to vector<8x128xf32>
    %722 = arith.negf %721 : vector<8x128xf32>
    %723 = math.exp %722 : vector<8x128xf32>
    %cst_205 = arith.constant 1.000000e+00 : f32
    %724 = vector.broadcast %cst_205 : f32 to vector<8x128xf32>
    %725 = arith.addf %724, %723 : vector<8x128xf32>
    %726 = arith.divf %724, %725 : vector<8x128xf32>
    %727 = arith.mulf %718, %698 : vector<8x128xf32>
    %728 = arith.mulf %712, %720 : vector<8x128xf32>
    %729 = arith.addf %727, %728 : vector<8x128xf32>
    %730 = math.tanh %729 : vector<8x128xf32>
    %731 = arith.mulf %726, %730 : vector<8x128xf32>
    %c6_i32_206 = arith.constant 6 : i32
    %732 = arith.index_cast %c6_i32_206 : i32 to index
    %c0_207 = arith.constant 0 : index
    %c0_208 = arith.constant 0 : index
    %733 = vector.load %arg18[%732, %c0_207, %c0_208] : memref<8x8x512xf32, #tpu.memory_space<vmem>>, vector<1x8x512xf32>
    %734 = vector.shape_cast %733 : vector<1x8x512xf32> to vector<8x512xf32>
    %735 = arith.truncf %731 : vector<8x128xf32> to vector<8x128xbf16>
    %cst_209 = arith.constant dense<0.000000e+00> : vector<8x512xf32>
    %736 = tpu.matmul %735, %541, %cst_209 {dimension_numbers = #tpu.dot_dimension_numbers<[1], [0], [0], [1], [0, 0, 1, 1], [], []>} : vector<8x128xbf16>, vector<128x512xbf16>, vector<8x512xf32> -> vector<8x512xf32>
    %737 = arith.addf %734, %736 : vector<8x512xf32>
    %738 = vector.extract_strided_slice %737 {offsets = [0, 0], sizes = [8, 128], strides = [1, 1]} : vector<8x512xf32> to vector<8x128xf32>
    %739 = arith.negf %738 : vector<8x128xf32>
    %740 = math.exp %739 : vector<8x128xf32>
    %cst_210 = arith.constant 1.000000e+00 : f32
    %741 = vector.broadcast %cst_210 : f32 to vector<8x128xf32>
    %742 = arith.addf %741, %740 : vector<8x128xf32>
    %743 = arith.divf %741, %742 : vector<8x128xf32>
    %744 = vector.extract_strided_slice %737 {offsets = [0, 128], sizes = [8, 128], strides = [1, 1]} : vector<8x512xf32> to vector<8x128xf32>
    %745 = arith.negf %744 : vector<8x128xf32>
    %746 = math.exp %745 : vector<8x128xf32>
    %cst_211 = arith.constant 1.000000e+00 : f32
    %747 = vector.broadcast %cst_211 : f32 to vector<8x128xf32>
    %748 = arith.addf %747, %746 : vector<8x128xf32>
    %749 = arith.divf %747, %748 : vector<8x128xf32>
    %750 = vector.extract_strided_slice %737 {offsets = [0, 256], sizes = [8, 128], strides = [1, 1]} : vector<8x512xf32> to vector<8x128xf32>
    %751 = math.tanh %750 : vector<8x128xf32>
    %752 = vector.extract_strided_slice %737 {offsets = [0, 384], sizes = [8, 128], strides = [1, 1]} : vector<8x512xf32> to vector<8x128xf32>
    %753 = arith.negf %752 : vector<8x128xf32>
    %754 = math.exp %753 : vector<8x128xf32>
    %cst_212 = arith.constant 1.000000e+00 : f32
    %755 = vector.broadcast %cst_212 : f32 to vector<8x128xf32>
    %756 = arith.addf %755, %754 : vector<8x128xf32>
    %757 = arith.divf %755, %756 : vector<8x128xf32>
    %758 = arith.mulf %749, %729 : vector<8x128xf32>
    %759 = arith.mulf %743, %751 : vector<8x128xf32>
    %760 = arith.addf %758, %759 : vector<8x128xf32>
    %761 = math.tanh %760 : vector<8x128xf32>
    %762 = arith.mulf %757, %761 : vector<8x128xf32>
    %c7_i32_213 = arith.constant 7 : i32
    %763 = arith.index_cast %c7_i32_213 : i32 to index
    %c0_214 = arith.constant 0 : index
    %c0_215 = arith.constant 0 : index
    %764 = vector.load %arg18[%763, %c0_214, %c0_215] : memref<8x8x512xf32, #tpu.memory_space<vmem>>, vector<1x8x512xf32>
    %765 = vector.shape_cast %764 : vector<1x8x512xf32> to vector<8x512xf32>
    %766 = arith.truncf %762 : vector<8x128xf32> to vector<8x128xbf16>
    %cst_216 = arith.constant dense<0.000000e+00> : vector<8x512xf32>
    %767 = tpu.matmul %766, %541, %cst_216 {dimension_numbers = #tpu.dot_dimension_numbers<[1], [0], [0], [1], [0, 0, 1, 1], [], []>} : vector<8x128xbf16>, vector<128x512xbf16>, vector<8x512xf32> -> vector<8x512xf32>
    %768 = arith.addf %765, %767 : vector<8x512xf32>
    %769 = vector.extract_strided_slice %768 {offsets = [0, 0], sizes = [8, 128], strides = [1, 1]} : vector<8x512xf32> to vector<8x128xf32>
    %770 = arith.negf %769 : vector<8x128xf32>
    %771 = math.exp %770 : vector<8x128xf32>
    %cst_217 = arith.constant 1.000000e+00 : f32
    %772 = vector.broadcast %cst_217 : f32 to vector<8x128xf32>
    %773 = arith.addf %772, %771 : vector<8x128xf32>
    %774 = arith.divf %772, %773 : vector<8x128xf32>
    %775 = vector.extract_strided_slice %768 {offsets = [0, 128], sizes = [8, 128], strides = [1, 1]} : vector<8x512xf32> to vector<8x128xf32>
    %776 = arith.negf %775 : vector<8x128xf32>
    %777 = math.exp %776 : vector<8x128xf32>
    %cst_218 = arith.constant 1.000000e+00 : f32
    %778 = vector.broadcast %cst_218 : f32 to vector<8x128xf32>
    %779 = arith.addf %778, %777 : vector<8x128xf32>
    %780 = arith.divf %778, %779 : vector<8x128xf32>
    %781 = vector.extract_strided_slice %768 {offsets = [0, 256], sizes = [8, 128], strides = [1, 1]} : vector<8x512xf32> to vector<8x128xf32>
    %782 = math.tanh %781 : vector<8x128xf32>
    %783 = vector.extract_strided_slice %768 {offsets = [0, 384], sizes = [8, 128], strides = [1, 1]} : vector<8x512xf32> to vector<8x128xf32>
    %784 = arith.negf %783 : vector<8x128xf32>
    %785 = math.exp %784 : vector<8x128xf32>
    %cst_219 = arith.constant 1.000000e+00 : f32
    %786 = vector.broadcast %cst_219 : f32 to vector<8x128xf32>
    %787 = arith.addf %786, %785 : vector<8x128xf32>
    %788 = arith.divf %786, %787 : vector<8x128xf32>
    %789 = arith.mulf %780, %760 : vector<8x128xf32>
    %790 = arith.mulf %774, %782 : vector<8x128xf32>
    %791 = arith.addf %789, %790 : vector<8x128xf32>
    %792 = math.tanh %791 : vector<8x128xf32>
    %793 = arith.mulf %788, %792 : vector<8x128xf32>
    %c8_i32_220 = arith.constant 8 : i32
    %c7 = arith.constant 7 : index
    %c0_221 = arith.constant 0 : index
    %c0_222 = arith.constant 0 : index
    %794 = vector.load %arg17[%c7, %c0_221, %c0_222] : memref<8x8x128xf32, #tpu.memory_space<vmem>>, vector<1x8x128xf32>
    %795 = vector.shape_cast %794 : vector<1x8x128xf32> to vector<8x128xf32>
    %796 = arith.addf %793, %795 : vector<8x128xf32>
    %797 = vector.broadcast %4 : vector<1x128xf32> to vector<8x128xf32>
    %798 = arith.mulf %796, %797 : vector<8x128xf32>
    %cst_223 = arith.constant dense<0.000000e+00> : vector<8xf32>
    %799 = vector.multi_reduction <add>, %798, %cst_223 [1] : vector<8x128xf32> to vector<8xf32>
    %800 = vector.shape_cast %799 : vector<8xf32> to vector<8x1xf32>
    %cst_224 = arith.constant 3.125000e-02 : f32
    %801 = vector.broadcast %cst_224 : f32 to vector<8x1xf32>
    %802 = arith.mulf %800, %801 : vector<8x1xf32>
    %803 = vector.broadcast %802 : vector<8x1xf32> to vector<8x128xf32>
    %804 = arith.subf %796, %803 : vector<8x128xf32>
    %805 = vector.broadcast %4 : vector<1x128xf32> to vector<8x128xf32>
    %806 = arith.mulf %804, %805 : vector<8x128xf32>
    %807 = arith.mulf %806, %806 : vector<8x128xf32>
    %cst_225 = arith.constant dense<0.000000e+00> : vector<8xf32>
    %808 = vector.multi_reduction <add>, %807, %cst_225 [1] : vector<8x128xf32> to vector<8xf32>
    %809 = vector.shape_cast %808 : vector<8xf32> to vector<8x1xf32>
    %cst_226 = arith.constant 3.125000e-02 : f32
    %810 = vector.broadcast %cst_226 : f32 to vector<8x1xf32>
    %811 = arith.mulf %809, %810 : vector<8x1xf32>
    %cst_227 = arith.constant 9.99999974E-6 : f32
    %812 = vector.broadcast %cst_227 : f32 to vector<8x1xf32>
    %813 = arith.addf %811, %812 : vector<8x1xf32>
    %814 = math.rsqrt %813 : vector<8x1xf32>
    %815 = vector.broadcast %814 : vector<8x1xf32> to vector<8x128xf32>
    %816 = arith.mulf %806, %815 : vector<8x128xf32>
    %817 = vector.broadcast %542 : vector<1x128xf32> to vector<8x128xf32>
    %818 = arith.mulf %816, %817 : vector<8x128xf32>
    %819 = vector.broadcast %543 : vector<1x128xf32> to vector<8x128xf32>
    %820 = arith.addf %818, %819 : vector<8x128xf32>
    %821 = arith.truncf %820 : vector<8x128xf32> to vector<8x128xbf16>
    %c0_228 = arith.constant 0 : index
    %c0_229 = arith.constant 0 : index
    %822 = vector.load %arg14[%c0_228, %c0_229] : memref<128x10xbf16, #tpu.memory_space<vmem>>, vector<128x10xbf16>
    %cst_230 = arith.constant dense<0.000000e+00> : vector<8x10xf32>
    %823 = tpu.matmul %821, %822, %cst_230 {dimension_numbers = #tpu.dot_dimension_numbers<[1], [0], [0], [1], [0, 0, 1, 1], [], []>} : vector<8x128xbf16>, vector<128x10xbf16>, vector<8x10xf32> -> vector<8x10xf32>
    %c0_231 = arith.constant 0 : index
    %c0_232 = arith.constant 0 : index
    %824 = vector.load %arg15[%c0_231, %c0_232] : memref<1x10xf32, #tpu.memory_space<vmem>>, vector<1x10xf32>
    %825 = vector.broadcast %824 : vector<1x10xf32> to vector<8x10xf32>
    %826 = arith.addf %823, %825 : vector<8x10xf32>
    %c0_233 = arith.constant 0 : index
    %c0_234 = arith.constant 0 : index
    %827 = vector.load %arg16[%c0_233, %c0_234] : memref<8x10xf32, #tpu.memory_space<vmem>>, vector<8x10xf32>
    tpu.vector_store %arg16[%c0_233, %c0_234], %826 {strides = array<i32>} : memref<8x10xf32, #tpu.memory_space<vmem>>, vector<8x10xf32>,
    return
  }
  func.func @transform_0(%arg0: i32) -> (i32, i32, i32) {
    %c0_i32 = arith.constant 0 : i32
    %c0_i32_0 = arith.constant 0 : i32
    %c0_i32_1 = arith.constant 0 : i32
    return %c0_i32, %arg0, %c0_i32_0 : i32, i32, i32
  }
  func.func @transform_1(%arg0: i32) -> (i32, i32) {
    %c0_i32 = arith.constant 0 : i32
    %c0_i32_0 = arith.constant 0 : i32
    %c0_i32_1 = arith.constant 0 : i32
    return %c0_i32, %c0_i32_0 : i32, i32
  }
  func.func @transform_2(%arg0: i32) -> (i32, i32) {
    %c0_i32 = arith.constant 0 : i32
    %c0_i32_0 = arith.constant 0 : i32
    %c0_i32_1 = arith.constant 0 : i32
    return %c0_i32, %c0_i32_0 : i32, i32
  }
  func.func @transform_3(%arg0: i32) -> (i32, i32) {
    %c0_i32 = arith.constant 0 : i32
    %c0_i32_0 = arith.constant 0 : i32
    %c0_i32_1 = arith.constant 0 : i32
    return %c0_i32, %c0_i32_0 : i32, i32
  }
  func.func @transform_4(%arg0: i32) -> (i32, i32) {
    %c0_i32 = arith.constant 0 : i32
    %c0_i32_0 = arith.constant 0 : i32
    %c0_i32_1 = arith.constant 0 : i32
    return %c0_i32, %c0_i32_0 : i32, i32
  }
  func.func @transform_5(%arg0: i32) -> (i32, i32) {
    %c0_i32 = arith.constant 0 : i32
    %c0_i32_0 = arith.constant 0 : i32
    %c0_i32_1 = arith.constant 0 : i32
    return %c0_i32, %c0_i32_0 : i32, i32
  }
  func.func @transform_6(%arg0: i32) -> (i32, i32) {
    %c0_i32 = arith.constant 0 : i32
    %c0_i32_0 = arith.constant 0 : i32
    %c0_i32_1 = arith.constant 0 : i32
    return %c0_i32, %c0_i32_0 : i32, i32
  }
  func.func @transform_7(%arg0: i32) -> (i32, i32) {
    %c0_i32 = arith.constant 0 : i32
    %c0_i32_0 = arith.constant 0 : i32
    %c0_i32_1 = arith.constant 0 : i32
    return %c0_i32, %c0_i32_0 : i32, i32
  }
  func.func @transform_8(%arg0: i32) -> (i32, i32) {
    %c0_i32 = arith.constant 0 : i32
    %c0_i32_0 = arith.constant 0 : i32
    %c0_i32_1 = arith.constant 0 : i32
    return %c0_i32, %c0_i32_0 : i32, i32
  }
  func.func @transform_9(%arg0: i32) -> (i32, i32) {
    %c0_i32 = arith.constant 0 : i32
    %c0_i32_0 = arith.constant 0 : i32
    %c0_i32_1 = arith.constant 0 : i32
    return %c0_i32, %c0_i32_0 : i32, i32
  }
  func.func @transform_10(%arg0: i32) -> (i32, i32) {
    %c0_i32 = arith.constant 0 : i32
    %c0_i32_0 = arith.constant 0 : i32
    %c0_i32_1 = arith.constant 0 : i32
    return %c0_i32, %c0_i32_0 : i32, i32
  }
  func.func @transform_11(%arg0: i32) -> (i32, i32) {
    %c0_i32 = arith.constant 0 : i32
    %c0_i32_0 = arith.constant 0 : i32
    %c0_i32_1 = arith.constant 0 : i32
    return %c0_i32, %c0_i32_0 : i32, i32
  }
  func.func @transform_12(%arg0: i32) -> (i32, i32) {
    %c0_i32 = arith.constant 0 : i32
    %c0_i32_0 = arith.constant 0 : i32
    %c0_i32_1 = arith.constant 0 : i32
    return %c0_i32, %c0_i32_0 : i32, i32
  }
  func.func @transform_13(%arg0: i32) -> (i32, i32) {
    %c0_i32 = arith.constant 0 : i32
    %c0_i32_0 = arith.constant 0 : i32
    %c0_i32_1 = arith.constant 0 : i32
    return %c0_i32, %c0_i32_0 : i32, i32
  }
  func.func @transform_14(%arg0: i32) -> (i32, i32) {
    %c0_i32 = arith.constant 0 : i32
    %c0_i32_0 = arith.constant 0 : i32
    %c0_i32_1 = arith.constant 0 : i32
    return %c0_i32, %c0_i32_0 : i32, i32
  }
  func.func @transform_15(%arg0: i32) -> (i32, i32) {
    %c0_i32 = arith.constant 0 : i32
    %c0_i32_0 = arith.constant 0 : i32
    return %arg0, %c0_i32 : i32, i32
  }
}

</mosaic_0001>

<bundles_post_ra>
// kernel: _forward.1
= control target key start
LH: loop header
LB: loop body
LE: loop exit
PB: predicated region body
PF: predicated region fallthrough
CT: control target
= control target key end

     0   :  { %20 = vsyncpa [#allocation5], 0  ;;  %s5612_s0 = inlined_call_operand.vmem [shape: f32[8,8,16], index: 0, kind: input, shape index: {}]   ;;  %s5613_s1 = inlined_call_operand.vmem [shape: bf16[16,512], index: 1, kind: input, shape index: {}]   ;;  %s5614_s2 = inlined_call_operand.hbm [shape: bf16[128,512], index: 2, kind: input, shape index: {}]   ;;  %s5615_s3 = inlined_call_operand.vmem [shape: f32[1,512], index: 3, kind: input, shape index: {}]   ;;  %s5616_s4 = inlined_call_operand.vmem [shape: bf16[16,128], index: 4, kind: input, shape index: {}]   ;;  %s5617_s5 = inlined_call_operand.vmem [shape: f32[1,128], index: 5, kind: input, shape index: {}]   ;;  %s5618_s6 = inlined_call_operand.vmem [shape: f32[1,128], index: 6, kind: input, shape index: {}]   ;;  %s5619_s7 = inlined_call_operand.vmem [shape: f32[1,128], index: 7, kind: input, shape index: {}]   ;;  %s5620_s8 = inlined_call_operand.hbm [shape: bf16[128,512], index: 8, kind: input, shape index: {}]   ;;  %s5621_s9 = inlined_call_operand.hbm [shape: bf16[128,512], index: 9, kind: input, shape index: {}]   ;;  %s5622_s10 = inlined_call_operand.vmem [shape: f32[1,512], index: 10, kind: input, shape index: {}]   ;;  %s5623_s11 = inlined_call_operand.vmem [shape: f32[1,128], index: 11, kind: input, shape index: {}]   ;;  %s5624_s12 = inlined_call_operand.vmem [shape: f32[1,128], index: 12, kind: input, shape index: {}]   ;;  %s5625_s13 = inlined_call_operand.vmem [shape: bf16[128,10], index: 13, kind: input, shape index: {}]   ;;  %s5626_s14 = inlined_call_operand.vmem [shape: f32[1,10], index: 14, kind: input, shape index: {}]   ;;  %s5627_s15 = inlined_call_operand.vmem [shape: f32[8,10], index: 15, kind: output, shape index: {}]  }
   0x1   :  { %21 = vsyncpa [#allocation7], 0  ;;  %s4172_s18 = smov [#allocation6]   ;;  %s4173_s20 = smov [#allocation4]  }
   0x2   :  { %s53_s19 = sshll.u32 %s4172_s18, 4  ;;  %s31_s21 = sshll.u32 %s4173_s20, 4  ;;  %s54_s19 = int_to_ptr.vmem [resolvable:$true] %s53_s19  ;;  %s32_s21 = int_to_ptr.vmem [resolvable:$true] %s31_s21 }
   0x3   :  { %s4116_s22 = scalar_lea.vmem %s54_s19, 4096  ;;  %p4121_p1 = scmp.lt.s32.totalorder %s54_s19, %s54_s19 }
   0x4   :  { %p4117_p0 = scmp.ne.s32.totalorder %s54_s19, %s4116_s22  ;;  %p4122_p2 = scmp.lt.s32.totalorder %s4116_s22, %s4116_s22 }
   0x6   :  { %p4123_p3 = por %p4122_p2, %p4121_p1 }
   0x8   :  { %p4124_p4 = pnand %p4123_p3, %p4117_p0 }
   0xa   :  { %4127 = shalt.err (!%p4124_p4)
}
   0xb   :  { %s4174_s23 = smov 256   ;;  %s4175_s24 = smov 16  }
   0xc   :  { %59 = dma.hbm_to_vmem [thread:$0]  %s5620_s8, 4096, %s54_s19, [#allocation7], %s4174_s23, %s4174_s23, %s4175_s24  }
   0xd   :  { %s4136_s27 = scalar_lea.vmem %s32_s21, 4096  ;;  %p4141_p6 = scmp.lt.s32.totalorder %s32_s21, %s32_s21 }
   0xe   :  { %p4137_p5 = scmp.ne.s32.totalorder %s32_s21, %s4136_s27  ;;  %p4142_p7 = scmp.lt.s32.totalorder %s4136_s27, %s4136_s27 }
  0x10   :  { %p4143_p8 = por %p4142_p7, %p4141_p6 }
  0x12   :  { %p4144_p9 = pnand %p4143_p8, %p4137_p5 }
  0x14   :  { %4147 = shalt.err (!%p4144_p9)
}
  0x15   :  { %37 = dma.hbm_to_vmem [thread:$0]  %s5614_s2, 4096, %s32_s21, [#allocation5], %s4174_s23, %s4174_s23, %s4175_s24  }
  0x16   :  { %s4176_s30 = smov [#allocation8]  }
  0x17   :  { %s65_s16 = sshll.u32 %s4176_s30, 4  ;;  %s66_s16 = int_to_ptr.vmem [resolvable:$true] %s65_s16 }
  0x18   :  { %s4156_s17 = scalar_lea.vmem %s66_s16, 4096  ;;  %p4161_p11 = scmp.lt.s32.totalorder %s66_s16, %s66_s16 }
  0x19   :  { %p4157_p10 = scmp.ne.s32.totalorder %s66_s16, %s4156_s17  ;;  %p4162_p12 = scmp.lt.s32.totalorder %s4156_s17, %s4156_s17 }
  0x1b   :  { %p4163_p13 = por %p4162_p12, %p4161_p11 }
  0x1d   :  { %p4164_p0 = pnand %p4163_p13, %p4157_p10 }
  0x1f   :  { %4167 = shalt.err (!%p4164_p0)
}
  0x20   :  { %71 = dma.hbm_to_vmem [thread:$0]  %s5621_s9, 4096, %s66_s16, [#allocation7], %s4174_s23, %s4174_s23, %s4175_s24  }
  0x21   :  { %4168 = dma.done.wait [#allocation5], 4096  }
  0x22   :  { %4169 = vsyncadd [#allocation5], 4294963200 }
  0x23   :  { %4170 = dma.done.wait [#allocation7], 8192  }
  0x24   :  { %4171 = vsyncadd [#allocation7], 4294959104  ;;  %v5632_v0 = vmov 0   ;;  %v3611_v1 = vld [vmem:[%s5613_s1 + $0x4] ss:$16 sps:$4 sm:$0xff]   ;;  %v98_v6 = vld [vmem:[%s5612_s0 + $0x8] sm:$0xff]  ;;  %v5634_v50 = vlaneseq }
  0x25   :  { %200 = vmatprep.mubr.bf16.mxu0 %v5632_v0  ;;  %273 = vmatprep.mubr.bf16.mxu1 %v5632_v0  ;;  %v3613_v2 = vld [vmem:[%s5613_s1 + $0xc] ss:$16 sps:$4 sm:$0xff]   ;;  %v3615_v3 = vld [vmem:[%s5613_s1] ss:$16 sps:$4 sm:$0xff]   ;;  %v3616_v4 = vld [vmem:[%s5613_s1 + $0x8] ss:$16 sps:$4 sm:$0xff]  }
  0x26   :  { %182 = vmatprep.subr.bf16.mxu0 %v3611_v1  ;;  %v97_v5 = vld [vmem:[%s5612_s0] sm:$0xff]  ;;  %255 = vmatprep.subr.bf16.mxu1 %v3613_v2  ;;  %vm155_vm0 = vcmask 130048   ;;  %v99_v12 = vld [vmem:[%s5612_s0 + $0x10] sm:$0xff]  ;;  %v100_v13 = vld [vmem:[%s5612_s0 + $0x18] sm:$0xff]  ;;  %v4465_v51 = vshrl.u32 %v5634_v50, 7  ;;  %vm4179_vm2 = vmmov 0  }
  0x27   :  { %183 = vmatpush1.bf16.msra.mxu0 %v3615_v3  ;;  %256 = vmatpush1.bf16.msra.mxu1 %v3616_v4  ;;  %v105_v7 = vpack.c.bf16 %v98_v6, %v97_v5  ;;  %v3617_v8 = vld [vmem:[%s5616_s4] sm:$0xff]   ;;  %v106_v16 = vpack.c.bf16 %v100_v13, %v99_v12  ;;  %v102_v21 = vld [vmem:[%s5612_s0 + $0x28] sm:$0xff]  ;;  %v103_v27 = vld [vmem:[%s5612_s0 + $0x30] sm:$0xff]  ;;  %vm3375_vm3 = vcmask 80896  }
  0x28   :  { %v4292_v9 = vld [vmem:[#allocation4 + $0xe4] ss:$16 sps:$4 sm:$0xff]   ;;  %v4294_v10 = vld [vmem:[#allocation4 + $0xe0] ss:$16 sps:$4 sm:$0xff]   ;;  %3573 = vmatprep.subr.bf16.mxu0 %v3617_v8  ;;  %v4334_v22 = vld [vmem:[#allocation4 + $0xec] ss:$16 sps:$4 sm:$0xff]  }
  0x29   :  { %v4296_v11 = vld [vmem:[#allocation4 + $0xc4] ss:$16 sps:$4 sm:$0xff]   ;;  %632 = vmatprep.subr.bf16.mxu1 %v4292_v9  ;;  %v4308_v14 = vld [vmem:[#allocation4 + $0xc0] ss:$16 sps:$4 sm:$0xff]   ;;  %v104_v28 = vld [vmem:[%s5612_s0 + $0x38] sm:$0xff]  ;;  %5642 = vst [vmem:[#allocation11_spill] sm:$0xff] %v4465_v51 }
  0x2a   :  { %3388 = vmatmul.mubr.msk.bf16.vlgmr.msra.gmra.mxu0 %vm155_vm0, %v105_v7  ;;  %3392 = vmatmul.mubr.msk.bf16.vlgmr.msra.gmra.mxu1 %vm155_vm0, %v105_v7  ;;  %v4313_v15 = vld [vmem:[#allocation4 + $0xa4] ss:$16 sps:$4 sm:$0xff]   ;;  %v4316_v17 = vld [vmem:[#allocation4 + $0xa0] ss:$16 sps:$4 sm:$0xff]   ;;  %v108_v31 = vpack.c.bf16 %v104_v28, %v103_v27  ;;  %v4376_v35 = vld [vmem:[#allocation4 + $0xe8] ss:$16 sps:$4 sm:$0xff]  }
  0x2b   :  { %3574 = vmatpush3.bf16.msra.mxu0 %v3617_v8  ;;  %633 = vmatpush1.bf16.msra.mxu1 %v4294_v10  ;;  %v4319_v18 = vld [vmem:[#allocation4 + $0x84] ss:$16 sps:$4 sm:$0xff]   ;;  %v4323_v19 = vld [vmem:[#allocation4 + $0x80] ss:$16 sps:$4 sm:$0xff]   ;;  %v4378_v36 = vld [vmem:[#allocation4 + $0xcc] ss:$16 sps:$4 sm:$0xff]  }
  0x2c   :  { %210 = vmatprep.mubr.bf16.mxu0 %v5632_v0  ;;  %634 = vmatprep.subr.bf16.mxu1 %v4296_v11  ;;  %v101_v20 = vld [vmem:[%s5612_s0 + $0x20] sm:$0xff]  ;;  %v4381_v37 = vld [vmem:[#allocation4 + $0xc8] ss:$16 sps:$4 sm:$0xff]   ;;  %v4385_v38 = vld [vmem:[#allocation4 + $0xac] ss:$16 sps:$4 sm:$0xff]   ;;  %v5628_v52 = vsub.s32 2, %v4465_v51 }
  0x2d   :  { %283 = vmatprep.mubr.bf16.mxu1 %v5632_v0  ;;  %v4337_v23 = vld [vmem:[#allocation4 + $0x64] ss:$16 sps:$4 sm:$0xff]   ;;  %v107_v24 = vpack.c.bf16 %v102_v21, %v101_v20  ;;  %673 = vmatprep.subr.bf16.mxu0 %v4334_v22  ;;  %v4341_v25 = vld [vmem:[#allocation4 + $0x60] ss:$16 sps:$4 sm:$0xff]   ;;  %v4391_v39 = vld [vmem:[#allocation4 + $0xa8] ss:$16 sps:$4 sm:$0xff]  }
  0x2e   :  { %v4344_v26 = vld [vmem:[#allocation4 + $0x44] ss:$16 sps:$4 sm:$0xff]   ;;  %v4357_v29 = vld [vmem:[#allocation4 + $0x40] ss:$16 sps:$4 sm:$0xff]   ;;  %v4395_v40 = vld [vmem:[#allocation4 + $0x8c] ss:$16 sps:$4 sm:$0xff]  }
  0x2f   :  { %635 = vmatpush1.bf16.msra.mxu1 %v4308_v14  ;;  %v4360_v30 = vld [vmem:[#allocation4 + $0x24] ss:$16 sps:$4 sm:$0xff]   ;;  %v4362_v32 = vld [vmem:[#allocation4 + $0x20] ss:$16 sps:$4 sm:$0xff]   ;;  %v4400_v41 = vld [vmem:[#allocation4 + $0x88] ss:$16 sps:$4 sm:$0xff]  }
  0x30   :  { %636 = vmatprep.subr.bf16.mxu1 %v4313_v15  ;;  %v4364_v33 = vld [vmem:[#allocation4 + $0x4] ss:$16 sps:$4 sm:$0xff]   ;;  %v4370_v34 = vld [vmem:[#allocation4] ss:$16 sps:$4 sm:$0xff]   ;;  %v4403_v42 = vld [vmem:[#allocation4 + $0x6c] ss:$16 sps:$4 sm:$0xff]  }
  0x31   :  { %v4410_v43 = vld [vmem:[#allocation4 + $0x68] ss:$16 sps:$4 sm:$0xff]   ;;  %v4413_v44 = vld [vmem:[#allocation4 + $0x4c] ss:$16 sps:$4 sm:$0xff]   ;;  %v5631_v53 = vsub.s32 0, %v4465_v51  ;;  %v5629_v54 = vsub.s32 3, %v4465_v51 }
  0x32   :  { %3389 = vmatmul.mubr.msk.bf16.gmra.mxu0 %vm155_vm0, %v106_v16  ;;  %3393 = vmatmul.mubr.msk.bf16.gmra.mxu1 %vm155_vm0, %v106_v16  ;;  %v4421_v45 = vld [vmem:[#allocation4 + $0x48] ss:$16 sps:$4 sm:$0xff]   ;;  %v4424_v46 = vld [vmem:[#allocation4 + $0x2c] ss:$16 sps:$4 sm:$0xff]   ;;  %v113_v55 = vld [vmem:[%s5615_s3] sm:$0xf] }
  0x33   :  { %220 = vmatprep.mubr.bf16.mxu0 %v5632_v0  ;;  %293 = vmatprep.mubr.bf16.mxu1 %v5632_v0  ;;  %v4429_v47 = vld [vmem:[#allocation4 + $0x28] ss:$16 sps:$4 sm:$0xff]   ;;  %v4432_v48 = vld [vmem:[#allocation4 + $0xc] ss:$16 sps:$4 sm:$0xff]   ;;  %v4479_v58 = vrot.slane %v113_v55, %v5628_v52  ;;  %v5630_v59 = vsub.s32 1, %v4465_v51  ;;  %v4488_v62 = vrot.slane %v113_v55, %v5631_v53  ;;  %v4492_v63 = vrot.slane %v113_v55, %v5629_v54 }
  0x34   :  { %637 = vmatpush1.bf16.msra.mxu1 %v4316_v17  ;;  %v4437_v49 = vld [vmem:[#allocation4 + $0x8] ss:$16 sps:$4 sm:$0xff]  }
  0x35   :  { %638 = vmatprep.subr.bf16.mxu1 %v4319_v18  ;;  %v122_v3 = vrot.slane %v113_v55, %v5630_v59 }
  0x38   :  { %639 = vmatpush1.bf16.msra.mxu1 %v4323_v19 }
  0x39   :  { %640 = vmatprep.subr.bf16.mxu1 %v4337_v23 }
  0x3a   :  { %3390 = vmatmul.mubr.msk.bf16.gmra.mxu0 %vm155_vm0, %v107_v24  ;;  %3394 = vmatmul.mubr.msk.bf16.gmra.mxu1 %vm155_vm0, %v107_v24 }
  0x3b   :  { %230 = vmatprep.mubr.bf16.mxu0 %v5632_v0  ;;  %303 = vmatprep.mubr.bf16.mxu1 %v5632_v0 }
  0x3c   :  { %641 = vmatpush1.bf16.msra.mxu1 %v4341_v25 }
  0x3d   :  { %642 = vmatprep.subr.bf16.mxu1 %v4344_v26 }
  0x40   :  { %643 = vmatpush1.bf16.msra.mxu1 %v4357_v29 }
  0x41   :  { %644 = vmatprep.subr.bf16.mxu1 %v4360_v30 }
  0x42   :  { %3391 = vmatmul.mubr.msk.bf16.gmra.mxu0 %vm155_vm0, %v108_v31  ;;  %3395 = vmatmul.mubr.msk.bf16.gmra.mxu1 %vm155_vm0, %v108_v31 }
  0x43   :  { %3575 = vmatprep.mubr.msk.bf16.mxu0 %vm155_vm0, %v105_v7  ;;  %664 = vmatprep.mubr.bf16.mxu1 %v5632_v0 }
  0x44   :  { %645 = vmatpush1.bf16.msra.mxu1 %v4362_v32 }
  0x45   :  { %646 = vmatprep.subr.bf16.mxu1 %v4364_v33 }
  0x48   :  { %647 = vmatpush1.bf16.msra.mxu1 %v4370_v34 }
  0x49   :  { %778 = vmatprep.subr.bf16.mxu1 %v4292_v9 }
  0x4a   :  { %3576 = vmatmul.mubr.msk.bf16.vlgmr.msra.gmra.mxu0 %vm155_vm0, %v106_v16 }
  0x4b   :  { %665 = vmatmul.mubr.bf16.vlgmr.msra.gmra.mxu1 %v5632_v0  ;;  %674 = vmatpush1.bf16.msra.mxu0 %v4376_v35 }
  0x4c   :  { %675 = vmatprep.subr.bf16.mxu0 %v4378_v36  ;;  %3579 = vmatprep.mubr.msk.bf16.mxu0 %vm155_vm0, %v107_v24 }
  0x4d   :  { %779 = vmatpush1.bf16.msra.mxu1 %v4294_v10  ;;  %810 = vmatprep.mubr.bf16.mxu1 %v5632_v0 }
  0x4e   :  { %780 = vmatprep.subr.bf16.mxu1 %v4296_v11 }
  0x4f   :  { %676 = vmatpush1.bf16.msra.mxu0 %v4381_v37 }
  0x50   :  { %677 = vmatprep.subr.bf16.mxu0 %v4385_v38 }
  0x51   :  { %781 = vmatpush1.bf16.msra.mxu1 %v4308_v14 }
  0x52   :  { %3580 = vmatmul.mubr.msk.bf16.gmra.mxu0 %vm155_vm0, %v108_v31  ;;  %782 = vmatprep.subr.bf16.mxu1 %v4313_v15 }
  0x53   :  { %678 = vmatpush1.bf16.msra.mxu0 %v4391_v39  ;;  %705 = vmatprep.mubr.bf16.mxu0 %v5632_v0 }
  0x54   :  { %679 = vmatprep.subr.bf16.mxu0 %v4395_v40 }
  0x55   :  { %783 = vmatpush1.bf16.msra.mxu1 %v4316_v17 }
  0x56   :  { %784 = vmatprep.subr.bf16.mxu1 %v4319_v18 }
  0x57   :  { %680 = vmatpush1.bf16.msra.mxu0 %v4400_v41 }
  0x58   :  { %681 = vmatprep.subr.bf16.mxu0 %v4403_v42 }
  0x59   :  { %785 = vmatpush1.bf16.msra.mxu1 %v4323_v19 }
  0x5a   :  { %786 = vmatprep.subr.bf16.mxu1 %v4337_v23 }
  0x5b   :  { %682 = vmatpush1.bf16.msra.mxu0 %v4410_v43 }
  0x5c   :  { %683 = vmatprep.subr.bf16.mxu0 %v4413_v44 }
  0x5d   :  { %787 = vmatpush1.bf16.msra.mxu1 %v4341_v25 }
  0x5e   :  { %788 = vmatprep.subr.bf16.mxu1 %v4344_v26 }
  0x5f   :  { %684 = vmatpush1.bf16.msra.mxu0 %v4421_v45 }
  0x60   :  { %685 = vmatprep.subr.bf16.mxu0 %v4424_v46 }
  0x61   :  { %789 = vmatpush1.bf16.msra.mxu1 %v4357_v29 }
  0x62   :  { %790 = vmatprep.subr.bf16.mxu1 %v4360_v30 }
  0x63   :  { %686 = vmatpush1.bf16.msra.mxu0 %v4429_v47 }
  0x64   :  { %687 = vmatprep.subr.bf16.mxu0 %v4432_v48 }
  0x65   :  { %791 = vmatpush1.bf16.msra.mxu1 %v4362_v32 }
  0x66   :  { %792 = vmatprep.subr.bf16.mxu1 %v4364_v33 }
  0x67   :  { %688 = vmatpush1.bf16.msra.mxu0 %v4437_v49 }
  0x68   :  { %819 = vmatprep.subr.bf16.mxu0 %v4334_v22 }
  0x69   :  { %793 = vmatpush1.bf16.msra.mxu1 %v4370_v34 }
  0x6a   :  { %706 = vmatmul.mubr.bf16.vlgmr.msra.gmra.mxu0 %v5632_v0  ;;  %913 = vmatprep.subr.bf16.mxu1 %v4292_v9 }
  0x6b   :  { %820 = vmatpush1.bf16.msra.mxu0 %v4376_v35  ;;  %851 = vmatprep.mubr.bf16.mxu0 %v5632_v0 }
  0x6c   :  { %821 = vmatprep.subr.bf16.mxu0 %v4378_v36 }
  0x6f   :  { %822 = vmatpush1.bf16.msra.mxu0 %v4381_v37 }
  0x70   :  { %823 = vmatprep.subr.bf16.mxu0 %v4385_v38 }
  0x73   :  { %824 = vmatpush1.bf16.msra.mxu0 %v4391_v39 }
  0x74   :  { %825 = vmatprep.subr.bf16.mxu0 %v4395_v40 }
  0x77   :  { %826 = vmatpush1.bf16.msra.mxu0 %v4400_v41 }
  0x78   :  { %827 = vmatprep.subr.bf16.mxu0 %v4403_v42 }
  0x7b   :  { %828 = vmatpush1.bf16.msra.mxu0 %v4410_v43 }
  0x7c   :  { %829 = vmatprep.subr.bf16.mxu0 %v4413_v44 }
  0x7f   :  { %830 = vmatpush1.bf16.msra.mxu0 %v4421_v45 }
  0x80   :  { %831 = vmatprep.subr.bf16.mxu0 %v4424_v46 }
  0x83   :  { %832 = vmatpush1.bf16.msra.mxu0 %v4429_v47 }
  0x84   :  { %833 = vmatprep.subr.bf16.mxu0 %v4432_v48 }
  0x87   :  { %834 = vmatpush1.bf16.msra.mxu0 %v4437_v49 }
  0x88   :  { %954 = vmatprep.subr.bf16.mxu0 %v4334_v22 }
  0xea   :  { %v4473_v56 = vpop.f32.mrf.mxu0  ;;  %v4475_v57 = vpop.f32.mrf.mxu1 }
  0xec   :  { %v4482_v60 = vpop.f32.mrf.mxu0  ;;  %v4484_v61 = vpop.f32.mrf.mxu1 }
  0xee   :  { %v206_v1 = vpop.f32.mrf.mxu0  ;;  %v279_v2 = vpop.f32.mrf.mxu1 }
  0xef   :  { %v4497_v4 = vadd.f32 %v206_v1, %v4488_v62  ;;  %v4500_v5 = vadd.f32 %v279_v2, %v4479_v58 }
  0xf0   :  { %v208_v6 = vpop.f32.mrf.mxu0  ;;  %v281_v7 = vpop.f32.mrf.mxu1 }
  0xf1   :  { %v4502_v8 = vadd.f32 %v208_v6, %v122_v3  ;;  %v4505_v12 = vadd.f32 %v281_v7, %v4492_v63 }
  0xf2   :  { %v212_v13 = vpop.f32.mrf.mxu0  ;;  %v285_v16 = vpop.f32.mrf.mxu1 }
  0xf3   :  { %v4508_v20 = vadd.f32 %v212_v13, %v4488_v62  ;;  %v4511_v21 = vadd.f32 %v285_v16, %v4479_v58 }
  0xf4   :  { %v214_v24 = vpop.f32.mrf.mxu0  ;;  %v287_v27 = vpop.f32.mrf.mxu1 }
  0xf5   :  { %5643 = vst [vmem:[#allocation12_spill] sm:$0xff] %v4511_v21  ;;  %v4513_v28 = vadd.f32 %v214_v24, %v122_v3  ;;  %v4516_v31 = vadd.f32 %v287_v27, %v4492_v63 }
  0xf6   :  { %v216_v55 = vpop.f32.mrf.mxu0  ;;  %v289_v1 = vpop.f32.mrf.mxu1 }
  0xf7   :  { %5644 = vst [vmem:[#allocation13_spill] sm:$0xff] %v4513_v28  ;;  %5645 = vst [vmem:[#allocation14_spill] sm:$0xff] %v4516_v31  ;;  %v4519_v2 = vadd.f32 %v216_v55, %v4488_v62  ;;  %v4522_v6 = vadd.f32 %v289_v1, %v4479_v58 }
  0xf8   :  { %v218_v7 = vpop.f32.mrf.mxu0  ;;  %v291_v13 = vpop.f32.mrf.mxu1 }
  0xf9   :  { %5646 = vst [vmem:[#allocation15_spill] sm:$0xff] %v4519_v2  ;;  %5647 = vst [vmem:[#allocation16_spill] sm:$0xff] %v4522_v6  ;;  %v4524_v52 = vadd.f32 %v218_v7, %v122_v3  ;;  %v4527_v16 = vadd.f32 %v291_v13, %v4492_v63 }
  0xfa   :  { %v222_v24 = vpop.f32.mrf.mxu0  ;;  %v295_v54 = vpop.f32.mrf.mxu1 }
  0xfb   :  { %5648 = vst [vmem:[#allocation17_spill] sm:$0xff] %v4524_v52  ;;  %5649 = vst [vmem:[#allocation18_spill] sm:$0xff] %v4527_v16  ;;  %v4530_v27 = vadd.f32 %v222_v24, %v4488_v62  ;;  %v4533_v59 = vadd.f32 %v295_v54, %v4479_v58 }
  0xfc   :  { %v224_v55 = vpop.f32.mrf.mxu0  ;;  %v297_v53 = vpop.f32.mrf.mxu1 }
  0xfd   :  { %5650 = vst [vmem:[#allocation19_spill] sm:$0xff] %v4530_v27  ;;  %5651 = vst [vmem:[#allocation20_spill] sm:$0xff] %v4533_v59  ;;  %v4535_v0 = vadd.f32 %v224_v55, %v122_v3  ;;  %v4538_v1 = vadd.f32 %v297_v53, %v4492_v63 }
  0xfe   :  { %v226_v7 = vpop.f32.mrf.mxu0  ;;  %v299_v50 = vpop.f32.mrf.mxu1 }
  0xff   :  { %5652 = vst [vmem:[#allocation21_spill] sm:$0xff] %v4535_v0  ;;  %5653 = vst [vmem:[#allocation22_spill] sm:$0xff] %v4538_v1  ;;  %v4541_v13 = vadd.f32 %v226_v7, %v4488_v62  ;;  %v4544_v51 = vadd.f32 %v299_v50, %v4479_v58 }
 0x100   :  { %v228_v24 = vpop.f32.mrf.mxu0  ;;  %v301_v27 = vpop.f32.mrf.mxu1 }
 0x101   :  { %5654 = vst [vmem:[#allocation23_spill] sm:$0xff] %v4541_v13  ;;  %5655 = vst [vmem:[#allocation24_spill] sm:$0xff] %v4544_v51  ;;  %v4546_v6 = vadd.f32 %v228_v24, %v122_v3  ;;  %v4549_v54 = vadd.f32 %v301_v27, %v4492_v63 }
 0x102   :  { %v232_v55 = vpop.f32.mrf.mxu0  ;;  %v305_v59 = vpop.f32.mrf.mxu1 }
 0x103   :  { %5656 = vst [vmem:[#allocation25_spill] sm:$0xff] %v4546_v6  ;;  %5657 = vst [vmem:[#allocation26_spill] sm:$0xff] %v4549_v54  ;;  %v4552_v53 = vadd.f32 %v232_v55, %v4488_v62  ;;  %v4555_v1 = vadd.f32 %v305_v59, %v4479_v58  ;;  %v3396_v59 = vld [vmem:[%s5617_s5] ss:$0 sm:$0xff] }
 0x104   :  { %v234_v7 = vpop.f32.mrf.mxu0  ;;  %v307_v13 = vpop.f32.mrf.mxu1 }
 0x105   :  { %5658 = vst [vmem:[#allocation27_spill] sm:$0xff] %v4552_v53  ;;  %5659 = vst [vmem:[#allocation28_spill] sm:$0xff] %v4555_v1  ;;  %v4557_v0 = vadd.f32 %v234_v7, %v122_v3  ;;  %v4560_v50 = vadd.f32 %v307_v13, %v4492_v63 }
 0x106   :  { %v236_v24 = vpop.f32.mrf.mxu0  ;;  %v309_v51 = vpop.f32.mrf.mxu1 }
 0x107   :  { %5660 = vst [vmem:[#allocation29_spill] sm:$0xff] %v4557_v0  ;;  %5661 = vst [vmem:[#allocation30_spill] sm:$0xff] %v4560_v50  ;;  %v4563_v27 = vadd.f32 %v236_v24, %v4488_v62  ;;  %v4566_v54 = vadd.f32 %v309_v51, %v4479_v58 }
 0x108   :  { %v238_v55 = vpop.f32.mrf.mxu0  ;;  %v311_v53 = vpop.f32.mrf.mxu1 }
 0x109   :  { %5662 = vst [vmem:[#allocation31_spill] sm:$0xff] %v4563_v27  ;;  %5663 = vst [vmem:[#allocation32_spill] sm:$0xff] %v4566_v54  ;;  %v4571_v1 = vadd.f32 %v238_v55, %v122_v3  ;;  %v4574_v7 = vadd.f32 %v311_v53, %v4492_v63  ;;  %v205_v27 = vadd.f32 %v4482_v60, %v122_v3 }
 0x10a   :  { %v3577_v13 = vpop.f32.mrf.mxu0  ;;  %v203_v54 = vadd.f32 %v4473_v56, %v4488_v62 }
 0x10b   :  { %5664 = vst [vmem:[#allocation33_spill] sm:$0xff] %v4571_v1  ;;  %5665 = vst [vmem:[#allocation34_spill] sm:$0xff] %v4574_v7  ;;  %v4576_v50 = vadd.f32 %v3577_v13, %v3396_v59  ;;  %v666_v0 = vpop.f32.mrf.mxu1 }
 0x10c   :  { %v395_v24 = vpop.f32.mrf.mxu0  ;;  %v714_v1 = vadd.f32 %v666_v0, %v203_v54 }
 0x10d   :  { %5666 = vst [vmem:[#allocation35_spill] sm:$0xff] %v4576_v50  ;;  %v668_v51 = vpop.f32.mrf.mxu1 }
 0x10e   :  { %v3578_v6 = vpop.f32.mrf.mxu0  ;;  %v715_v16 = vadd.f32 %v668_v51, %v205_v27  ;;  %v3434_v31 = vmul.f32 -1.442695, %v714_v1  ;;  %v278_v1 = vadd.f32 %v4484_v61, %v4492_v63  ;;  %v5669_v61 = vlaneseq }
 0x10f   :  { %v4581_v52 = vadd.f32 %v3578_v6, %v3396_v59  ;;  %v670_v55 = vpop.f32.mrf.mxu1 }
 0x110   :  { %v398_v2 = vpop.f32.mrf.mxu0  ;;  %v3435_v50 = vmul.f32 -1.442695, %v715_v16  ;;  %v276_v16 = vadd.f32 %v4475_v57, %v4479_v58  ;;  %v93_v63 = vand.u32 127, %v5669_v61 }
 0x111   :  { %v4583_v53 = vadd.f32 %v3396_v59, %v398_v2  ;;  %v671_v7 = vpop.f32.mrf.mxu1 }
 0x112   :  { %v3581_v13 = vpop.f32.mrf.mxu0  ;;  %3770 = vpow2.f32 %v3435_v50  ;;  %vm94_vm1 = vcmp.lt.s32.totalorder %v93_v63, 32 }
 0x113   :  { %v4585_v21 = vadd.f32 %v3581_v13, %v3396_v59  ;;  %3772 = vpow2.f32 %v3434_v31 }
 0x114   :  { %v411_v60 = vpop.f32.mrf.mxu0 }
 0x115   :  { %5667 = vst [vmem:[#allocation36_spill] sm:$0xff] %v4585_v21  ;;  %v4587_v3 = vadd.f32 %v3396_v59, %v411_v60 }
 0x116   :  { %v3582_v28 = vpop.f32.mrf.mxu0 }
 0x117   :  { %v4589_v56 = vadd.f32 %v3582_v28, %v3396_v59 }
 0x118   :  { %v414_v62 = vpop.f32.mrf.mxu0 }
 0x119   :  { %5668 = vst [vmem:[#allocation37_spill] sm:$0xff] %v4589_v56  ;;  %v4591_v6 = vadd.f32 %v3396_v59, %v414_v62 }
 0x11f   :  { %v3771_v0 = vpop.eup %3770 }
 0x120   :  { %v3773_v2 = vpop.eup %3772  ;;  %v727_v54 = vadd.f32 1.0, %v3771_v0 }
 0x121   :  { %v721_v27 = vadd.f32 1.0, %v3773_v2 }
 0x122   :  { %3774 = vrcp.f32 %v727_v54 }
 0x123   :  { %3776 = vrcp.f32 %v721_v27 }
 0x12a   :  { %v707_v7 = vpop.f32.mrf.mxu0 }
 0x12b   :  { %v716_v51 = vadd.f32 %v707_v7, %v276_v16  ;;  %v396_v16 = vadd.f32 %v3396_v59, %v395_v24 }
 0x12c   :  { %v709_v28 = vpop.f32.mrf.mxu0 }
 0x12d   :  { %3778 = vtanh.f32 %v716_v51  ;;  %v717_v31 = vadd.f32 %v709_v28, %v278_v1  ;;  %v5637_v1 = vmov 0.0  }
 0x12e   :  { %v711_v50 = vpop.f32.mrf.mxu0  ;;  %v4602_v51 = vsel %vm94_vm1, 1.0, %v5637_v1 }
 0x12f   :  { %v3436_v55 = vmul.f32 -1.442695, %v717_v31  ;;  %v3775_v60 = vpop.eup %3774  ;;  %5670 = vst [vmem:[#allocation38_spill] sm:$0xff] %v4602_v51 }
 0x130   :  { %v712_v13 = vpop.f32.mrf.mxu0  ;;  %v3777_v62 = vpop.eup %3776  ;;  %v737_v2 = vmul.f32 0.0, %v3775_v60 }
 0x131   :  { %3780 = vpow2.f32 %v3436_v55 }
 0x13a   :  { %v3779_v0 = vpop.eup %3778 }
 0x13b   :  { %v738_v56 = vmul.f32 %v3779_v0, %v3777_v62 }
 0x13d   :  { %v4597_v57 = vadd.f32 %v738_v56, %v737_v2 }
 0x13e   :  { %v3781_v58 = vpop.eup %3780 }
 0x13f   :  { %v734_v21 = vadd.f32 1.0, %v3781_v58  ;;  %3782 = vtanh.f32 %v4597_v57 }
 0x141   :  { %3784 = vrcp.f32 %v734_v21  ;;  %v5671_v21 = vmov 0  }
 0x14c   :  { %v3783_v54 = vpop.eup %3782 }
 0x14e   :  { %v3785_v27 = vpop.eup %3784 }
 0x14f   :  { %v741_v7 = vmul.f32 %v3785_v27, %v3783_v54 }
 0x151   :  { %v777_v28 = vpack.c.bf16 %v741_v7, %v741_v7  ;;  %v4604_v31 = vadd.f32 %v741_v7, %v396_v16 }
 0x153   :  { %811 = vmatmul.mubr.bf16.vlgmr.msra.gmra.mxu1 %v777_v28  ;;  %852 = vmatmul.mubr.bf16.vlgmr.msra.gmra.mxu0 %v777_v28  ;;  %v744_v56 = vmul.f32 %v4602_v51, %v4604_v31 }
 0x154   :  { %914 = vmatpush1.bf16.msra.mxu1 %v4294_v10  ;;  %955 = vmatpush1.bf16.msra.mxu0 %v4376_v35 }
 0x155   :  { %745 = vadd.xlane.f32.xlu0 %v744_v56  ;;  %915 = vmatprep.subr.bf16.mxu1 %v4296_v11 }
 0x156   :  { %956 = vmatprep.subr.bf16.mxu0 %v4378_v36  ;;  %945 = vmatprep.mubr.bf16.mxu1 %v5671_v21 }
 0x157   :  { %986 = vmatprep.mubr.bf16.mxu0 %v5671_v21 }
 0x158   :  { %916 = vmatpush1.bf16.msra.mxu1 %v4308_v14  ;;  %957 = vmatpush1.bf16.msra.mxu0 %v4381_v37 }
 0x159   :  { %917 = vmatprep.subr.bf16.mxu1 %v4313_v15  ;;  %958 = vmatprep.subr.bf16.mxu0 %v4385_v38 }
 0x15c   :  { %918 = vmatpush1.bf16.msra.mxu1 %v4316_v17  ;;  %959 = vmatpush1.bf16.msra.mxu0 %v4391_v39 }
 0x15d   :  { %919 = vmatprep.subr.bf16.mxu1 %v4319_v18  ;;  %960 = vmatprep.subr.bf16.mxu0 %v4395_v40 }
 0x160   :  { %920 = vmatpush1.bf16.msra.mxu1 %v4323_v19  ;;  %961 = vmatpush1.bf16.msra.mxu0 %v4400_v41 }
 0x161   :  { %921 = vmatprep.subr.bf16.mxu1 %v4337_v23  ;;  %962 = vmatprep.subr.bf16.mxu0 %v4403_v42 }
 0x164   :  { %922 = vmatpush1.bf16.msra.mxu1 %v4341_v25  ;;  %963 = vmatpush1.bf16.msra.mxu0 %v4410_v43 }
 0x165   :  { %923 = vmatprep.subr.bf16.mxu1 %v4344_v26  ;;  %964 = vmatprep.subr.bf16.mxu0 %v4413_v44 }
 0x168   :  { %924 = vmatpush1.bf16.msra.mxu1 %v4357_v29  ;;  %965 = vmatpush1.bf16.msra.mxu0 %v4421_v45 }
 0x169   :  { %925 = vmatprep.subr.bf16.mxu1 %v4360_v30  ;;  %966 = vmatprep.subr.bf16.mxu0 %v4424_v46 }
 0x16c   :  { %926 = vmatpush1.bf16.msra.mxu1 %v4362_v32  ;;  %967 = vmatpush1.bf16.msra.mxu0 %v4429_v47 }
 0x16d   :  { %927 = vmatprep.subr.bf16.mxu1 %v4364_v33  ;;  %968 = vmatprep.subr.bf16.mxu0 %v4432_v48 }
 0x170   :  { %928 = vmatpush1.bf16.msra.mxu1 %v4370_v34  ;;  %969 = vmatpush1.bf16.msra.mxu0 %v4437_v49 }
 0x171   :  { %1048 = vmatprep.subr.bf16.mxu1 %v4292_v9  ;;  %1089 = vmatprep.subr.bf16.mxu0 %v4334_v22 }
 0x213   :  { %v812_v59 = vpop.f32.mrf.mxu1  ;;  %v853_v24 = vpop.f32.mrf.mxu0 }
 0x214   :  { %v860_v50 = vadd.f32 %v812_v59, %v4497_v4  ;;  %v862_v27 = vadd.f32 %v853_v24, %v4500_v5 }
 0x215   :  { %v814_v55 = vpop.f32.mrf.mxu1  ;;  %v855_v13 = vpop.f32.mrf.mxu0 }
 0x216   :  { %v3439_v60 = vmul.f32 -1.442695, %v860_v50  ;;  %v861_v62 = vadd.f32 %v814_v55, %v4502_v8  ;;  %v863_v54 = vadd.f32 %v855_v13, %v4505_v12 }
 0x217   :  { %v816_v0 = vpop.f32.mrf.mxu1  ;;  %v857_v2 = vpop.f32.mrf.mxu0 }
 0x218   :  { %3786 = vpow2.f32 %v3439_v60  ;;  %v3440_v58 = vmul.f32 -1.442695, %v861_v62  ;;  %v3441_v16 = vmul.f32 -1.442695, %v863_v54 }
 0x219   :  { %v817_v61 = vpop.f32.mrf.mxu1  ;;  %v858_v63 = vpop.f32.mrf.mxu0 }
 0x21a   :  { %3788 = vpow2.f32 %v3440_v58 }
 0x21b   :  { %3790 = vtanh.f32 %v862_v27 }
 0x21c   :  { %3792 = vpow2.f32 %v3441_v16 }
 0x225   :  { %v3787_v7 = vpop.eup %3786 }
 0x226   :  { %v867_v28 = vadd.f32 1.0, %v3787_v7  ;;  %v5673_v7 = vld [vmem:[#allocation14_spill] sm:$0xff] }
 0x227   :  { %v3789_v4 = vpop.eup %3788 }
 0x228   :  { %3794 = vrcp.f32 %v867_v28  ;;  %v873_v56 = vadd.f32 1.0, %v3789_v4  ;;  %v3791_v8 = vpop.eup %3790  ;;  %v5674_v28 = vld [vmem:[#allocation12_spill] sm:$0xff] }
 0x229   :  { %v3793_v59 = vpop.eup %3792 }
 0x22a   :  { %3796 = vrcp.f32 %v873_v56  ;;  %v880_v62 = vadd.f32 1.0, %v3793_v59 }
 0x22c   :  { %3798 = vrcp.f32 %v880_v62 }
 0x235   :  { %v3795_v50 = vpop.eup %3794 }
 0x236   :  { %v884_v55 = vmul.f32 %v3795_v50, %v3791_v8 }
 0x237   :  { %v3797_v60 = vpop.eup %3796 }
 0x238   :  { %v883_v0 = vmul.f32 %v3797_v60, %v4597_v57 }
 0x239   :  { %v3799_v5 = vpop.eup %3798 }
 0x23a   :  { %v4647_v12 = vadd.f32 %v884_v55, %v883_v0 }
 0x23c   :  { %3800 = vtanh.f32 %v4647_v12 }
 0x249   :  { %v3801_v24 = vpop.eup %3800 }
 0x24a   :  { %v887_v13 = vmul.f32 %v3801_v24, %v3799_v5 }
 0x24c   :  { %v912_v2 = vpack.c.bf16 %v887_v13, %v887_v13  ;;  %v4651_v58 = vadd.f32 %v887_v13, %v4583_v53 }
 0x24e   :  { %946 = vmatmul.mubr.bf16.vlgmr.msra.gmra.mxu1 %v912_v2  ;;  %987 = vmatmul.mubr.bf16.vlgmr.msra.gmra.mxu0 %v912_v2  ;;  %v891_v61 = vmul.f32 %v4602_v51, %v4651_v58 }
 0x24f   :  { %1049 = vmatpush1.bf16.msra.mxu1 %v4294_v10  ;;  %1090 = vmatpush1.bf16.msra.mxu0 %v4376_v35 }
 0x250   :  { %892 = vadd.xlane.f32.xlu0 %v891_v61  ;;  %1050 = vmatprep.subr.bf16.mxu1 %v4296_v11 }
 0x251   :  { %1091 = vmatprep.subr.bf16.mxu0 %v4378_v36  ;;  %1080 = vmatprep.mubr.bf16.mxu1 %v5671_v21 }
 0x252   :  { %1121 = vmatprep.mubr.bf16.mxu0 %v5671_v21 }
 0x253   :  { %1051 = vmatpush1.bf16.msra.mxu1 %v4308_v14  ;;  %1092 = vmatpush1.bf16.msra.mxu0 %v4381_v37 }
 0x254   :  { %1052 = vmatprep.subr.bf16.mxu1 %v4313_v15  ;;  %1093 = vmatprep.subr.bf16.mxu0 %v4385_v38 }
 0x257   :  { %1053 = vmatpush1.bf16.msra.mxu1 %v4316_v17  ;;  %1094 = vmatpush1.bf16.msra.mxu0 %v4391_v39 }
 0x258   :  { %1054 = vmatprep.subr.bf16.mxu1 %v4319_v18  ;;  %1095 = vmatprep.subr.bf16.mxu0 %v4395_v40 }
 0x25b   :  { %1055 = vmatpush1.bf16.msra.mxu1 %v4323_v19  ;;  %1096 = vmatpush1.bf16.msra.mxu0 %v4400_v41  ;;  %v5672_v19 = vld [vmem:[#allocation13_spill] sm:$0xff] }
 0x25c   :  { %1056 = vmatprep.subr.bf16.mxu1 %v4337_v23  ;;  %1097 = vmatprep.subr.bf16.mxu0 %v4403_v42 }
 0x25f   :  { %1057 = vmatpush1.bf16.msra.mxu1 %v4341_v25  ;;  %1098 = vmatpush1.bf16.msra.mxu0 %v4410_v43 }
 0x260   :  { %1058 = vmatprep.subr.bf16.mxu1 %v4344_v26  ;;  %1099 = vmatprep.subr.bf16.mxu0 %v4413_v44 }
 0x263   :  { %1059 = vmatpush1.bf16.msra.mxu1 %v4357_v29  ;;  %1100 = vmatpush1.bf16.msra.mxu0 %v4421_v45 }
 0x264   :  { %1060 = vmatprep.subr.bf16.mxu1 %v4360_v30  ;;  %1101 = vmatprep.subr.bf16.mxu0 %v4424_v46 }
 0x267   :  { %1061 = vmatpush1.bf16.msra.mxu1 %v4362_v32  ;;  %1102 = vmatpush1.bf16.msra.mxu0 %v4429_v47 }
 0x268   :  { %1062 = vmatprep.subr.bf16.mxu1 %v4364_v33  ;;  %1103 = vmatprep.subr.bf16.mxu0 %v4432_v48 }
 0x26b   :  { %1063 = vmatpush1.bf16.msra.mxu1 %v4370_v34  ;;  %1104 = vmatpush1.bf16.msra.mxu0 %v4437_v49 }
 0x26c   :  { %1183 = vmatprep.subr.bf16.mxu1 %v4292_v9  ;;  %1224 = vmatprep.subr.bf16.mxu0 %v4334_v22 }
 0x30e   :  { %v947_v10 = vpop.f32.mrf.mxu1  ;;  %v988_v11 = vpop.f32.mrf.mxu0 }
 0x30f   :  { %v995_v14 = vadd.f32 %v947_v10, %v4508_v20  ;;  %v997_v22 = vadd.f32 %v988_v11, %v5674_v28 }
 0x310   :  { %v949_v15 = vpop.f32.mrf.mxu1  ;;  %v990_v17 = vpop.f32.mrf.mxu0 }
 0x311   :  { %v3442_v18 = vmul.f32 -1.442695, %v995_v14  ;;  %v996_v53 = vadd.f32 %v949_v15, %v5672_v19  ;;  %v998_v9 = vadd.f32 %v990_v17, %v5673_v7  ;;  %v5675_v14 = vld [vmem:[#allocation35_spill] sm:$0xff]  ;;  %v5677_v7 = vld [vmem:[#allocation17_spill] sm:$0xff] }
 0x312   :  { %v951_v57 = vpop.f32.mrf.mxu1  ;;  %v992_v63 = vpop.f32.mrf.mxu0  ;;  %v4712_v19 = vld [vmem:[#allocation4 + $0xc0] ss:$16 sps:$4 sm:$0xff]  }
 0x313   :  { %3802 = vpow2.f32 %v3442_v18  ;;  %v3443_v54 = vmul.f32 -1.442695, %v996_v53  ;;  %v3444_v4 = vmul.f32 -1.442695, %v998_v9  ;;  %v4702_v18 = vld [vmem:[#allocation4 + $0xe0] ss:$16 sps:$4 sm:$0xff]  }
 0x314   :  { %v952_v27 = vpop.f32.mrf.mxu1  ;;  %v993_v16 = vpop.f32.mrf.mxu0  ;;  %v4716_v53 = vld [vmem:[#allocation4 + $0xa4] ss:$16 sps:$4 sm:$0xff]   ;;  %v4720_v57 = vld [vmem:[#allocation4 + $0xa0] ss:$16 sps:$4 sm:$0xff]  }
 0x315   :  { %3804 = vpow2.f32 %v3443_v54  ;;  %v4724_v63 = vld [vmem:[#allocation4 + $0x84] ss:$16 sps:$4 sm:$0xff]   ;;  %v4728_v54 = vld [vmem:[#allocation4 + $0x80] ss:$16 sps:$4 sm:$0xff]  }
 0x316   :  { %3806 = vtanh.f32 %v997_v22 }
 0x317   :  { %3808 = vpow2.f32 %v3444_v4 }
 0x320   :  { %v3803_v56 = vpop.eup %3802 }
 0x321   :  { %v1002_v8 = vadd.f32 1.0, %v3803_v56 }
 0x322   :  { %v3805_v20 = vpop.eup %3804 }
 0x323   :  { %3810 = vrcp.f32 %v1002_v8  ;;  %v1008_v59 = vadd.f32 1.0, %v3805_v20  ;;  %v3807_v50 = vpop.eup %3806  ;;  %v5678_v8 = vld [vmem:[#allocation18_spill] sm:$0xff] }
 0x324   :  { %v3809_v55 = vpop.eup %3808 }
 0x325   :  { %3812 = vrcp.f32 %v1008_v59  ;;  %v1015_v5 = vadd.f32 1.0, %v3809_v55  ;;  %v5679_v59 = vld [vmem:[#allocation16_spill] sm:$0xff] }
 0x327   :  { %3814 = vrcp.f32 %v1015_v5 }
 0x330   :  { %v3811_v60 = vpop.eup %3810 }
 0x331   :  { %v1019_v62 = vmul.f32 %v3811_v60, %v3807_v50 }
 0x332   :  { %v3813_v0 = vpop.eup %3812 }
 0x333   :  { %v1018_v24 = vmul.f32 %v3813_v0, %v4647_v12  ;;  %v4706_v12 = vld [vmem:[#allocation4 + $0xc4] ss:$16 sps:$4 sm:$0xff]  }
 0x334   :  { %v3815_v2 = vpop.eup %3814 }
 0x335   :  { %v4694_v13 = vadd.f32 %v1019_v62, %v1018_v24 }
 0x337   :  { %3816 = vtanh.f32 %v4694_v13 }
 0x344   :  { %v3817_v61 = vpop.eup %3816 }
 0x345   :  { %v1022_v10 = vmul.f32 %v3817_v61, %v3815_v2 }
 0x347   :  { %v1047_v11 = vpack.c.bf16 %v1022_v10, %v1022_v10  ;;  %v4698_v15 = vadd.f32 %v1022_v10, %v5675_v14 }
 0x349   :  { %1081 = vmatmul.mubr.bf16.vlgmr.msra.gmra.mxu1 %v1047_v11  ;;  %1122 = vmatmul.mubr.bf16.vlgmr.msra.gmra.mxu0 %v1047_v11  ;;  %v1026_v17 = vmul.f32 %v4602_v51, %v4698_v15 }
 0x34a   :  { %1184 = vmatpush1.bf16.msra.mxu1 %v4702_v18  ;;  %1225 = vmatpush1.bf16.msra.mxu0 %v4376_v35 }
 0x34b   :  { %1027 = vadd.xlane.f32.xlu1 %v1026_v17  ;;  %1185 = vmatprep.subr.bf16.mxu1 %v4706_v12 }
 0x34c   :  { %1226 = vmatprep.subr.bf16.mxu0 %v4378_v36  ;;  %1215 = vmatprep.mubr.bf16.mxu1 %v5671_v21 }
 0x34d   :  { %1256 = vmatprep.mubr.bf16.mxu0 %v5671_v21 }
 0x34e   :  { %1186 = vmatpush1.bf16.msra.mxu1 %v4712_v19  ;;  %1227 = vmatpush1.bf16.msra.mxu0 %v4381_v37 }
 0x34f   :  { %1187 = vmatprep.subr.bf16.mxu1 %v4716_v53  ;;  %1228 = vmatprep.subr.bf16.mxu0 %v4385_v38 }
 0x352   :  { %1188 = vmatpush1.bf16.msra.mxu1 %v4720_v57  ;;  %1229 = vmatpush1.bf16.msra.mxu0 %v4391_v39 }
 0x353   :  { %1189 = vmatprep.subr.bf16.mxu1 %v4724_v63  ;;  %1230 = vmatprep.subr.bf16.mxu0 %v4395_v40 }
 0x356   :  { %1190 = vmatpush1.bf16.msra.mxu1 %v4728_v54  ;;  %1231 = vmatpush1.bf16.msra.mxu0 %v4400_v41 }
 0x357   :  { %1191 = vmatprep.subr.bf16.mxu1 %v4337_v23  ;;  %1232 = vmatprep.subr.bf16.mxu0 %v4403_v42  ;;  %v4748_v23 = vld [vmem:[#allocation4 + $0xe4] ss:$16 sps:$4 sm:$0xff]  }
 0x35a   :  { %1192 = vmatpush1.bf16.msra.mxu1 %v4341_v25  ;;  %1233 = vmatpush1.bf16.msra.mxu0 %v4410_v43  ;;  %v4751_v25 = vld [vmem:[#allocation4 + $0xec] ss:$16 sps:$4 sm:$0xff]  }
 0x35b   :  { %1193 = vmatprep.subr.bf16.mxu1 %v4344_v26  ;;  %1234 = vmatprep.subr.bf16.mxu0 %v4413_v44 }
 0x35e   :  { %1194 = vmatpush1.bf16.msra.mxu1 %v4357_v29  ;;  %1235 = vmatpush1.bf16.msra.mxu0 %v4421_v45 }
 0x35f   :  { %1195 = vmatprep.subr.bf16.mxu1 %v4360_v30  ;;  %1236 = vmatprep.subr.bf16.mxu0 %v4424_v46  ;;  %v5676_v30 = vld [vmem:[#allocation15_spill] sm:$0xff] }
 0x362   :  { %1196 = vmatpush1.bf16.msra.mxu1 %v4362_v32  ;;  %1237 = vmatpush1.bf16.msra.mxu0 %v4429_v47 }
 0x363   :  { %1197 = vmatprep.subr.bf16.mxu1 %v4364_v33  ;;  %1238 = vmatprep.subr.bf16.mxu0 %v4432_v48 }
 0x366   :  { %1198 = vmatpush1.bf16.msra.mxu1 %v4370_v34  ;;  %1239 = vmatpush1.bf16.msra.mxu0 %v4437_v49 }
 0x367   :  { %1318 = vmatprep.subr.bf16.mxu1 %v4748_v23  ;;  %1359 = vmatprep.subr.bf16.mxu0 %v4751_v25 }
 0x409   :  { %v1082_v26 = vpop.f32.mrf.mxu1  ;;  %v1123_v29 = vpop.f32.mrf.mxu0 }
 0x40a   :  { %v1130_v32 = vadd.f32 %v1082_v26, %v5676_v30  ;;  %v1132_v50 = vadd.f32 %v1123_v29, %v5679_v59 }
 0x40b   :  { %v1084_v27 = vpop.f32.mrf.mxu1  ;;  %v1125_v33 = vpop.f32.mrf.mxu0 }
 0x40c   :  { %v3445_v16 = vmul.f32 -1.442695, %v1130_v32  ;;  %v1131_v9 = vadd.f32 %v1084_v27, %v5677_v7  ;;  %v1133_v20 = vadd.f32 %v1125_v33, %v5678_v8 }
 0x40d   :  { %v1086_v34 = vpop.f32.mrf.mxu1  ;;  %v1127_v28 = vpop.f32.mrf.mxu0 }
 0x40e   :  { %3818 = vpow2.f32 %v3445_v16  ;;  %v3446_v22 = vmul.f32 -1.442695, %v1131_v9  ;;  %v3447_v55 = vmul.f32 -1.442695, %v1133_v20  ;;  %v5681_v9 = vld [vmem:[#allocation21_spill] sm:$0xff]  ;;  %v5682_v20 = vld [vmem:[#allocation22_spill] sm:$0xff] }
 0x40f   :  { %v1087_v4 = vpop.f32.mrf.mxu1  ;;  %v1128_v56 = vpop.f32.mrf.mxu0 }
 0x410   :  { %3820 = vpow2.f32 %v3446_v22 }
 0x411   :  { %3822 = vtanh.f32 %v1132_v50  ;;  %v5683_v50 = vld [vmem:[#allocation20_spill] sm:$0xff] }
 0x412   :  { %3824 = vpow2.f32 %v3447_v55 }
 0x41b   :  { %v3819_v60 = vpop.eup %3818 }
 0x41c   :  { %v1137_v62 = vadd.f32 1.0, %v3819_v60 }
 0x41d   :  { %v3821_v0 = vpop.eup %3820 }
 0x41e   :  { %3826 = vrcp.f32 %v1137_v62  ;;  %v1143_v5 = vadd.f32 1.0, %v3821_v0  ;;  %v3823_v24 = vpop.eup %3822 }
 0x41f   :  { %v3825_v2 = vpop.eup %3824 }
 0x420   :  { %3828 = vrcp.f32 %v1143_v5  ;;  %v1150_v14 = vadd.f32 1.0, %v3825_v2 }
 0x422   :  { %3830 = vrcp.f32 %v1150_v14 }
 0x42b   :  { %v3827_v61 = vpop.eup %3826 }
 0x42c   :  { %v1154_v10 = vmul.f32 %v3827_v61, %v3823_v24 }
 0x42d   :  { %v3829_v11 = vpop.eup %3828 }
 0x42e   :  { %v1153_v17 = vmul.f32 %v3829_v11, %v4694_v13 }
 0x42f   :  { %v3831_v29 = vpop.eup %3830 }
 0x430   :  { %v4759_v26 = vadd.f32 %v1154_v10, %v1153_v17 }
 0x432   :  { %3832 = vtanh.f32 %v4759_v26 }
 0x43f   :  { %v3833_v30 = vpop.eup %3832 }
 0x440   :  { %v1157_v32 = vmul.f32 %v3833_v30, %v3831_v29 }
 0x442   :  { %v1182_v27 = vpack.c.bf16 %v1157_v32, %v1157_v32  ;;  %v4763_v33 = vadd.f32 %v1157_v32, %v4581_v52 }
 0x444   :  { %1216 = vmatmul.mubr.bf16.vlgmr.msra.gmra.mxu1 %v1182_v27  ;;  %1257 = vmatmul.mubr.bf16.vlgmr.msra.gmra.mxu0 %v1182_v27  ;;  %v1161_v16 = vmul.f32 %v4602_v51, %v4763_v33 }
 0x445   :  { %1319 = vmatpush1.bf16.msra.mxu1 %v4702_v18  ;;  %1360 = vmatpush1.bf16.msra.mxu0 %v4376_v35  ;;  %v4783_v35 = vld [vmem:[#allocation4 + $0x64] ss:$16 sps:$4 sm:$0xff]  }
 0x446   :  { %1162 = vadd.xlane.f32.xlu1 %v1161_v16  ;;  %1320 = vmatprep.subr.bf16.mxu1 %v4706_v12 }
 0x447   :  { %1361 = vmatprep.subr.bf16.mxu0 %v4378_v36  ;;  %1350 = vmatprep.mubr.bf16.mxu1 %v5671_v21  ;;  %v4787_v36 = vld [vmem:[#allocation4 + $0x60] ss:$16 sps:$4 sm:$0xff]  }
 0x448   :  { %1391 = vmatprep.mubr.bf16.mxu0 %v5671_v21 }
 0x449   :  { %1321 = vmatpush1.bf16.msra.mxu1 %v4712_v19  ;;  %1362 = vmatpush1.bf16.msra.mxu0 %v4381_v37  ;;  %v4791_v37 = vld [vmem:[#allocation4 + $0x44] ss:$16 sps:$4 sm:$0xff]  }
 0x44a   :  { %1322 = vmatprep.subr.bf16.mxu1 %v4716_v53  ;;  %1363 = vmatprep.subr.bf16.mxu0 %v4385_v38  ;;  %v4795_v38 = vld [vmem:[#allocation4 + $0x40] ss:$16 sps:$4 sm:$0xff]  }
 0x44d   :  { %1323 = vmatpush1.bf16.msra.mxu1 %v4720_v57  ;;  %1364 = vmatpush1.bf16.msra.mxu0 %v4391_v39  ;;  %v4799_v39 = vld [vmem:[#allocation4 + $0x24] ss:$16 sps:$4 sm:$0xff]  }
 0x44e   :  { %1324 = vmatprep.subr.bf16.mxu1 %v4724_v63  ;;  %1365 = vmatprep.subr.bf16.mxu0 %v4395_v40  ;;  %v4803_v40 = vld [vmem:[#allocation4 + $0x20] ss:$16 sps:$4 sm:$0xff]  }
 0x451   :  { %1325 = vmatpush1.bf16.msra.mxu1 %v4728_v54  ;;  %1366 = vmatpush1.bf16.msra.mxu0 %v4400_v41  ;;  %v4807_v41 = vld [vmem:[#allocation4 + $0x4] ss:$16 sps:$4 sm:$0xff]  }
 0x452   :  { %1326 = vmatprep.subr.bf16.mxu1 %v4783_v35  ;;  %1367 = vmatprep.subr.bf16.mxu0 %v4403_v42  ;;  %v4811_v42 = vld [vmem:[#allocation4] ss:$16 sps:$4 sm:$0xff]  }
 0x455   :  { %1327 = vmatpush1.bf16.msra.mxu1 %v4787_v36  ;;  %1368 = vmatpush1.bf16.msra.mxu0 %v4410_v43 }
 0x456   :  { %1328 = vmatprep.subr.bf16.mxu1 %v4791_v37  ;;  %1369 = vmatprep.subr.bf16.mxu0 %v4413_v44 }
 0x459   :  { %1329 = vmatpush1.bf16.msra.mxu1 %v4795_v38  ;;  %1370 = vmatpush1.bf16.msra.mxu0 %v4421_v45  ;;  %v5680_v45 = vld [vmem:[#allocation19_spill] sm:$0xff] }
 0x45a   :  { %1330 = vmatprep.subr.bf16.mxu1 %v4799_v39  ;;  %1371 = vmatprep.subr.bf16.mxu0 %v4424_v46 }
 0x45d   :  { %1331 = vmatpush1.bf16.msra.mxu1 %v4803_v40  ;;  %1372 = vmatpush1.bf16.msra.mxu0 %v4429_v47 }
 0x45e   :  { %1332 = vmatprep.subr.bf16.mxu1 %v4807_v41  ;;  %1373 = vmatprep.subr.bf16.mxu0 %v4432_v48 }
 0x461   :  { %1333 = vmatpush1.bf16.msra.mxu1 %v4811_v42  ;;  %1374 = vmatpush1.bf16.msra.mxu0 %v4437_v49 }
 0x462   :  { %1453 = vmatprep.subr.bf16.mxu1 %v4748_v23  ;;  %1494 = vmatprep.subr.bf16.mxu0 %v4751_v25 }
 0x504   :  { %v1217_v43 = vpop.f32.mrf.mxu1  ;;  %v1258_v44 = vpop.f32.mrf.mxu0 }
 0x505   :  { %v1265_v46 = vadd.f32 %v1217_v43, %v5680_v45  ;;  %v1267_v55 = vadd.f32 %v1258_v44, %v5683_v50 }
 0x506   :  { %v1219_v52 = vpop.f32.mrf.mxu1  ;;  %v1260_v13 = vpop.f32.mrf.mxu0 }
 0x507   :  { %v3448_v7 = vmul.f32 -1.442695, %v1265_v46  ;;  %v1266_v34 = vadd.f32 %v1219_v52, %v5681_v9  ;;  %v1268_v59 = vadd.f32 %v1260_v13, %v5682_v20  ;;  %v4835_v46 = vld [vmem:[#allocation4 + $0xcc] ss:$16 sps:$4 sm:$0xff]   ;;  %v4849_v13 = vld [vmem:[#allocation4 + $0xa8] ss:$16 sps:$4 sm:$0xff]  }
 0x508   :  { %v1221_v28 = vpop.f32.mrf.mxu1  ;;  %v1262_v22 = vpop.f32.mrf.mxu0  ;;  %v4845_v52 = vld [vmem:[#allocation4 + $0xac] ss:$16 sps:$4 sm:$0xff]   ;;  %v4857_v9 = vld [vmem:[#allocation4 + $0x88] ss:$16 sps:$4 sm:$0xff]  }
 0x509   :  { %3834 = vpow2.f32 %v3448_v7  ;;  %v3449_v4 = vmul.f32 -1.442695, %v1266_v34  ;;  %v3450_v60 = vmul.f32 -1.442695, %v1268_v59  ;;  %v4853_v7 = vld [vmem:[#allocation4 + $0x8c] ss:$16 sps:$4 sm:$0xff]  }
 0x50a   :  { %v1222_v56 = vpop.f32.mrf.mxu1  ;;  %v1263_v8 = vpop.f32.mrf.mxu0  ;;  %v4861_v34 = vld [vmem:[#allocation4 + $0x6c] ss:$16 sps:$4 sm:$0xff]   ;;  %v4865_v28 = vld [vmem:[#allocation4 + $0x68] ss:$16 sps:$4 sm:$0xff]   ;;  %v5684_v59 = vld [vmem:[#allocation23_spill] sm:$0xff] }
 0x50b   :  { %3836 = vpow2.f32 %v3449_v4  ;;  %v4869_v22 = vld [vmem:[#allocation4 + $0x4c] ss:$16 sps:$4 sm:$0xff]   ;;  %v4873_v4 = vld [vmem:[#allocation4 + $0x48] ss:$16 sps:$4 sm:$0xff]  }
 0x50c   :  { %3838 = vtanh.f32 %v1267_v55  ;;  %v4877_v56 = vld [vmem:[#allocation4 + $0x2c] ss:$16 sps:$4 sm:$0xff]  }
 0x50d   :  { %3840 = vpow2.f32 %v3450_v60 }
 0x516   :  { %v3835_v62 = vpop.eup %3834 }
 0x517   :  { %v1272_v0 = vadd.f32 1.0, %v3835_v62 }
 0x518   :  { %v3837_v5 = vpop.eup %3836 }
 0x519   :  { %3842 = vrcp.f32 %v1272_v0  ;;  %v1278_v24 = vadd.f32 1.0, %v3837_v5  ;;  %v3839_v2 = vpop.eup %3838 }
 0x51a   :  { %v3841_v61 = vpop.eup %3840 }
 0x51b   :  { %3844 = vrcp.f32 %v1278_v24  ;;  %v1285_v17 = vadd.f32 1.0, %v3841_v61 }
 0x51d   :  { %3846 = vrcp.f32 %v1285_v17 }
 0x526   :  { %v3843_v10 = vpop.eup %3842 }
 0x527   :  { %v1289_v11 = vmul.f32 %v3843_v10, %v3839_v2  ;;  %v5687_v10 = vld [vmem:[#allocation24_spill] sm:$0xff] }
 0x528   :  { %v3845_v14 = vpop.eup %3844 }
 0x529   :  { %v1288_v29 = vmul.f32 %v3845_v14, %v4759_v26  ;;  %v4831_v26 = vld [vmem:[#allocation4 + $0xe8] ss:$16 sps:$4 sm:$0xff]  }
 0x52a   :  { %v3847_v32 = vpop.eup %3846 }
 0x52b   :  { %v4822_v30 = vadd.f32 %v1289_v11, %v1288_v29 }
 0x52d   :  { %3848 = vtanh.f32 %v4822_v30 }
 0x53a   :  { %v3849_v27 = vpop.eup %3848 }
 0x53b   :  { %v1292_v16 = vmul.f32 %v3849_v27, %v3847_v32 }
 0x53d   :  { %v1317_v43 = vpack.c.bf16 %v1292_v16, %v1292_v16  ;;  %v4826_v44 = vadd.f32 %v1292_v16, %v4587_v3  ;;  %v4841_v3 = vld [vmem:[#allocation4 + $0xc8] ss:$16 sps:$4 sm:$0xff]  }
 0x53f   :  { %1351 = vmatmul.mubr.bf16.vlgmr.msra.gmra.mxu1 %v1317_v43  ;;  %1392 = vmatmul.mubr.bf16.vlgmr.msra.gmra.mxu0 %v1317_v43  ;;  %v1296_v45 = vmul.f32 %v4602_v51, %v4826_v44 }
 0x540   :  { %1454 = vmatpush1.bf16.msra.mxu1 %v4702_v18  ;;  %1495 = vmatpush1.bf16.msra.mxu0 %v4831_v26 }
 0x541   :  { %1297 = vadd.xlane.f32.xlu0 %v1296_v45  ;;  %1455 = vmatprep.subr.bf16.mxu1 %v4706_v12 }
 0x542   :  { %1496 = vmatprep.subr.bf16.mxu0 %v4835_v46  ;;  %1485 = vmatprep.mubr.bf16.mxu1 %v5671_v21 }
 0x543   :  { %1526 = vmatprep.mubr.bf16.mxu0 %v5671_v21 }
 0x544   :  { %1456 = vmatpush1.bf16.msra.mxu1 %v4712_v19  ;;  %1497 = vmatpush1.bf16.msra.mxu0 %v4841_v3 }
 0x545   :  { %1457 = vmatprep.subr.bf16.mxu1 %v4716_v53  ;;  %1498 = vmatprep.subr.bf16.mxu0 %v4845_v52 }
 0x548   :  { %1458 = vmatpush1.bf16.msra.mxu1 %v4720_v57  ;;  %1499 = vmatpush1.bf16.msra.mxu0 %v4849_v13 }
 0x549   :  { %1459 = vmatprep.subr.bf16.mxu1 %v4724_v63  ;;  %1500 = vmatprep.subr.bf16.mxu0 %v4853_v7 }
 0x54c   :  { %1460 = vmatpush1.bf16.msra.mxu1 %v4728_v54  ;;  %1501 = vmatpush1.bf16.msra.mxu0 %v4857_v9 }
 0x54d   :  { %1461 = vmatprep.subr.bf16.mxu1 %v4783_v35  ;;  %1502 = vmatprep.subr.bf16.mxu0 %v4861_v34 }
 0x550   :  { %1462 = vmatpush1.bf16.msra.mxu1 %v4787_v36  ;;  %1503 = vmatpush1.bf16.msra.mxu0 %v4865_v28 }
 0x551   :  { %1463 = vmatprep.subr.bf16.mxu1 %v4791_v37  ;;  %1504 = vmatprep.subr.bf16.mxu0 %v4869_v22 }
 0x554   :  { %1464 = vmatpush1.bf16.msra.mxu1 %v4795_v38  ;;  %1505 = vmatpush1.bf16.msra.mxu0 %v4873_v4 }
 0x555   :  { %1465 = vmatprep.subr.bf16.mxu1 %v4799_v39  ;;  %1506 = vmatprep.subr.bf16.mxu0 %v4877_v56 }
 0x558   :  { %1466 = vmatpush1.bf16.msra.mxu1 %v4803_v40  ;;  %1507 = vmatpush1.bf16.msra.mxu0 %v4429_v47  ;;  %v5685_v47 = vld [vmem:[#allocation25_spill] sm:$0xff] }
 0x559   :  { %1467 = vmatprep.subr.bf16.mxu1 %v4807_v41  ;;  %1508 = vmatprep.subr.bf16.mxu0 %v4432_v48 }
 0x55c   :  { %1468 = vmatpush1.bf16.msra.mxu1 %v4811_v42  ;;  %1509 = vmatpush1.bf16.msra.mxu0 %v4437_v49  ;;  %v5686_v49 = vld [vmem:[#allocation26_spill] sm:$0xff] }
 0x55d   :  { %1588 = vmatprep.subr.bf16.mxu1 %v4748_v23  ;;  %1629 = vmatprep.subr.bf16.mxu0 %v4751_v25 }
 0x5ff   :  { %v1352_v8 = vpop.f32.mrf.mxu1  ;;  %v1393_v20 = vpop.f32.mrf.mxu0 }
 0x600   :  { %v1400_v50 = vadd.f32 %v1352_v8, %v5684_v59  ;;  %v1402_v25 = vadd.f32 %v1393_v20, %v5687_v10 }
 0x601   :  { %v1354_v55 = vpop.f32.mrf.mxu1  ;;  %v1395_v60 = vpop.f32.mrf.mxu0 }
 0x602   :  { %v3451_v62 = vmul.f32 -1.442695, %v1400_v50  ;;  %v1401_v0 = vadd.f32 %v1354_v55, %v5685_v47  ;;  %v1403_v23 = vadd.f32 %v1395_v60, %v5686_v49 }
 0x603   :  { %v1356_v5 = vpop.f32.mrf.mxu1  ;;  %v1397_v24 = vpop.f32.mrf.mxu0 }
 0x604   :  { %3850 = vpow2.f32 %v3451_v62  ;;  %v3452_v48 = vmul.f32 -1.442695, %v1401_v0  ;;  %v3453_v11 = vmul.f32 -1.442695, %v1403_v23  ;;  %v746_v23 = vpop.xlane.xlu0 %745 }
 0x605   :  { %v1357_v2 = vpop.f32.mrf.mxu1  ;;  %v1398_v61 = vpop.f32.mrf.mxu0  ;;  %v747_v10 = vmul.f32 0.03125, %v746_v23 }
 0x606   :  { %3852 = vpow2.f32 %v3452_v48 }
 0x607   :  { %3854 = vtanh.f32 %v1402_v25 }
 0x608   :  { %3856 = vpow2.f32 %v3453_v11  ;;  %v4938_v25 = vpop.xlane.xlu0 %892  ;;  %v1028_v11 = vpop.xlane.xlu1 %1027 }
 0x611   :  { %v3851_v14 = vpop.eup %3850 }
 0x612   :  { %v1407_v17 = vadd.f32 1.0, %v3851_v14 }
 0x613   :  { %v3853_v29 = vpop.eup %3852 }
 0x614   :  { %3858 = vrcp.f32 %v1407_v17  ;;  %v1413_v32 = vadd.f32 1.0, %v3853_v29  ;;  %v3855_v27 = vpop.eup %3854  ;;  %v748_v29 = vsub.f32 %v4604_v31, %v747_v10 }
 0x615   :  { %v3857_v16 = vpop.eup %3856 }
 0x616   :  { %3860 = vrcp.f32 %v1413_v32  ;;  %v1420_v59 = vadd.f32 1.0, %v3857_v16  ;;  %v1029_v32 = vmul.f32 0.03125, %v1028_v11  ;;  %v1298_v16 = vpop.xlane.xlu0 %1297 }
 0x618   :  { %3862 = vrcp.f32 %v1420_v59  ;;  %v1030_v59 = vsub.f32 %v4698_v15, %v1029_v32  ;;  %v894_v32 = vmul.f32 0.03125, %v4938_v25 }
 0x61a   :  { %v4953_v15 = vmul.f32 %v4602_v51, %v1030_v59 }
 0x621   :  { %v3859_v43 = vpop.eup %3858 }
 0x622   :  { %v1424_v45 = vmul.f32 %v3859_v43, %v3855_v27 }
 0x623   :  { %v3861_v8 = vpop.eup %3860 }
 0x624   :  { %v1423_v50 = vmul.f32 %v3861_v8, %v4822_v30 }
 0x625   :  { %v3863_v20 = vpop.eup %3862 }
 0x626   :  { %v4893_v55 = vadd.f32 %v1424_v45, %v1423_v50  ;;  %v5692_v45 = vld [vmem:[#allocation36_spill] sm:$0xff]  ;;  %v1299_v50 = vmul.f32 0.03125, %v1298_v16 }
 0x628   :  { %3864 = vtanh.f32 %v4893_v55  ;;  %v1300_v31 = vsub.f32 %v4826_v44, %v1299_v50 }
 0x635   :  { %v3865_v60 = vpop.eup %3864 }
 0x636   :  { %v1427_v62 = vmul.f32 %v3865_v60, %v3863_v20  ;;  %v4945_v20 = vmul.f32 %v4602_v51, %v748_v29 }
 0x638   :  { %v1452_v47 = vpack.c.bf16 %v1427_v62, %v1427_v62  ;;  %v4897_v0 = vadd.f32 %v1427_v62, %v4591_v6  ;;  %v4073_v6 = vld [vmem:[#allocation4 + $0x28] ss:$16 sps:$4 sm:$0xff]   ;;  %v750_v60 = vmul.f32 %v4945_v20, %v4945_v20  ;;  %v1032_v62 = vmul.f32 %v4953_v15, %v4953_v15 }
 0x63a   :  { %1486 = vmatmul.mubr.bf16.vlgmr.msra.gmra.mxu1 %v1452_v47  ;;  %1527 = vmatmul.mubr.bf16.vlgmr.msra.gmra.mxu0 %v1452_v47  ;;  %v1431_v5 = vmul.f32 %v4602_v51, %v4897_v0  ;;  %v4958_v47 = vmul.f32 %v4602_v51, %v1300_v31 }
 0x63b   :  { %1589 = vmatpush1.bf16.msra.mxu1 %v4702_v18  ;;  %1630 = vmatpush1.bf16.msra.mxu0 %v4831_v26  ;;  %v4074_v18 = vld [vmem:[#allocation4 + $0xc] ss:$16 sps:$4 sm:$0xff]  }
 0x63c   :  { %1432 = vadd.xlane.f32.xlu1 %v1431_v5  ;;  %1590 = vmatprep.subr.bf16.mxu1 %v4706_v12  ;;  %v4075_v12 = vld [vmem:[#allocation4 + $0x8] ss:$16 sps:$4 sm:$0xff]   ;;  %v1302_v5 = vmul.f32 %v4958_v47, %v4958_v47 }
 0x63d   :  { %1631 = vmatprep.subr.bf16.mxu0 %v4835_v46  ;;  %1620 = vmatprep.mubr.bf16.mxu1 %v5671_v21  ;;  %v5690_v46 = vld [vmem:[#allocation30_spill] sm:$0xff] }
 0x63e   :  { %1661 = vmatprep.mubr.bf16.mxu0 %v5671_v21 }
 0x63f   :  { %1591 = vmatpush1.bf16.msra.mxu1 %v4712_v19  ;;  %1632 = vmatpush1.bf16.msra.mxu0 %v4841_v3  ;;  %v5691_v3 = vld [vmem:[#allocation28_spill] sm:$0xff] }
 0x640   :  { %1592 = vmatprep.subr.bf16.mxu1 %v4716_v53  ;;  %1633 = vmatprep.subr.bf16.mxu0 %v4845_v52 }
 0x643   :  { %1593 = vmatpush1.bf16.msra.mxu1 %v4720_v57  ;;  %1634 = vmatpush1.bf16.msra.mxu0 %v4849_v13  ;;  %v5688_v57 = vld [vmem:[#allocation27_spill] sm:$0xff] }
 0x644   :  { %1594 = vmatprep.subr.bf16.mxu1 %v4724_v63  ;;  %1635 = vmatprep.subr.bf16.mxu0 %v4853_v7 }
 0x647   :  { %1595 = vmatpush1.bf16.msra.mxu1 %v4728_v54  ;;  %1636 = vmatpush1.bf16.msra.mxu0 %v4857_v9 }
 0x648   :  { %1596 = vmatprep.subr.bf16.mxu1 %v4783_v35  ;;  %1637 = vmatprep.subr.bf16.mxu0 %v4861_v34 }
 0x64b   :  { %1597 = vmatpush1.bf16.msra.mxu1 %v4787_v36  ;;  %1638 = vmatpush1.bf16.msra.mxu0 %v4865_v28 }
 0x64c   :  { %1598 = vmatprep.subr.bf16.mxu1 %v4791_v37  ;;  %1639 = vmatprep.subr.bf16.mxu0 %v4869_v22  ;;  %v5689_v37 = vld [vmem:[#allocation29_spill] sm:$0xff] }
 0x64f   :  { %1599 = vmatpush1.bf16.msra.mxu1 %v4795_v38  ;;  %1640 = vmatpush1.bf16.msra.mxu0 %v4873_v4 }
 0x650   :  { %1600 = vmatprep.subr.bf16.mxu1 %v4799_v39  ;;  %1641 = vmatprep.subr.bf16.mxu0 %v4877_v56 }
 0x653   :  { %1601 = vmatpush1.bf16.msra.mxu1 %v4803_v40  ;;  %1642 = vmatpush1.bf16.msra.mxu0 %v4073_v6 }
 0x654   :  { %1602 = vmatprep.subr.bf16.mxu1 %v4807_v41  ;;  %1643 = vmatprep.subr.bf16.mxu0 %v4074_v18 }
 0x657   :  { %1603 = vmatpush1.bf16.msra.mxu1 %v4811_v42  ;;  %1644 = vmatpush1.bf16.msra.mxu0 %v4075_v12 }
 0x6fa   :  { %v1487_v19 = vpop.f32.mrf.mxu1  ;;  %v1528_v53 = vpop.f32.mrf.mxu0 }
 0x6fb   :  { %v1535_v63 = vadd.f32 %v1487_v19, %v5688_v57  ;;  %v1537_v52 = vadd.f32 %v1528_v53, %v5691_v3  ;;  %v3666_v53 = vld [vmem:[#allocation6 + $0xe0] ss:$16 sps:$4 sm:$0xff]   ;;  %v3668_v57 = vld [vmem:[#allocation6 + $0xe4] ss:$16 sps:$4 sm:$0xff]  }
 0x6fc   :  { %v1489_v54 = vpop.f32.mrf.mxu1  ;;  %v1530_v35 = vpop.f32.mrf.mxu0  ;;  %1943 = vmatprep.subr.bf16.mxu1 %v3668_v57  ;;  %v3675_v57 = vld [vmem:[#allocation6 + $0xc8] ss:$16 sps:$4 sm:$0xff]  }
 0x6fd   :  { %v3454_v36 = vmul.f32 -1.442695, %v1535_v63  ;;  %v1536_v38 = vadd.f32 %v1489_v54, %v5689_v37  ;;  %v1538_v42 = vadd.f32 %v1530_v35, %v5690_v46  ;;  %v3669_v63 = vld [vmem:[#allocation6 + $0xe8] ss:$16 sps:$4 sm:$0xff]   ;;  %v3671_v54 = vld [vmem:[#allocation6 + $0xec] ss:$16 sps:$4 sm:$0xff]  }
 0x6fe   :  { %v1491_v39 = vpop.f32.mrf.mxu1  ;;  %v1532_v40 = vpop.f32.mrf.mxu0  ;;  %2016 = vmatprep.subr.bf16.mxu0 %v3671_v54  ;;  %v5693_v37 = vld [vmem:[#allocation31_spill] sm:$0xff]  ;;  %v3683_v54 = vld [vmem:[#allocation6 + $0xac] ss:$16 sps:$4 sm:$0xff]  }
 0x6ff   :  { %3866 = vpow2.f32 %v3454_v36  ;;  %v3455_v30 = vmul.f32 -1.442695, %v1536_v38  ;;  %v3456_v13 = vmul.f32 -1.442695, %v1538_v42 }
 0x700   :  { %v1492_v41 = vpop.f32.mrf.mxu1  ;;  %v1533_v26 = vpop.f32.mrf.mxu0 }
 0x701   :  { %3868 = vpow2.f32 %v3455_v30  ;;  %v5694_v41 = vld [vmem:[#allocation33_spill] sm:$0xff] }
 0x702   :  { %3870 = vtanh.f32 %v1537_v52 }
 0x703   :  { %3872 = vpow2.f32 %v3456_v13 }
 0x70c   :  { %v3867_v7 = vpop.eup %3866 }
 0x70d   :  { %v1542_v9 = vadd.f32 1.0, %v3867_v7  ;;  %v5695_v7 = vld [vmem:[#allocation34_spill] sm:$0xff] }
 0x70e   :  { %v3869_v34 = vpop.eup %3868 }
 0x70f   :  { %3874 = vrcp.f32 %v1542_v9  ;;  %v1548_v28 = vadd.f32 1.0, %v3869_v34  ;;  %v3871_v22 = vpop.eup %3870  ;;  %v5696_v34 = vld [vmem:[#allocation32_spill] sm:$0xff] }
 0x710   :  { %v3873_v4 = vpop.eup %3872 }
 0x711   :  { %3876 = vrcp.f32 %v1548_v28  ;;  %v1555_v2 = vadd.f32 1.0, %v3873_v4 }
 0x713   :  { %3878 = vrcp.f32 %v1555_v2 }
 0x71c   :  { %v3875_v56 = vpop.eup %3874 }
 0x71d   :  { %v1559_v24 = vmul.f32 %v3875_v56, %v3871_v22 }
 0x71e   :  { %v3877_v48 = vpop.eup %3876 }
 0x71f   :  { %v1558_v61 = vmul.f32 %v3877_v48, %v4893_v55 }
 0x720   :  { %v3879_v14 = vpop.eup %3878 }
 0x721   :  { %v4935_v49 = vadd.f32 %v1559_v24, %v1558_v61 }
 0x723   :  { %3880 = vtanh.f32 %v4935_v49 }
 0x730   :  { %v3881_v17 = vpop.eup %3880 }
 0x731   :  { %v1562_v27 = vmul.f32 %v3881_v17, %v3879_v14 }
 0x733   :  { %v1587_v43 = vpack.c.bf16 %v1562_v27, %v1562_v27  ;;  %v1565_v8 = vadd.f32 %v1562_v27, %v5692_v45  ;;  %v1163_v27 = vpop.xlane.xlu1 %1162  ;;  %v895_v45 = vsub.f32 %v4651_v58, %v894_v32 }
 0x735   :  { %1621 = vmatmul.mubr.bf16.vlgmr.msra.gmra.mxu1 %v1587_v43  ;;  %1662 = vmatmul.mubr.bf16.vlgmr.msra.gmra.mxu0 %v1587_v43  ;;  %v1566_v55 = vmul.f32 %v4602_v51, %v1565_v8 }
 0x736   :  { %1975 = vmatprep.mubr.bf16.mxu1 %v5671_v21  ;;  %2048 = vmatprep.mubr.bf16.mxu0 %v5671_v21 }
 0x737   :  { %1567 = vadd.xlane.f32.xlu0 %v1566_v55  ;;  %1944 = vmatpush1.bf16.msra.mxu1 %v3666_v53  ;;  %v1433_v50 = vpop.xlane.xlu1 %1432  ;;  %v5697_v55 = vld [vmem:[#allocation37_spill] sm:$0xff]  ;;  %v3677_v53 = vld [vmem:[#allocation6 + $0xcc] ss:$16 sps:$4 sm:$0xff]  }
 0x738   :  { %2017 = vmatpush1.bf16.msra.mxu0 %v3669_v63  ;;  %v3680_v63 = vld [vmem:[#allocation6 + $0xa4] ss:$16 sps:$4 sm:$0xff]  }
 0x739   :  { %2018 = vmatprep.subr.bf16.mxu0 %v3677_v53  ;;  %v5010_v53 = vld [vmem:[#allocation8 + $0xec] ss:$16 sps:$4 sm:$0xff]  }
 0x73b   :  { %751 = vadd.xlane.f32.xlu0 %v750_v60 }
 0x73c   :  { %2019 = vmatpush1.bf16.msra.mxu0 %v3675_v57 }
 0x73d   :  { %2020 = vmatprep.subr.bf16.mxu0 %v3683_v54 }
 0x73f   :  { %1033 = vadd.xlane.f32.xlu0 %v1032_v62  ;;  %v1434_v62 = vmul.f32 0.03125, %v1433_v50 }
 0x741   :  { %v1435_v25 = vsub.f32 %v4897_v0, %v1434_v62  ;;  %v3672_v0 = vld [vmem:[#allocation6 + $0xc0] ss:$16 sps:$4 sm:$0xff]  }
 0x743   :  { %1303 = vadd.xlane.f32.xlu0 %v1302_v5  ;;  %v4981_v5 = vmul.f32 %v4602_v51, %v895_v45 }
 0x745   :  { %v897_v58 = vmul.f32 %v4981_v5, %v4981_v5 }
 0x7c0   :  { %v1568_v6 = vpop.xlane.xlu0 %1567 }
 0x7c1   :  { %v1569_v44 = vmul.f32 0.03125, %v1568_v6 }
 0x7c3   :  { %v1570_v18 = vsub.f32 %v1565_v8, %v1569_v44  ;;  %v1164_v8 = vmul.f32 0.03125, %v1163_v27  ;;  %v4992_v44 = vmul.f32 %v4602_v51, %v1435_v25 }
 0x7c5   :  { %v4963_v12 = vmul.f32 %v4602_v51, %v1570_v18  ;;  %v1165_v60 = vsub.f32 %v4763_v33, %v1164_v8  ;;  %v1437_v18 = vmul.f32 %v4992_v44, %v4992_v44 }
 0x7c7   :  { %v1572_v19 = vmul.f32 %v4963_v12, %v4963_v12  ;;  %v4987_v6 = vmul.f32 %v4602_v51, %v1165_v60 }
 0x7c9   :  { %1573 = vadd.xlane.f32.xlu0 %v1572_v19  ;;  %v1167_v33 = vmul.f32 %v4987_v6, %v4987_v6  ;;  %v3674_v19 = vld [vmem:[#allocation6 + $0xc4] ss:$16 sps:$4 sm:$0xff]  }
 0x7ca   :  { %1945 = vmatprep.subr.bf16.mxu1 %v3674_v19  ;;  %v5008_v19 = vld [vmem:[#allocation8 + $0xe4] ss:$16 sps:$4 sm:$0xff]  }
 0x7cb   :  { %1946 = vmatpush1.bf16.msra.mxu1 %v3672_v0 }
 0x7cc   :  { %1947 = vmatprep.subr.bf16.mxu1 %v3680_v63 }
 0x7f5   :  { %v1622_v35 = vpop.f32.mrf.mxu1  ;;  %v1663_v36 = vpop.f32.mrf.mxu0 }
 0x7f6   :  { %v1670_v38 = vadd.f32 %v1622_v35, %v5693_v37  ;;  %v1672_v28 = vadd.f32 %v1663_v36, %v5696_v34  ;;  %v3678_v35 = vld [vmem:[#allocation6 + $0xa0] ss:$16 sps:$4 sm:$0xff]   ;;  %v3681_v36 = vld [vmem:[#allocation6 + $0xa8] ss:$16 sps:$4 sm:$0xff]   ;;  %v3686_v37 = vld [vmem:[#allocation6 + $0x84] ss:$16 sps:$4 sm:$0xff]  }
 0x7f7   :  { %v1624_v39 = vpop.f32.mrf.mxu1  ;;  %v1665_v40 = vpop.f32.mrf.mxu0  ;;  %1948 = vmatpush1.bf16.msra.mxu1 %v3678_v35  ;;  %2021 = vmatpush1.bf16.msra.mxu0 %v3681_v36  ;;  %v3702_v34 = vld [vmem:[#allocation6 + $0x20] ss:$16 sps:$4 sm:$0xff]  }
 0x7f8   :  { %v3457_v30 = vmul.f32 -1.442695, %v1670_v38  ;;  %v1671_v26 = vadd.f32 %v1624_v39, %v5694_v41  ;;  %v1673_v9 = vadd.f32 %v1665_v40, %v5695_v7  ;;  %v3689_v38 = vld [vmem:[#allocation6 + $0x8c] ss:$16 sps:$4 sm:$0xff]   ;;  %v3684_v39 = vld [vmem:[#allocation6 + $0x80] ss:$16 sps:$4 sm:$0xff]   ;;  %1949 = vmatprep.subr.bf16.mxu1 %v3686_v37 }
 0x7f9   :  { %v1626_v46 = vpop.f32.mrf.mxu1  ;;  %v1667_v42 = vpop.f32.mrf.mxu0  ;;  %v3687_v40 = vld [vmem:[#allocation6 + $0x88] ss:$16 sps:$4 sm:$0xff]   ;;  %2022 = vmatprep.subr.bf16.mxu0 %v3689_v38  ;;  %v3695_v41 = vld [vmem:[#allocation6 + $0x6c] ss:$16 sps:$4 sm:$0xff]   ;;  %v3704_v7 = vld [vmem:[#allocation6 + $0x24] ss:$16 sps:$4 sm:$0xff]  }
 0x7fa   :  { %3882 = vpow2.f32 %v3457_v30  ;;  %v3458_v3 = vmul.f32 -1.442695, %v1671_v26  ;;  %v3459_v22 = vmul.f32 -1.442695, %v1673_v9  ;;  %v3692_v30 = vld [vmem:[#allocation6 + $0x64] ss:$16 sps:$4 sm:$0xff]  }
 0x7fb   :  { %v1627_v52 = vpop.f32.mrf.mxu1  ;;  %v1668_v13 = vpop.f32.mrf.mxu0  ;;  %1950 = vmatpush1.bf16.msra.mxu1 %v3684_v39  ;;  %2023 = vmatpush1.bf16.msra.mxu0 %v3687_v40  ;;  %v3690_v26 = vld [vmem:[#allocation6 + $0x60] ss:$16 sps:$4 sm:$0xff]   ;;  %v3693_v46 = vld [vmem:[#allocation6 + $0x68] ss:$16 sps:$4 sm:$0xff]   ;;  %v3707_v9 = vld [vmem:[#allocation6 + $0x2c] ss:$16 sps:$4 sm:$0xff]  }
 0x7fc   :  { %3884 = vpow2.f32 %v3458_v3  ;;  %1951 = vmatprep.subr.bf16.mxu1 %v3692_v30  ;;  %2024 = vmatprep.subr.bf16.mxu0 %v3695_v41  ;;  %v3696_v42 = vld [vmem:[#allocation6 + $0x40] ss:$16 sps:$4 sm:$0xff]   ;;  %v3698_v3 = vld [vmem:[#allocation6 + $0x44] ss:$16 sps:$4 sm:$0xff]   ;;  %v3699_v52 = vld [vmem:[#allocation6 + $0x48] ss:$16 sps:$4 sm:$0xff]  }
 0x7fd   :  { %3886 = vtanh.f32 %v1672_v28  ;;  %v3701_v13 = vld [vmem:[#allocation6 + $0x4c] ss:$16 sps:$4 sm:$0xff]   ;;  %v3705_v28 = vld [vmem:[#allocation6 + $0x28] ss:$16 sps:$4 sm:$0xff]   ;;  %v5027_v41 = vld [vmem:[#allocation8 + $0xe0] ss:$16 sps:$4 sm:$0xff]  }
 0x7fe   :  { %3888 = vpow2.f32 %v3459_v22  ;;  %v3710_v22 = vld [vmem:[#allocation6 + $0x4] ss:$16 sps:$4 sm:$0xff]  }
 0x7ff   :  { %1952 = vmatpush1.bf16.msra.mxu1 %v3690_v26  ;;  %2025 = vmatpush1.bf16.msra.mxu0 %v3693_v46  ;;  %v5029_v26 = vld [vmem:[#allocation8 + $0xe8] ss:$16 sps:$4 sm:$0xff]  }
 0x800   :  { %1953 = vmatprep.subr.bf16.mxu1 %v3698_v3  ;;  %2026 = vmatprep.subr.bf16.mxu0 %v3701_v13  ;;  %v5033_v3 = vld [vmem:[#allocation8 + $0xcc] ss:$16 sps:$4 sm:$0xff]  }
 0x803   :  { %1954 = vmatpush1.bf16.msra.mxu1 %v3696_v42  ;;  %2027 = vmatpush1.bf16.msra.mxu0 %v3699_v52  ;;  %v5031_v42 = vld [vmem:[#allocation8 + $0xc4] ss:$16 sps:$4 sm:$0xff]  }
 0x804   :  { %1955 = vmatprep.subr.bf16.mxu1 %v3704_v7  ;;  %2028 = vmatprep.subr.bf16.mxu0 %v3707_v9  ;;  %v5042_v7 = vld [vmem:[#allocation8 + $0xc0] ss:$16 sps:$4 sm:$0xff]   ;;  %v5044_v9 = vld [vmem:[#allocation8 + $0xc8] ss:$16 sps:$4 sm:$0xff]  }
 0x807   :  { %v3883_v4 = vpop.eup %3882  ;;  %1956 = vmatpush1.bf16.msra.mxu1 %v3702_v34  ;;  %2029 = vmatpush1.bf16.msra.mxu0 %v3705_v28  ;;  %v5048_v34 = vld [vmem:[#allocation8 + $0xa4] ss:$16 sps:$4 sm:$0xff]   ;;  %v5050_v28 = vld [vmem:[#allocation8 + $0xac] ss:$16 sps:$4 sm:$0xff]  }
 0x808   :  { %v1677_v56 = vadd.f32 1.0, %v3883_v4  ;;  %v3713_v4 = vld [vmem:[#allocation6 + $0xc] ss:$16 sps:$4 sm:$0xff]   ;;  %1957 = vmatprep.subr.bf16.mxu1 %v3710_v22 }
 0x809   :  { %v3885_v24 = vpop.eup %3884  ;;  %2030 = vmatprep.subr.bf16.mxu0 %v3713_v4 }
 0x80a   :  { %3890 = vrcp.f32 %v1677_v56  ;;  %v1683_v48 = vadd.f32 1.0, %v3885_v24  ;;  %v3887_v2 = vpop.eup %3886  ;;  %v3708_v56 = vld [vmem:[#allocation6] ss:$16 sps:$4 sm:$0xff]   ;;  %v3711_v24 = vld [vmem:[#allocation6 + $0x8] ss:$16 sps:$4 sm:$0xff]  }
 0x80b   :  { %v3889_v61 = vpop.eup %3888  ;;  %1958 = vmatpush1.bf16.msra.mxu1 %v3708_v56  ;;  %2031 = vmatpush1.bf16.msra.mxu0 %v3711_v24  ;;  %v5057_v24 = vld [vmem:[#allocation8 + $0xa0] ss:$16 sps:$4 sm:$0xff]  }
 0x80c   :  { %3892 = vrcp.f32 %v1683_v48  ;;  %v1690_v14 = vadd.f32 1.0, %v3889_v61  ;;  %v752_v48 = vpop.xlane.xlu0 %751  ;;  %2319 = vmatprep.subr.bf16.mxu1 %v5008_v19  ;;  %2360 = vmatprep.subr.bf16.mxu0 %v5010_v53 }
 0x80e   :  { %3894 = vrcp.f32 %v1690_v14 }
 0x817   :  { %v3891_v23 = vpop.eup %3890 }
 0x818   :  { %v1694_v10 = vmul.f32 %v3891_v23, %v3887_v2  ;;  %v753_v2 = vmul.f32 0.03125, %v752_v48  ;;  %v1034_v23 = vpop.xlane.xlu0 %1033  ;;  %v5059_v48 = vld [vmem:[#allocation8 + $0xa8] ss:$16 sps:$4 sm:$0xff]  }
 0x819   :  { %v3893_v11 = vpop.eup %3892  ;;  %v1035_v14 = vmul.f32 0.03125, %v1034_v23 }
 0x81a   :  { %v1693_v17 = vmul.f32 %v3893_v11, %v4935_v49  ;;  %v754_v61 = vadd.f32 1e-05, %v753_v2  ;;  %v5063_v2 = vld [vmem:[#allocation8 + $0x84] ss:$16 sps:$4 sm:$0xff]  }
 0x81b   :  { %v3895_v16 = vpop.eup %3894 }
 0x81c   :  { %v1695_v29 = vadd.f32 %v1694_v10, %v1693_v17  ;;  %v1304_v8 = vpop.xlane.xlu0 %1303 }
 0x81e   :  { %3896 = vtanh.f32 %v1695_v29 }
 0x81f   :  { %3898 = vrsqrt.f32 %v754_v61  ;;  %v5065_v61 = vld [vmem:[#allocation8 + $0x8c] ss:$16 sps:$4 sm:$0xff]  }
 0x82b   :  { %v3897_v43 = vpop.eup %3896 }
 0x82c   :  { %v1697_v59 = vmul.f32 %v3897_v43, %v3895_v16  ;;  %v1036_v16 = vadd.f32 1e-05, %v1035_v14  ;;  %v5079_v14 = vld [vmem:[#allocation8 + $0x64] ss:$16 sps:$4 sm:$0xff]  }
 0x82e   :  { %v4975_v31 = vadd.f32 %v1697_v59, %v5697_v55  ;;  %v1305_v55 = vmul.f32 0.03125, %v1304_v8  ;;  %v5094_v8 = vld [vmem:[#allocation8 + $0x4c] ss:$16 sps:$4 sm:$0xff]  }
 0x830   :  { %v1701_v49 = vmul.f32 %v4602_v51, %v4975_v31 }
 0x832   :  { %1702 = vadd.xlane.f32.xlu1 %v1701_v49  ;;  %v1306_v49 = vadd.f32 1e-05, %v1305_v55  ;;  %v5106_v55 = vld [vmem:[#allocation8 + $0x24] ss:$16 sps:$4 sm:$0xff]  }
 0x836   :  { %898 = vadd.xlane.f32.xlu1 %v897_v58  ;;  %v3899_v58 = vpop.eup %3898 }
 0x83a   :  { %1168 = vadd.xlane.f32.xlu1 %v1167_v33  ;;  %v756_v33 = vmul.f32 %v3899_v58, %v4945_v20  ;;  %v5019_v20 = vld [vmem:[%s5619_s7] ss:$0 sm:$0xff] }
 0x83b   :  { %v5124_v58 = vld [vmem:[#allocation8] ss:$16 sps:$4 sm:$0xff]  }
 0x83e   :  { %1438 = vadd.xlane.f32.xlu1 %v1437_v18  ;;  %v5006_v18 = vld [vmem:[%s5618_s6] ss:$0 sm:$0xff] }
 0x83f   :  { %v763_v57 = vmul.f32 %v5006_v18, %v756_v33  ;;  %v5126_v33 = vld [vmem:[#allocation8 + $0x8] ss:$16 sps:$4 sm:$0xff]  }
 0x841   :  { %v770_v37 = vadd.f32 %v5019_v20, %v763_v57 }
 0x8bb   :  { %v1703_v10 = vpop.xlane.xlu1 %1702 }
 0x8bc   :  { %v1704_v11 = vmul.f32 0.03125, %v1703_v10  ;;  %v5073_v10 = vld [vmem:[#allocation8 + $0x80] ss:$16 sps:$4 sm:$0xff]  }
 0x8be   :  { %v1705_v17 = vsub.f32 %v4975_v31, %v1704_v11  ;;  %v5075_v11 = vld [vmem:[#allocation8 + $0x88] ss:$16 sps:$4 sm:$0xff]  }
 0x8bf   :  { %v899_v29 = vpop.xlane.xlu1 %898 }
 0x8c0   :  { %v900_v32 = vmul.f32 0.03125, %v899_v29  ;;  %v4998_v27 = vmul.f32 %v4602_v51, %v1705_v17  ;;  %v5081_v17 = vld [vmem:[#allocation8 + $0x6c] ss:$16 sps:$4 sm:$0xff]   ;;  %v5716_v51 = vld [vmem:[#allocation11_spill] sm:$0xff] }
 0x8c2   :  { %v901_v43 = vadd.f32 1e-05, %v900_v32  ;;  %v1707_v45 = vmul.f32 %v4998_v27, %v4998_v27 }
 0x8c3   :  { %v1169_v59 = vpop.xlane.xlu1 %1168 }
 0x8c4   :  { %3900 = vrsqrt.f32 %v901_v43  ;;  %v1170_v50 = vmul.f32 0.03125, %v1169_v59  ;;  %1708 = vadd.xlane.f32.xlu1 %v1707_v45  ;;  %v5088_v43 = vld [vmem:[#allocation8 + $0x68] ss:$16 sps:$4 sm:$0xff]   ;;  %v5092_v45 = vld [vmem:[#allocation8 + $0x44] ss:$16 sps:$4 sm:$0xff]  }
 0x8c5   :  { %3902 = vrsqrt.f32 %v1036_v16  ;;  %v5086_v16 = vld [vmem:[#allocation8 + $0x60] ss:$16 sps:$4 sm:$0xff]  }
 0x8c6   :  { %v1171_v60 = vadd.f32 1e-05, %v1170_v50  ;;  %v5100_v59 = vld [vmem:[#allocation8 + $0x40] ss:$16 sps:$4 sm:$0xff]   ;;  %v5102_v50 = vld [vmem:[#allocation8 + $0x48] ss:$16 sps:$4 sm:$0xff]  }
 0x8c7   :  { %v1439_v62 = vpop.xlane.xlu1 %1438 }
 0x8c8   :  { %3904 = vrsqrt.f32 %v1171_v60  ;;  %v1440_v31 = vmul.f32 0.03125, %v1439_v62  ;;  %v5108_v60 = vld [vmem:[#allocation8 + $0x2c] ss:$16 sps:$4 sm:$0xff]   ;;  %v5112_v62 = vld [vmem:[#allocation8 + $0x20] ss:$16 sps:$4 sm:$0xff]  }
 0x8ca   :  { %v1441_v25 = vadd.f32 1e-05, %v1440_v31  ;;  %v5114_v31 = vld [vmem:[#allocation8 + $0x28] ss:$16 sps:$4 sm:$0xff]  }
 0x8cc   :  { %3906 = vrsqrt.f32 %v1441_v25  ;;  %v5120_v25 = vld [vmem:[#allocation8 + $0xc] ss:$16 sps:$4 sm:$0xff]  }
 0x8cd   :  { %3908 = vrsqrt.f32 %v1306_v49  ;;  %v5118_v49 = vld [vmem:[#allocation8 + $0x4] ss:$16 sps:$4 sm:$0xff]  }
 0x8d1   :  { %v3901_v0 = vpop.eup %3900 }
 0x8d2   :  { %v903_v63 = vmul.f32 %v3901_v0, %v4981_v5  ;;  %v3903_v54 = vpop.eup %3902  ;;  %v1574_v0 = vpop.xlane.xlu0 %1573 }
 0x8d3   :  { %v1038_v39 = vmul.f32 %v3903_v54, %v4953_v15  ;;  %v1575_v57 = vmul.f32 0.03125, %v1574_v0 }
 0x8d4   :  { %v904_v35 = vmul.f32 %v5006_v18, %v903_v63 }
 0x8d5   :  { %v3905_v36 = vpop.eup %3904  ;;  %v1039_v52 = vmul.f32 %v5006_v18, %v1038_v39  ;;  %v1576_v63 = vadd.f32 1e-05, %v1575_v57 }
 0x8d6   :  { %v905_v38 = vadd.f32 %v5019_v20, %v904_v35  ;;  %v1173_v40 = vmul.f32 %v3905_v36, %v4987_v6 }
 0x8d7   :  { %v1040_v22 = vadd.f32 %v5019_v20, %v1039_v52  ;;  %3910 = vrsqrt.f32 %v1576_v63 }
 0x8d8   :  { %v1725_v30 = vpack.c.bf16 %v905_v38, %v770_v37  ;;  %v1174_v5 = vmul.f32 %v5006_v18, %v1173_v40 }
 0x8d9   :  { %v3907_v46 = vpop.eup %3906 }
 0x8da   :  { %1976 = vmatmul.mubr.bf16.vlgmr.msra.gmra.mxu1 %v1725_v30  ;;  %2049 = vmatmul.mubr.bf16.vlgmr.msra.gmra.mxu0 %v1725_v30  ;;  %v3909_v13 = vpop.eup %3908  ;;  %v1175_v15 = vadd.f32 %v5019_v20, %v1174_v5  ;;  %v1443_v6 = vmul.f32 %v3907_v46, %v4992_v44 }
 0x8db   :  { %1985 = vmatprep.mubr.bf16.mxu1 %v5671_v21  ;;  %2058 = vmatprep.mubr.bf16.mxu0 %v5671_v21  ;;  %v1308_v44 = vmul.f32 %v3909_v13, %v4958_v47 }
 0x8dc   :  { %2320 = vmatpush1.bf16.msra.mxu1 %v5027_v41  ;;  %2361 = vmatpush1.bf16.msra.mxu0 %v5029_v26  ;;  %v1726_v4 = vpack.c.bf16 %v1175_v15, %v1040_v22  ;;  %v1444_v56 = vmul.f32 %v5006_v18, %v1443_v6 }
 0x8dd   :  { %2321 = vmatprep.subr.bf16.mxu1 %v5031_v42  ;;  %2362 = vmatprep.subr.bf16.mxu0 %v5033_v3  ;;  %v1309_v47 = vmul.f32 %v5006_v18, %v1308_v44 }
 0x8de   :  { %v1445_v23 = vadd.f32 %v5019_v20, %v1444_v56 }
 0x8df   :  { %v1310_v29 = vadd.f32 %v5019_v20, %v1309_v47 }
 0x8e0   :  { %2322 = vmatpush1.bf16.msra.mxu1 %v5042_v7  ;;  %2363 = vmatpush1.bf16.msra.mxu0 %v5044_v9 }
 0x8e1   :  { %2323 = vmatprep.subr.bf16.mxu1 %v5048_v34  ;;  %2364 = vmatprep.subr.bf16.mxu0 %v5050_v28  ;;  %v1727_v32 = vpack.c.bf16 %v1445_v23, %v1310_v29 }
 0x8e2   :  { %1986 = vmatmul.mubr.bf16.gmra.mxu1 %v1726_v4  ;;  %2059 = vmatmul.mubr.bf16.gmra.mxu0 %v1726_v4 }
 0x8e3   :  { %1995 = vmatprep.mubr.bf16.mxu1 %v5671_v21  ;;  %2068 = vmatprep.mubr.bf16.mxu0 %v5671_v21 }
 0x8e4   :  { %2324 = vmatpush1.bf16.msra.mxu1 %v5057_v24  ;;  %2365 = vmatpush1.bf16.msra.mxu0 %v5059_v48  ;;  %v3911_v37 = vpop.eup %3910 }
 0x8e5   :  { %2325 = vmatprep.subr.bf16.mxu1 %v5063_v2  ;;  %2366 = vmatprep.subr.bf16.mxu0 %v5065_v61  ;;  %v1578_v38 = vmul.f32 %v3911_v37, %v4963_v12 }
 0x8e7   :  { %v1579_v40 = vmul.f32 %v5006_v18, %v1578_v38 }
 0x8e8   :  { %2326 = vmatpush1.bf16.msra.mxu1 %v5073_v10  ;;  %2367 = vmatpush1.bf16.msra.mxu0 %v5075_v11 }
 0x8e9   :  { %2327 = vmatprep.subr.bf16.mxu1 %v5079_v14  ;;  %2368 = vmatprep.subr.bf16.mxu0 %v5081_v17  ;;  %v1580_v46 = vadd.f32 %v5019_v20, %v1579_v40 }
 0x8ea   :  { %1996 = vmatmul.mubr.bf16.gmra.mxu1 %v1727_v32  ;;  %2069 = vmatmul.mubr.bf16.gmra.mxu0 %v1727_v32 }
 0x8eb   :  { %2005 = vmatprep.mubr.bf16.mxu1 %v5671_v21  ;;  %2078 = vmatprep.mubr.bf16.mxu0 %v5671_v21 }
 0x8ec   :  { %2328 = vmatpush1.bf16.msra.mxu1 %v5086_v16  ;;  %2369 = vmatpush1.bf16.msra.mxu0 %v5088_v43 }
 0x8ed   :  { %2329 = vmatprep.subr.bf16.mxu1 %v5092_v45  ;;  %2370 = vmatprep.subr.bf16.mxu0 %v5094_v8 }
 0x8f0   :  { %2330 = vmatpush1.bf16.msra.mxu1 %v5100_v59  ;;  %2371 = vmatpush1.bf16.msra.mxu0 %v5102_v50 }
 0x8f1   :  { %2331 = vmatprep.subr.bf16.mxu1 %v5106_v55  ;;  %2372 = vmatprep.subr.bf16.mxu0 %v5108_v60 }
 0x8f4   :  { %2332 = vmatpush1.bf16.msra.mxu1 %v5112_v62  ;;  %2373 = vmatpush1.bf16.msra.mxu0 %v5114_v31 }
 0x8f5   :  { %2333 = vmatprep.subr.bf16.mxu1 %v5118_v49  ;;  %2374 = vmatprep.subr.bf16.mxu0 %v5120_v25 }
 0x8f8   :  { %2334 = vmatpush1.bf16.msra.mxu1 %v5124_v58  ;;  %2375 = vmatpush1.bf16.msra.mxu0 %v5126_v33 }
 0x8f9   :  { %2434 = vmatprep.subr.bf16.mxu1 %v5008_v19  ;;  %2475 = vmatprep.subr.bf16.mxu0 %v5010_v53 }
 0x94d   :  { %v1709_v54 = vpop.xlane.xlu1 %1708 }
 0x94e   :  { %v1710_v35 = vmul.f32 0.03125, %v1709_v54 }
 0x950   :  { %v1711_v36 = vadd.f32 1e-05, %v1710_v35 }
 0x952   :  { %3912 = vrsqrt.f32 %v1711_v36 }
 0x95f   :  { %v3913_v39 = vpop.eup %3912 }
 0x960   :  { %v1713_v30 = vmul.f32 %v3913_v39, %v4998_v27 }
 0x962   :  { %v1714_v5 = vmul.f32 %v5006_v18, %v1713_v30  ;;  %v1761_v30 = vld [vmem:[%s5622_s10] sm:$0xf] }
 0x964   :  { %v5140_v52 = vadd.f32 %v5019_v20, %v1714_v5 }
 0x966   :  { %5698 = vst [vmem:[#allocation13_spill] sm:$0xff] %v5140_v52  ;;  %v1728_v13 = vpack.c.bf16 %v5140_v52, %v1580_v46  ;;  %v5717_v52 = vsub.s32 0, %v5716_v51 }
 0x968   :  { %2006 = vmatmul.mubr.bf16.gmra.mxu1 %v1728_v13  ;;  %2079 = vmatmul.mubr.bf16.gmra.mxu0 %v1728_v13 }
 0x969   :  { %2351 = vmatprep.mubr.bf16.mxu1 %v5671_v21  ;;  %2392 = vmatprep.mubr.bf16.mxu0 %v5671_v21 }
 0x970   :  { %2352 = vmatmul.mubr.bf16.vlgmr.msra.gmra.mxu1 %v5671_v21  ;;  %2393 = vmatmul.mubr.bf16.vlgmr.msra.gmra.mxu0 %v5671_v21 }
 0x971   :  { %2435 = vmatpush1.bf16.msra.mxu1 %v5027_v41  ;;  %2476 = vmatpush1.bf16.msra.mxu0 %v5029_v26 }
 0x972   :  { %2436 = vmatprep.subr.bf16.mxu1 %v5031_v42  ;;  %2477 = vmatprep.subr.bf16.mxu0 %v5033_v3 }
 0x973   :  { %2466 = vmatprep.mubr.bf16.mxu1 %v5671_v21  ;;  %2507 = vmatprep.mubr.bf16.mxu0 %v5671_v21 }
 0x975   :  { %2437 = vmatpush1.bf16.msra.mxu1 %v5042_v7  ;;  %2478 = vmatpush1.bf16.msra.mxu0 %v5044_v9 }
 0x976   :  { %2438 = vmatprep.subr.bf16.mxu1 %v5048_v34  ;;  %2479 = vmatprep.subr.bf16.mxu0 %v5050_v28 }
 0x979   :  { %2439 = vmatpush1.bf16.msra.mxu1 %v5057_v24  ;;  %2480 = vmatpush1.bf16.msra.mxu0 %v5059_v48 }
 0x97a   :  { %2440 = vmatprep.subr.bf16.mxu1 %v5063_v2  ;;  %2481 = vmatprep.subr.bf16.mxu0 %v5065_v61 }
 0x97d   :  { %2441 = vmatpush1.bf16.msra.mxu1 %v5073_v10  ;;  %2482 = vmatpush1.bf16.msra.mxu0 %v5075_v11 }
 0x97e   :  { %2442 = vmatprep.subr.bf16.mxu1 %v5079_v14  ;;  %2483 = vmatprep.subr.bf16.mxu0 %v5081_v17 }
 0x981   :  { %2443 = vmatpush1.bf16.msra.mxu1 %v5086_v16  ;;  %2484 = vmatpush1.bf16.msra.mxu0 %v5088_v43 }
 0x982   :  { %2444 = vmatprep.subr.bf16.mxu1 %v5092_v45  ;;  %2485 = vmatprep.subr.bf16.mxu0 %v5094_v8 }
 0x985   :  { %2445 = vmatpush1.bf16.msra.mxu1 %v5100_v59  ;;  %2486 = vmatpush1.bf16.msra.mxu0 %v5102_v50 }
 0x986   :  { %2446 = vmatprep.subr.bf16.mxu1 %v5106_v55  ;;  %2487 = vmatprep.subr.bf16.mxu0 %v5108_v60 }
 0x989   :  { %2447 = vmatpush1.bf16.msra.mxu1 %v5112_v62  ;;  %2488 = vmatpush1.bf16.msra.mxu0 %v5114_v31 }
 0x98a   :  { %2448 = vmatprep.subr.bf16.mxu1 %v5118_v49  ;;  %2489 = vmatprep.subr.bf16.mxu0 %v5120_v25 }
 0x98d   :  { %2449 = vmatpush1.bf16.msra.mxu1 %v5124_v58  ;;  %2490 = vmatpush1.bf16.msra.mxu0 %v5126_v33 }
 0x98e   :  { %2549 = vmatprep.subr.bf16.mxu1 %v5008_v19  ;;  %2590 = vmatprep.subr.bf16.mxu0 %v5010_v53 }
 0x99a   :  { %v1977_v12 = vpop.f32.mrf.mxu1  ;;  %v2050_v27 = vpop.f32.mrf.mxu0 }
 0x99c   :  { %v1979_v18 = vpop.f32.mrf.mxu1  ;;  %v2052_v20 = vpop.f32.mrf.mxu0 }
 0x99e   :  { %v5181_v15 = vpop.f32.mrf.mxu1  ;;  %v5183_v6 = vpop.f32.mrf.mxu0 }
 0x9a0   :  { %v5185_v22 = vpop.f32.mrf.mxu1  ;;  %v5187_v44 = vpop.f32.mrf.mxu0 }
 0x9a2   :  { %v5189_v4 = vpop.f32.mrf.mxu1  ;;  %v5191_v56 = vpop.f32.mrf.mxu0 }
 0x9a3   :  { %5699 = vst [vmem:[#allocation14_spill] sm:$0xff] %v5191_v56 }
 0x9a4   :  { %v5193_v47 = vpop.f32.mrf.mxu1  ;;  %v5195_v23 = vpop.f32.mrf.mxu0 }
 0x9a6   :  { %v5197_v29 = vpop.f32.mrf.mxu1  ;;  %v5199_v32 = vpop.f32.mrf.mxu0 }
 0x9a7   :  { %5700 = vst [vmem:[#allocation12_spill] sm:$0xff] %v5197_v29  ;;  %5701 = vst [vmem:[#allocation35_spill] sm:$0xff] %v5199_v32  ;;  %v5723_v29 = vsub.s32 3, %v5716_v51 }
 0x9a8   :  { %v5201_v0 = vpop.f32.mrf.mxu1  ;;  %v5203_v57 = vpop.f32.mrf.mxu0 }
 0x9a9   :  { %5702 = vst [vmem:[#allocation15_spill] sm:$0xff] %v5201_v0  ;;  %5703 = vst [vmem:[#allocation17_spill] sm:$0xff] %v5203_v57 }
 0x9aa   :  { %v5205_v63 = vpop.f32.mrf.mxu1  ;;  %v5207_v54 = vpop.f32.mrf.mxu0 }
 0x9ab   :  { %5704 = vst [vmem:[#allocation18_spill] sm:$0xff] %v5205_v63  ;;  %5705 = vst [vmem:[#allocation16_spill] sm:$0xff] %v5207_v54 }
 0x9ac   :  { %v5209_v35 = vpop.f32.mrf.mxu1  ;;  %v5211_v36 = vpop.f32.mrf.mxu0 }
 0x9ad   :  { %5706 = vst [vmem:[#allocation19_spill] sm:$0xff] %v5209_v35  ;;  %5707 = vst [vmem:[#allocation21_spill] sm:$0xff] %v5211_v36 }
 0x9ae   :  { %v5213_v37 = vpop.f32.mrf.mxu1  ;;  %v5215_v38 = vpop.f32.mrf.mxu0 }
 0x9af   :  { %5708 = vst [vmem:[#allocation22_spill] sm:$0xff] %v5213_v37  ;;  %5709 = vst [vmem:[#allocation20_spill] sm:$0xff] %v5215_v38  ;;  %v5234_v37 = vrot.slane %v1761_v30, %v5717_v52 }
 0x9b0   :  { %v5217_v39 = vpop.f32.mrf.mxu1  ;;  %v5219_v40 = vpop.f32.mrf.mxu0 }
 0x9b1   :  { %5710 = vst [vmem:[#allocation23_spill] sm:$0xff] %v5217_v39  ;;  %5711 = vst [vmem:[#allocation25_spill] sm:$0xff] %v5219_v40  ;;  %v5720_v40 = vsub.s32 1, %v5716_v51 }
 0x9b3   :  { %v5242_v54 = vrot.slane %v1761_v30, %v5720_v40 }
 0x9b5   :  { %v1980_v35 = vadd.f32 %v1979_v18, %v5242_v54  ;;  %v5724_v18 = vsub.s32 2, %v5716_v51 }
 0xa28   :  { %v5224_v5 = vpop.f32.mrf.mxu1  ;;  %v5226_v46 = vpop.f32.mrf.mxu0 }
 0xa29   :  { %5712 = vst [vmem:[#allocation26_spill] sm:$0xff] %v5224_v5  ;;  %5713 = vst [vmem:[#allocation24_spill] sm:$0xff] %v5226_v46  ;;  %v1978_v46 = vadd.f32 %v1977_v12, %v5234_v37 }
 0xa2a   :  { %v5228_v13 = vpop.f32.mrf.mxu1  ;;  %v5230_v1 = vpop.f32.mrf.mxu0 }
 0xa2b   :  { %5714 = vst [vmem:[#allocation27_spill] sm:$0xff] %v5228_v13  ;;  %5715 = vst [vmem:[#allocation29_spill] sm:$0xff] %v5230_v1 }
 0xa2c   :  { %v5236_v38 = vpop.f32.mrf.mxu1  ;;  %v5238_v39 = vpop.f32.mrf.mxu0 }
 0xa2d   :  { %5718 = vst [vmem:[#allocation30_spill] sm:$0xff] %v5236_v38  ;;  %5719 = vst [vmem:[#allocation28_spill] sm:$0xff] %v5238_v39 }
 0xa2e   :  { %v5244_v36 = vpop.f32.mrf.mxu1  ;;  %v5246_v5 = vpop.f32.mrf.mxu0 }
 0xa2f   :  { %5721 = vst [vmem:[#allocation36_spill] sm:$0xff] %v5244_v36  ;;  %5722 = vst [vmem:[#allocation31_spill] sm:$0xff] %v5246_v5  ;;  %v5252_v36 = vrot.slane %v1761_v30, %v5723_v29 }
 0xa30   :  { %v2353_v13 = vpop.f32.mrf.mxu1  ;;  %v2394_v1 = vpop.f32.mrf.mxu0 }
 0xa31   :  { %v2401_v52 = vadd.f32 %v2353_v13, %v1978_v46  ;;  %v2053_v12 = vadd.f32 %v2052_v20, %v5252_v36  ;;  %v5257_v46 = vrot.slane %v1761_v30, %v5724_v18 }
 0xa32   :  { %v2355_v63 = vpop.f32.mrf.mxu1  ;;  %v2396_v32 = vpop.f32.mrf.mxu0 }
 0xa33   :  { %v3524_v38 = vmul.f32 -1.442695, %v2401_v52  ;;  %v2402_v57 = vadd.f32 %v2355_v63, %v1980_v35  ;;  %v2404_v13 = vadd.f32 %v2396_v32, %v2053_v12  ;;  %v2051_v63 = vadd.f32 %v2050_v27, %v5257_v46 }
 0xa34   :  { %v2357_v39 = vpop.f32.mrf.mxu1  ;;  %v2398_v0 = vpop.f32.mrf.mxu0 }
 0xa35   :  { %3914 = vpow2.f32 %v3524_v38  ;;  %v3525_v40 = vmul.f32 -1.442695, %v2402_v57  ;;  %v3526_v35 = vmul.f32 -1.442695, %v2404_v13  ;;  %v2403_v38 = vadd.f32 %v2394_v1, %v2051_v63 }
 0xa36   :  { %v2358_v5 = vpop.f32.mrf.mxu1  ;;  %v2399_v56 = vpop.f32.mrf.mxu0  ;;  %v1982_v13 = vadd.f32 %v5181_v15, %v5234_v37  ;;  %v2057_v15 = vadd.f32 %v5187_v44, %v5252_v36 }
 0xa37   :  { %3916 = vpow2.f32 %v3525_v40 }
 0xa38   :  { %3918 = vpow2.f32 %v3526_v35 }
 0xa42   :  { %v3915_v0 = vpop.eup %3914 }
 0xa43   :  { %v2408_v57 = vadd.f32 1.0, %v3915_v0  ;;  %v1984_v0 = vadd.f32 %v5185_v22, %v5242_v54 }
 0xa44   :  { %v3917_v39 = vpop.eup %3916 }
 0xa45   :  { %3920 = vrcp.f32 %v2408_v57  ;;  %v2414_v29 = vadd.f32 1.0, %v3917_v39  ;;  %v3919_v56 = vpop.eup %3918 }
 0xa46   :  { %3922 = vtanh.f32 %v2403_v38  ;;  %v2421_v51 = vadd.f32 1.0, %v3919_v56 }
 0xa47   :  { %3924 = vrcp.f32 %v2414_v29 }
 0xa48   :  { %3926 = vrcp.f32 %v2421_v51 }
 0xa52   :  { %v3921_v5 = vpop.eup %3920 }
 0xa53   :  { %v3923_v20 = vpop.eup %3922 }
 0xa54   :  { %v3925_v52 = vpop.eup %3924  ;;  %v2425_v40 = vmul.f32 %v3923_v20, %v3921_v5 }
 0xa55   :  { %v2424_v30 = vmul.f32 0.0, %v3925_v52  ;;  %v3927_v1 = vpop.eup %3926 }
 0xa57   :  { %v5260_v32 = vadd.f32 %v2425_v40, %v2424_v30 }
 0xa59   :  { %3928 = vtanh.f32 %v5260_v32 }
 0xa66   :  { %v3929_v27 = vpop.eup %3928 }
 0xa67   :  { %v2428_v12 = vmul.f32 %v3929_v27, %v3927_v1  ;;  %v2055_v1 = vadd.f32 %v5183_v6, %v5257_v46 }
 0xa69   :  { %v2433_v18 = vpack.c.bf16 %v2428_v12, %v2428_v12 }
 0xa6b   :  { %2467 = vmatmul.mubr.bf16.vlgmr.msra.gmra.mxu1 %v2433_v18  ;;  %2508 = vmatmul.mubr.bf16.vlgmr.msra.gmra.mxu0 %v2433_v18 }
 0xa6c   :  { %2550 = vmatpush1.bf16.msra.mxu1 %v5027_v41  ;;  %2591 = vmatpush1.bf16.msra.mxu0 %v5029_v26 }
 0xa6d   :  { %2551 = vmatprep.subr.bf16.mxu1 %v5031_v42  ;;  %2592 = vmatprep.subr.bf16.mxu0 %v5033_v3 }
 0xa6e   :  { %2581 = vmatprep.mubr.bf16.mxu1 %v5671_v21  ;;  %2622 = vmatprep.mubr.bf16.mxu0 %v5671_v21 }
 0xa70   :  { %2552 = vmatpush1.bf16.msra.mxu1 %v5042_v7  ;;  %2593 = vmatpush1.bf16.msra.mxu0 %v5044_v9 }
 0xa71   :  { %2553 = vmatprep.subr.bf16.mxu1 %v5048_v34  ;;  %2594 = vmatprep.subr.bf16.mxu0 %v5050_v28 }
 0xa74   :  { %2554 = vmatpush1.bf16.msra.mxu1 %v5057_v24  ;;  %2595 = vmatpush1.bf16.msra.mxu0 %v5059_v48 }
 0xa75   :  { %2555 = vmatprep.subr.bf16.mxu1 %v5063_v2  ;;  %2596 = vmatprep.subr.bf16.mxu0 %v5065_v61 }
 0xa78   :  { %2556 = vmatpush1.bf16.msra.mxu1 %v5073_v10  ;;  %2597 = vmatpush1.bf16.msra.mxu0 %v5075_v11 }
 0xa79   :  { %2557 = vmatprep.subr.bf16.mxu1 %v5079_v14  ;;  %2598 = vmatprep.subr.bf16.mxu0 %v5081_v17 }
 0xa7c   :  { %2558 = vmatpush1.bf16.msra.mxu1 %v5086_v16  ;;  %2599 = vmatpush1.bf16.msra.mxu0 %v5088_v43 }
 0xa7d   :  { %2559 = vmatprep.subr.bf16.mxu1 %v5092_v45  ;;  %2600 = vmatprep.subr.bf16.mxu0 %v5094_v8 }
 0xa80   :  { %2560 = vmatpush1.bf16.msra.mxu1 %v5100_v59  ;;  %2601 = vmatpush1.bf16.msra.mxu0 %v5102_v50 }
 0xa81   :  { %2561 = vmatprep.subr.bf16.mxu1 %v5106_v55  ;;  %2602 = vmatprep.subr.bf16.mxu0 %v5108_v60 }
 0xa84   :  { %2562 = vmatpush1.bf16.msra.mxu1 %v5112_v62  ;;  %2603 = vmatpush1.bf16.msra.mxu0 %v5114_v31 }
 0xa85   :  { %2563 = vmatprep.subr.bf16.mxu1 %v5118_v49  ;;  %2604 = vmatprep.subr.bf16.mxu0 %v5120_v25 }
 0xa88   :  { %2564 = vmatpush1.bf16.msra.mxu1 %v5124_v58  ;;  %2605 = vmatpush1.bf16.msra.mxu0 %v5126_v33 }
 0xa89   :  { %2664 = vmatprep.subr.bf16.mxu1 %v5008_v19  ;;  %2705 = vmatprep.subr.bf16.mxu0 %v5010_v53 }
 0xb2b   :  { %v2468_v63 = vpop.f32.mrf.mxu1  ;;  %v2509_v35 = vpop.f32.mrf.mxu0 }
 0xb2c   :  { %v2516_v38 = vadd.f32 %v2468_v63, %v1982_v13  ;;  %v2518_v22 = vadd.f32 %v2509_v35, %v2055_v1 }
 0xb2d   :  { %v2470_v57 = vpop.f32.mrf.mxu1  ;;  %v2511_v39 = vpop.f32.mrf.mxu0 }
 0xb2e   :  { %v3527_v29 = vmul.f32 -1.442695, %v2516_v38  ;;  %v2517_v56 = vadd.f32 %v2470_v57, %v1984_v0  ;;  %v2519_v40 = vadd.f32 %v2511_v39, %v2057_v15  ;;  %v1990_v15 = vadd.f32 %v5193_v47, %v5242_v54 }
 0xb2f   :  { %v2472_v5 = vpop.f32.mrf.mxu1  ;;  %v2513_v20 = vpop.f32.mrf.mxu0 }
 0xb30   :  { %3930 = vpow2.f32 %v3527_v29  ;;  %v3528_v52 = vmul.f32 -1.442695, %v2517_v56  ;;  %v3529_v27 = vmul.f32 -1.442695, %v2519_v40 }
 0xb31   :  { %v2473_v51 = vpop.f32.mrf.mxu1  ;;  %v2514_v30 = vpop.f32.mrf.mxu0 }
 0xb32   :  { %3932 = vpow2.f32 %v3528_v52 }
 0xb33   :  { %3934 = vtanh.f32 %v2518_v22 }
 0xb34   :  { %3936 = vpow2.f32 %v3529_v27 }
 0xb3d   :  { %v3931_v12 = vpop.eup %3930 }
 0xb3e   :  { %v2523_v18 = vadd.f32 1.0, %v3931_v12 }
 0xb3f   :  { %v3933_v13 = vpop.eup %3932 }
 0xb40   :  { %3938 = vrcp.f32 %v2523_v18  ;;  %v2529_v63 = vadd.f32 1.0, %v3933_v13  ;;  %v3935_v0 = vpop.eup %3934 }
 0xb41   :  { %v3937_v38 = vpop.eup %3936 }
 0xb42   :  { %3940 = vrcp.f32 %v2529_v63  ;;  %v2536_v44 = vadd.f32 1.0, %v3937_v38 }
 0xb44   :  { %3942 = vrcp.f32 %v2536_v44 }
 0xb4d   :  { %v3939_v57 = vpop.eup %3938 }
 0xb4e   :  { %v2540_v29 = vmul.f32 %v3939_v57, %v3935_v0 }
 0xb4f   :  { %v3941_v56 = vpop.eup %3940 }
 0xb50   :  { %v2539_v39 = vmul.f32 %v3941_v56, %v5260_v32  ;;  %v1988_v32 = vadd.f32 %v5189_v4, %v5234_v37  ;;  %v2063_v4 = vadd.f32 %v5195_v23, %v5252_v36 }
 0xb51   :  { %v3943_v6 = vpop.eup %3942 }
 0xb52   :  { %v5306_v5 = vadd.f32 %v2540_v29, %v2539_v39  ;;  %v5725_v29 = vld [vmem:[#allocation14_spill] sm:$0xff] }
 0xb53   :  { %v2061_v56 = vadd.f32 %v5725_v29, %v5257_v46 }
 0xb54   :  { %3944 = vtanh.f32 %v5306_v5 }
 0xb61   :  { %v3945_v35 = vpop.eup %3944 }
 0xb62   :  { %v2543_v20 = vmul.f32 %v3945_v35, %v3943_v6 }
 0xb64   :  { %v2548_v52 = vpack.c.bf16 %v2543_v20, %v2543_v20 }
 0xb66   :  { %2582 = vmatmul.mubr.bf16.vlgmr.msra.gmra.mxu1 %v2548_v52  ;;  %2623 = vmatmul.mubr.bf16.vlgmr.msra.gmra.mxu0 %v2548_v52 }
 0xb67   :  { %2665 = vmatpush1.bf16.msra.mxu1 %v5027_v41  ;;  %2706 = vmatpush1.bf16.msra.mxu0 %v5029_v26 }
 0xb68   :  { %2666 = vmatprep.subr.bf16.mxu1 %v5031_v42  ;;  %2707 = vmatprep.subr.bf16.mxu0 %v5033_v3 }
 0xb69   :  { %2696 = vmatprep.mubr.bf16.mxu1 %v5671_v21  ;;  %2737 = vmatprep.mubr.bf16.mxu0 %v5671_v21 }
 0xb6b   :  { %2667 = vmatpush1.bf16.msra.mxu1 %v5042_v7  ;;  %2708 = vmatpush1.bf16.msra.mxu0 %v5044_v9 }
 0xb6c   :  { %2668 = vmatprep.subr.bf16.mxu1 %v5048_v34  ;;  %2709 = vmatprep.subr.bf16.mxu0 %v5050_v28 }
 0xb6f   :  { %2669 = vmatpush1.bf16.msra.mxu1 %v5057_v24  ;;  %2710 = vmatpush1.bf16.msra.mxu0 %v5059_v48 }
 0xb70   :  { %2670 = vmatprep.subr.bf16.mxu1 %v5063_v2  ;;  %2711 = vmatprep.subr.bf16.mxu0 %v5065_v61 }
 0xb73   :  { %2671 = vmatpush1.bf16.msra.mxu1 %v5073_v10  ;;  %2712 = vmatpush1.bf16.msra.mxu0 %v5075_v11 }
 0xb74   :  { %2672 = vmatprep.subr.bf16.mxu1 %v5079_v14  ;;  %2713 = vmatprep.subr.bf16.mxu0 %v5081_v17 }
 0xb77   :  { %2673 = vmatpush1.bf16.msra.mxu1 %v5086_v16  ;;  %2714 = vmatpush1.bf16.msra.mxu0 %v5088_v43 }
 0xb78   :  { %2674 = vmatprep.subr.bf16.mxu1 %v5092_v45  ;;  %2715 = vmatprep.subr.bf16.mxu0 %v5094_v8 }
 0xb7b   :  { %2675 = vmatpush1.bf16.msra.mxu1 %v5100_v59  ;;  %2716 = vmatpush1.bf16.msra.mxu0 %v5102_v50 }
 0xb7c   :  { %2676 = vmatprep.subr.bf16.mxu1 %v5106_v55  ;;  %2717 = vmatprep.subr.bf16.mxu0 %v5108_v60 }
 0xb7f   :  { %2677 = vmatpush1.bf16.msra.mxu1 %v5112_v62  ;;  %2718 = vmatpush1.bf16.msra.mxu0 %v5114_v31 }
 0xb80   :  { %2678 = vmatprep.subr.bf16.mxu1 %v5118_v49  ;;  %2719 = vmatprep.subr.bf16.mxu0 %v5120_v25 }
 0xb83   :  { %2679 = vmatpush1.bf16.msra.mxu1 %v5124_v58  ;;  %2720 = vmatpush1.bf16.msra.mxu0 %v5126_v33 }
 0xb84   :  { %2779 = vmatprep.subr.bf16.mxu1 %v5008_v19  ;;  %2820 = vmatprep.subr.bf16.mxu0 %v5010_v53 }
 0xc26   :  { %v2583_v51 = vpop.f32.mrf.mxu1  ;;  %v2624_v30 = vpop.f32.mrf.mxu0 }
 0xc27   :  { %v2631_v40 = vadd.f32 %v2583_v51, %v1988_v32  ;;  %v2633_v47 = vadd.f32 %v2624_v30, %v2061_v56 }
 0xc28   :  { %v2585_v1 = vpop.f32.mrf.mxu1  ;;  %v2626_v22 = vpop.f32.mrf.mxu0 }
 0xc29   :  { %v3530_v27 = vmul.f32 -1.442695, %v2631_v40  ;;  %v2632_v12 = vadd.f32 %v2585_v1, %v1990_v15  ;;  %v2634_v57 = vadd.f32 %v2626_v22, %v2063_v4 }
 0xc2a   :  { %v2587_v18 = vpop.f32.mrf.mxu1  ;;  %v2628_v13 = vpop.f32.mrf.mxu0 }
 0xc2b   :  { %3946 = vpow2.f32 %v3530_v27  ;;  %v3531_v63 = vmul.f32 -1.442695, %v2632_v12  ;;  %v3532_v44 = vmul.f32 -1.442695, %v2634_v57 }
 0xc2c   :  { %v2588_v0 = vpop.f32.mrf.mxu1  ;;  %v2629_v38 = vpop.f32.mrf.mxu0 }
 0xc2d   :  { %3948 = vpow2.f32 %v3531_v63  ;;  %v5727_v38 = vld [vmem:[#allocation15_spill] sm:$0xff] }
 0xc2e   :  { %3950 = vtanh.f32 %v2633_v47  ;;  %v1994_v4 = vadd.f32 %v5727_v38, %v5242_v54 }
 0xc2f   :  { %3952 = vpow2.f32 %v3532_v44 }
 0xc38   :  { %v3947_v39 = vpop.eup %3946 }
 0xc39   :  { %v2638_v6 = vadd.f32 1.0, %v3947_v39 }
 0xc3a   :  { %v3949_v35 = vpop.eup %3948 }
 0xc3b   :  { %3954 = vrcp.f32 %v2638_v6  ;;  %v2644_v20 = vadd.f32 1.0, %v3949_v35  ;;  %v3951_v52 = vpop.eup %3950 }
 0xc3c   :  { %v3953_v32 = vpop.eup %3952 }
 0xc3d   :  { %3956 = vrcp.f32 %v2644_v20  ;;  %v2651_v23 = vadd.f32 1.0, %v3953_v32 }
 0xc3f   :  { %3958 = vrcp.f32 %v2651_v23 }
 0xc48   :  { %v3955_v51 = vpop.eup %3954 }
 0xc49   :  { %v2655_v15 = vmul.f32 %v3955_v51, %v3951_v52  ;;  %v5729_v51 = vld [vmem:[#allocation35_spill] sm:$0xff] }
 0xc4a   :  { %v3957_v40 = vpop.eup %3956 }
 0xc4b   :  { %v2654_v1 = vmul.f32 %v3957_v40, %v5306_v5  ;;  %v5726_v5 = vld [vmem:[#allocation12_spill] sm:$0xff] }
 0xc4c   :  { %v3959_v30 = vpop.eup %3958  ;;  %v1992_v13 = vadd.f32 %v5726_v5, %v5234_v37 }
 0xc4d   :  { %v5352_v22 = vadd.f32 %v2655_v15, %v2654_v1  ;;  %v2065_v15 = vadd.f32 %v5729_v51, %v5257_v46 }
 0xc4f   :  { %3960 = vtanh.f32 %v5352_v22 }
 0xc5c   :  { %v3961_v27 = vpop.eup %3960 }
 0xc5d   :  { %v2658_v12 = vmul.f32 %v3961_v27, %v3959_v30 }
 0xc5f   :  { %v2663_v18 = vpack.c.bf16 %v2658_v12, %v2658_v12 }
 0xc61   :  { %2697 = vmatmul.mubr.bf16.vlgmr.msra.gmra.mxu1 %v2663_v18  ;;  %2738 = vmatmul.mubr.bf16.vlgmr.msra.gmra.mxu0 %v2663_v18 }
 0xc62   :  { %2780 = vmatpush1.bf16.msra.mxu1 %v5027_v41  ;;  %2821 = vmatpush1.bf16.msra.mxu0 %v5029_v26 }
 0xc63   :  { %2781 = vmatprep.subr.bf16.mxu1 %v5031_v42  ;;  %2822 = vmatprep.subr.bf16.mxu0 %v5033_v3 }
 0xc64   :  { %2811 = vmatprep.mubr.bf16.mxu1 %v5671_v21  ;;  %2852 = vmatprep.mubr.bf16.mxu0 %v5671_v21 }
 0xc66   :  { %2782 = vmatpush1.bf16.msra.mxu1 %v5042_v7  ;;  %2823 = vmatpush1.bf16.msra.mxu0 %v5044_v9 }
 0xc67   :  { %2783 = vmatprep.subr.bf16.mxu1 %v5048_v34  ;;  %2824 = vmatprep.subr.bf16.mxu0 %v5050_v28 }
 0xc6a   :  { %2784 = vmatpush1.bf16.msra.mxu1 %v5057_v24  ;;  %2825 = vmatpush1.bf16.msra.mxu0 %v5059_v48 }
 0xc6b   :  { %2785 = vmatprep.subr.bf16.mxu1 %v5063_v2  ;;  %2826 = vmatprep.subr.bf16.mxu0 %v5065_v61 }
 0xc6e   :  { %2786 = vmatpush1.bf16.msra.mxu1 %v5073_v10  ;;  %2827 = vmatpush1.bf16.msra.mxu0 %v5075_v11 }
 0xc6f   :  { %2787 = vmatprep.subr.bf16.mxu1 %v5079_v14  ;;  %2828 = vmatprep.subr.bf16.mxu0 %v5081_v17 }
 0xc72   :  { %2788 = vmatpush1.bf16.msra.mxu1 %v5086_v16  ;;  %2829 = vmatpush1.bf16.msra.mxu0 %v5088_v43 }
 0xc73   :  { %2789 = vmatprep.subr.bf16.mxu1 %v5092_v45  ;;  %2830 = vmatprep.subr.bf16.mxu0 %v5094_v8 }
 0xc76   :  { %2790 = vmatpush1.bf16.msra.mxu1 %v5100_v59  ;;  %2831 = vmatpush1.bf16.msra.mxu0 %v5102_v50 }
 0xc77   :  { %2791 = vmatprep.subr.bf16.mxu1 %v5106_v55  ;;  %2832 = vmatprep.subr.bf16.mxu0 %v5108_v60 }
 0xc7a   :  { %2792 = vmatpush1.bf16.msra.mxu1 %v5112_v62  ;;  %2833 = vmatpush1.bf16.msra.mxu0 %v5114_v31 }
 0xc7b   :  { %2793 = vmatprep.subr.bf16.mxu1 %v5118_v49  ;;  %2834 = vmatprep.subr.bf16.mxu0 %v5120_v25 }
 0xc7e   :  { %2794 = vmatpush1.bf16.msra.mxu1 %v5124_v58  ;;  %2835 = vmatpush1.bf16.msra.mxu0 %v5126_v33 }
 0xc7f   :  { %2894 = vmatprep.subr.bf16.mxu1 %v5008_v19  ;;  %2935 = vmatprep.subr.bf16.mxu0 %v5010_v53  ;;  %v5728_v53 = vld [vmem:[#allocation17_spill] sm:$0xff] }
 0xc80   :  { %v2067_v52 = vadd.f32 %v5728_v53, %v5252_v36 }
 0xd21   :  { %v2698_v63 = vpop.f32.mrf.mxu1  ;;  %v2739_v0 = vpop.f32.mrf.mxu0 }
 0xd22   :  { %v2746_v57 = vadd.f32 %v2698_v63, %v1992_v13  ;;  %v2748_v40 = vadd.f32 %v2739_v0, %v2065_v15 }
 0xd23   :  { %v2700_v29 = vpop.f32.mrf.mxu1  ;;  %v2741_v56 = vpop.f32.mrf.mxu0 }
 0xd24   :  { %v3533_v47 = vmul.f32 -1.442695, %v2746_v57  ;;  %v2747_v44 = vadd.f32 %v2700_v29, %v1994_v4  ;;  %v2749_v32 = vadd.f32 %v2741_v56, %v2067_v52 }
 0xd25   :  { %v2702_v39 = vpop.f32.mrf.mxu1  ;;  %v2743_v6 = vpop.f32.mrf.mxu0 }
 0xd26   :  { %3962 = vpow2.f32 %v3533_v47  ;;  %v3534_v35 = vmul.f32 -1.442695, %v2747_v44  ;;  %v3535_v23 = vmul.f32 -1.442695, %v2749_v32  ;;  %v5732_v6 = vld [vmem:[#allocation21_spill] sm:$0xff] }
 0xd27   :  { %v2703_v19 = vpop.f32.mrf.mxu1  ;;  %v2744_v20 = vpop.f32.mrf.mxu0 }
 0xd28   :  { %3964 = vpow2.f32 %v3534_v35  ;;  %v2073_v35 = vadd.f32 %v5732_v6, %v5252_v36  ;;  %v5733_v20 = vld [vmem:[#allocation16_spill] sm:$0xff] }
 0xd29   :  { %3966 = vtanh.f32 %v2748_v40  ;;  %v2071_v53 = vadd.f32 %v5733_v20, %v5257_v46 }
 0xd2a   :  { %3968 = vpow2.f32 %v3535_v23 }
 0xd33   :  { %v3963_v1 = vpop.eup %3962 }
 0xd34   :  { %v2753_v30 = vadd.f32 1.0, %v3963_v1 }
 0xd35   :  { %v3965_v27 = vpop.eup %3964 }
 0xd36   :  { %3970 = vrcp.f32 %v2753_v30  ;;  %v2759_v12 = vadd.f32 1.0, %v3965_v27  ;;  %v3967_v18 = vpop.eup %3966 }
 0xd37   :  { %v3969_v5 = vpop.eup %3968 }
 0xd38   :  { %3972 = vrcp.f32 %v2759_v12  ;;  %v2766_v4 = vadd.f32 1.0, %v3969_v5 }
 0xd3a   :  { %3974 = vrcp.f32 %v2766_v4 }
 0xd43   :  { %v3971_v13 = vpop.eup %3970 }
 0xd44   :  { %v2770_v63 = vmul.f32 %v3971_v13, %v3967_v18 }
 0xd45   :  { %v3973_v38 = vpop.eup %3972 }
 0xd46   :  { %v2769_v57 = vmul.f32 %v3973_v38, %v5352_v22 }
 0xd47   :  { %v3975_v0 = vpop.eup %3974 }
 0xd48   :  { %v5398_v29 = vadd.f32 %v2770_v63, %v2769_v57 }
 0xd4a   :  { %3976 = vtanh.f32 %v5398_v29 }
 0xd57   :  { %v3977_v56 = vpop.eup %3976 }
 0xd58   :  { %v2773_v47 = vmul.f32 %v3977_v56, %v3975_v0  ;;  %v5451_v56 = vld [vmem:[#allocation8 + $0xe0] ss:$16 sps:$4 sm:$0xff]  }
 0xd5a   :  { %v2778_v44 = vpack.c.bf16 %v2773_v47, %v2773_v47  ;;  %v5454_v47 = vld [vmem:[#allocation8 + $0xe8] ss:$16 sps:$4 sm:$0xff]  }
 0xd5c   :  { %2812 = vmatmul.mubr.bf16.vlgmr.msra.gmra.mxu1 %v2778_v44  ;;  %2853 = vmatmul.mubr.bf16.vlgmr.msra.gmra.mxu0 %v2778_v44  ;;  %v5460_v44 = vld [vmem:[#allocation8 + $0xcc] ss:$16 sps:$4 sm:$0xff]  }
 0xd5d   :  { %2895 = vmatpush1.bf16.msra.mxu1 %v5027_v41  ;;  %2936 = vmatpush1.bf16.msra.mxu0 %v5029_v26  ;;  %v5433_v41 = vld [vmem:[#allocation8 + $0xe4] ss:$16 sps:$4 sm:$0xff]   ;;  %v5436_v26 = vld [vmem:[#allocation8 + $0xec] ss:$16 sps:$4 sm:$0xff]  }
 0xd5e   :  { %2896 = vmatprep.subr.bf16.mxu1 %v5031_v42  ;;  %2937 = vmatprep.subr.bf16.mxu0 %v5033_v3  ;;  %v5730_v42 = vld [vmem:[#allocation18_spill] sm:$0xff] }
 0xd5f   :  { %2926 = vmatprep.mubr.bf16.mxu1 %v5671_v21  ;;  %2967 = vmatprep.mubr.bf16.mxu0 %v5671_v21  ;;  %v1998_v3 = vadd.f32 %v5730_v42, %v5234_v37  ;;  %v5465_v42 = vld [vmem:[#allocation8 + $0xc0] ss:$16 sps:$4 sm:$0xff]  }
 0xd61   :  { %2897 = vmatpush1.bf16.msra.mxu1 %v5042_v7  ;;  %2938 = vmatpush1.bf16.msra.mxu0 %v5044_v9 }
 0xd62   :  { %2898 = vmatprep.subr.bf16.mxu1 %v5048_v34  ;;  %2939 = vmatprep.subr.bf16.mxu0 %v5050_v28  ;;  %v5731_v34 = vld [vmem:[#allocation19_spill] sm:$0xff] }
 0xd63   :  { %v2000_v28 = vadd.f32 %v5731_v34, %v5242_v54  ;;  %v5477_v34 = vld [vmem:[#allocation8 + $0xa0] ss:$16 sps:$4 sm:$0xff]  }
 0xd65   :  { %2899 = vmatpush1.bf16.msra.mxu1 %v5057_v24  ;;  %2940 = vmatpush1.bf16.msra.mxu0 %v5059_v48 }
 0xd66   :  { %2900 = vmatprep.subr.bf16.mxu1 %v5063_v2  ;;  %2941 = vmatprep.subr.bf16.mxu0 %v5065_v61 }
 0xd69   :  { %2901 = vmatpush1.bf16.msra.mxu1 %v5073_v10  ;;  %2942 = vmatpush1.bf16.msra.mxu0 %v5075_v11 }
 0xd6a   :  { %2902 = vmatprep.subr.bf16.mxu1 %v5079_v14  ;;  %2943 = vmatprep.subr.bf16.mxu0 %v5081_v17 }
 0xd6d   :  { %2903 = vmatpush1.bf16.msra.mxu1 %v5086_v16  ;;  %2944 = vmatpush1.bf16.msra.mxu0 %v5088_v43 }
 0xd6e   :  { %2904 = vmatprep.subr.bf16.mxu1 %v5092_v45  ;;  %2945 = vmatprep.subr.bf16.mxu0 %v5094_v8 }
 0xd71   :  { %2905 = vmatpush1.bf16.msra.mxu1 %v5100_v59  ;;  %2946 = vmatpush1.bf16.msra.mxu0 %v5102_v50 }
 0xd72   :  { %2906 = vmatprep.subr.bf16.mxu1 %v5106_v55  ;;  %2947 = vmatprep.subr.bf16.mxu0 %v5108_v60 }
 0xd75   :  { %2907 = vmatpush1.bf16.msra.mxu1 %v5112_v62  ;;  %2948 = vmatpush1.bf16.msra.mxu0 %v5114_v31 }
 0xd76   :  { %2908 = vmatprep.subr.bf16.mxu1 %v5118_v49  ;;  %2949 = vmatprep.subr.bf16.mxu0 %v5120_v25 }
 0xd79   :  { %2909 = vmatpush1.bf16.msra.mxu1 %v5124_v58  ;;  %2950 = vmatpush1.bf16.msra.mxu0 %v5126_v33 }
 0xd7a   :  { %3009 = vmatprep.subr.bf16.mxu1 %v5433_v41  ;;  %3050 = vmatprep.subr.bf16.mxu0 %v5436_v26 }
 0xe1c   :  { %v2813_v7 = vpop.f32.mrf.mxu1  ;;  %v2854_v9 = vpop.f32.mrf.mxu0 }
 0xe1d   :  { %v2861_v24 = vadd.f32 %v2813_v7, %v1998_v3  ;;  %v2863_v52 = vadd.f32 %v2854_v9, %v2071_v53  ;;  %v5468_v3 = vld [vmem:[#allocation8 + $0xc8] ss:$16 sps:$4 sm:$0xff]   ;;  %v5471_v7 = vld [vmem:[#allocation8 + $0xa4] ss:$16 sps:$4 sm:$0xff]   ;;  %v5474_v9 = vld [vmem:[#allocation8 + $0xac] ss:$16 sps:$4 sm:$0xff]  }
 0xe1e   :  { %v2815_v48 = vpop.f32.mrf.mxu1  ;;  %v2856_v2 = vpop.f32.mrf.mxu0 }
 0xe1f   :  { %v3536_v61 = vmul.f32 -1.442695, %v2861_v24  ;;  %v2862_v10 = vadd.f32 %v2815_v48, %v2000_v28  ;;  %v2864_v19 = vadd.f32 %v2856_v2, %v2073_v35  ;;  %v5480_v28 = vld [vmem:[#allocation8 + $0xa8] ss:$16 sps:$4 sm:$0xff]   ;;  %v5483_v24 = vld [vmem:[#allocation8 + $0x84] ss:$16 sps:$4 sm:$0xff]  }
 0xe20   :  { %v2817_v11 = vpop.f32.mrf.mxu1  ;;  %v2858_v14 = vpop.f32.mrf.mxu0  ;;  %v5486_v48 = vld [vmem:[#allocation8 + $0x8c] ss:$16 sps:$4 sm:$0xff]   ;;  %v5489_v2 = vld [vmem:[#allocation8 + $0x80] ss:$16 sps:$4 sm:$0xff]  }
 0xe21   :  { %3978 = vpow2.f32 %v3536_v61  ;;  %v3537_v17 = vmul.f32 -1.442695, %v2862_v10  ;;  %v3538_v32 = vmul.f32 -1.442695, %v2864_v19  ;;  %v5492_v61 = vld [vmem:[#allocation8 + $0x88] ss:$16 sps:$4 sm:$0xff]  }
 0xe22   :  { %v2818_v22 = vpop.f32.mrf.mxu1  ;;  %v2859_v39 = vpop.f32.mrf.mxu0  ;;  %v5495_v10 = vld [vmem:[#allocation8 + $0x64] ss:$16 sps:$4 sm:$0xff]   ;;  %v5498_v11 = vld [vmem:[#allocation8 + $0x6c] ss:$16 sps:$4 sm:$0xff]  }
 0xe23   :  { %3980 = vpow2.f32 %v3537_v17  ;;  %v5737_v39 = vld [vmem:[#allocation20_spill] sm:$0xff] }
 0xe24   :  { %3982 = vtanh.f32 %v2863_v52  ;;  %v2075_v6 = vadd.f32 %v5737_v39, %v5257_v46 }
 0xe25   :  { %3984 = vpow2.f32 %v3538_v32 }
 0xe2e   :  { %v3979_v51 = vpop.eup %3978 }
 0xe2f   :  { %v2868_v15 = vadd.f32 1.0, %v3979_v51 }
 0xe30   :  { %v3981_v40 = vpop.eup %3980 }
 0xe31   :  { %3986 = vrcp.f32 %v2868_v15  ;;  %v2874_v23 = vadd.f32 1.0, %v3981_v40  ;;  %v3983_v1 = vpop.eup %3982 }
 0xe32   :  { %v3985_v30 = vpop.eup %3984 }
 0xe33   :  { %3988 = vrcp.f32 %v2874_v23  ;;  %v2881_v5 = vadd.f32 1.0, %v3985_v30 }
 0xe35   :  { %3990 = vrcp.f32 %v2881_v5 }
 0xe3e   :  { %v3987_v27 = vpop.eup %3986 }
 0xe3f   :  { %v2885_v12 = vmul.f32 %v3987_v27, %v3983_v1 }
 0xe40   :  { %v3989_v18 = vpop.eup %3988 }
 0xe41   :  { %v2884_v13 = vmul.f32 %v3989_v18, %v5398_v29  ;;  %v5457_v29 = vld [vmem:[#allocation8 + $0xc4] ss:$16 sps:$4 sm:$0xff]  }
 0xe42   :  { %v3991_v38 = vpop.eup %3990 }
 0xe43   :  { %v5448_v63 = vadd.f32 %v2885_v12, %v2884_v13 }
 0xe45   :  { %3992 = vtanh.f32 %v5448_v63 }
 0xe52   :  { %v3993_v4 = vpop.eup %3992 }
 0xe53   :  { %v2888_v57 = vmul.f32 %v3993_v4, %v3991_v38  ;;  %v4096_v4 = vld [vmem:[#allocation8 + $0x44] ss:$16 sps:$4 sm:$0xff]  }
 0xe55   :  { %v2893_v0 = vpack.c.bf16 %v2888_v57, %v2888_v57  ;;  %v4097_v57 = vld [vmem:[#allocation8 + $0x4c] ss:$16 sps:$4 sm:$0xff]  }
 0xe57   :  { %2927 = vmatmul.mubr.bf16.vlgmr.msra.gmra.mxu1 %v2893_v0  ;;  %2968 = vmatmul.mubr.bf16.vlgmr.msra.gmra.mxu0 %v2893_v0  ;;  %v4098_v0 = vld [vmem:[#allocation8 + $0x40] ss:$16 sps:$4 sm:$0xff]  }
 0xe58   :  { %3010 = vmatpush1.bf16.msra.mxu1 %v5451_v56  ;;  %3051 = vmatpush1.bf16.msra.mxu0 %v5454_v47 }
 0xe59   :  { %3011 = vmatprep.subr.bf16.mxu1 %v5457_v29  ;;  %3052 = vmatprep.subr.bf16.mxu0 %v5460_v44 }
 0xe5a   :  { %3041 = vmatprep.mubr.bf16.mxu1 %v5671_v21  ;;  %3082 = vmatprep.mubr.bf16.mxu0 %v5671_v21 }
 0xe5c   :  { %3012 = vmatpush1.bf16.msra.mxu1 %v5465_v42  ;;  %3053 = vmatpush1.bf16.msra.mxu0 %v5468_v3 }
 0xe5d   :  { %3013 = vmatprep.subr.bf16.mxu1 %v5471_v7  ;;  %3054 = vmatprep.subr.bf16.mxu0 %v5474_v9 }
 0xe60   :  { %3014 = vmatpush1.bf16.msra.mxu1 %v5477_v34  ;;  %3055 = vmatpush1.bf16.msra.mxu0 %v5480_v28 }
 0xe61   :  { %3015 = vmatprep.subr.bf16.mxu1 %v5483_v24  ;;  %3056 = vmatprep.subr.bf16.mxu0 %v5486_v48 }
 0xe64   :  { %3016 = vmatpush1.bf16.msra.mxu1 %v5489_v2  ;;  %3057 = vmatpush1.bf16.msra.mxu0 %v5492_v61 }
 0xe65   :  { %3017 = vmatprep.subr.bf16.mxu1 %v5495_v10  ;;  %3058 = vmatprep.subr.bf16.mxu0 %v5498_v11 }
 0xe68   :  { %3018 = vmatpush1.bf16.msra.mxu1 %v5086_v16  ;;  %3059 = vmatpush1.bf16.msra.mxu0 %v5088_v43  ;;  %v5734_v16 = vld [vmem:[#allocation22_spill] sm:$0xff] }
 0xe69   :  { %3019 = vmatprep.subr.bf16.mxu1 %v5092_v45  ;;  %3060 = vmatprep.subr.bf16.mxu0 %v5094_v8  ;;  %v2002_v43 = vadd.f32 %v5734_v16, %v5234_v37 }
 0xe6c   :  { %3020 = vmatpush1.bf16.msra.mxu1 %v5100_v59  ;;  %3061 = vmatpush1.bf16.msra.mxu0 %v5102_v50  ;;  %v5735_v59 = vld [vmem:[#allocation23_spill] sm:$0xff] }
 0xe6d   :  { %3021 = vmatprep.subr.bf16.mxu1 %v5106_v55  ;;  %3062 = vmatprep.subr.bf16.mxu0 %v5108_v60  ;;  %v2004_v50 = vadd.f32 %v5735_v59, %v5242_v54 }
 0xe70   :  { %3022 = vmatpush1.bf16.msra.mxu1 %v5112_v62  ;;  %3063 = vmatpush1.bf16.msra.mxu0 %v5114_v31 }
 0xe71   :  { %3023 = vmatprep.subr.bf16.mxu1 %v5118_v49  ;;  %3064 = vmatprep.subr.bf16.mxu0 %v5120_v25 }
 0xe74   :  { %3024 = vmatpush1.bf16.msra.mxu1 %v5124_v58  ;;  %3065 = vmatpush1.bf16.msra.mxu0 %v5126_v33 }
 0xe75   :  { %3124 = vmatprep.subr.bf16.mxu1 %v5433_v41  ;;  %3165 = vmatprep.subr.bf16.mxu0 %v5436_v26  ;;  %v5736_v26 = vld [vmem:[#allocation25_spill] sm:$0xff] }
 0xe76   :  { %v2077_v17 = vadd.f32 %v5736_v26, %v5252_v36 }
 0xf17   :  { %v2928_v45 = vpop.f32.mrf.mxu1  ;;  %v2969_v8 = vpop.f32.mrf.mxu0 }
 0xf18   :  { %v2976_v55 = vadd.f32 %v2928_v45, %v2002_v43  ;;  %v2978_v35 = vadd.f32 %v2969_v8, %v2075_v6 }
 0xf19   :  { %v2930_v60 = vpop.f32.mrf.mxu1  ;;  %v2971_v62 = vpop.f32.mrf.mxu0 }
 0xf1a   :  { %v3539_v31 = vmul.f32 -1.442695, %v2976_v55  ;;  %v2977_v49 = vadd.f32 %v2930_v60, %v2004_v50  ;;  %v2979_v22 = vadd.f32 %v2971_v62, %v2077_v17 }
 0xf1b   :  { %v2932_v25 = vpop.f32.mrf.mxu1  ;;  %v2973_v58 = vpop.f32.mrf.mxu0 }
 0xf1c   :  { %3994 = vpow2.f32 %v3539_v31  ;;  %v3540_v33 = vmul.f32 -1.442695, %v2977_v49  ;;  %v3541_v19 = vmul.f32 -1.442695, %v2979_v22  ;;  %v5741_v49 = vld [vmem:[#allocation29_spill] sm:$0xff] }
 0xf1d   :  { %v2933_v41 = vpop.f32.mrf.mxu1  ;;  %v2974_v14 = vpop.f32.mrf.mxu0  ;;  %v2083_v25 = vadd.f32 %v5741_v49, %v5252_v36  ;;  %v5748_v49 = vld [vmem:[#allocation38_spill] sm:$0xff] }
 0xf1e   :  { %3996 = vpow2.f32 %v3540_v33  ;;  %v5742_v33 = vld [vmem:[#allocation24_spill] sm:$0xff] }
 0xf1f   :  { %3998 = vtanh.f32 %v2978_v35  ;;  %v2081_v41 = vadd.f32 %v5742_v33, %v5257_v46  ;;  %v3763_v33 = vld [vmem:[%s5625_s13 + $0x30] sm:$0xff]  }
 0xf20   :  { %4000 = vpow2.f32 %v3541_v19 }
 0xf29   :  { %v3995_v20 = vpop.eup %3994 }
 0xf2a   :  { %v2983_v53 = vadd.f32 1.0, %v3995_v20 }
 0xf2b   :  { %v3997_v52 = vpop.eup %3996 }
 0xf2c   :  { %4002 = vrcp.f32 %v2983_v53  ;;  %v2989_v32 = vadd.f32 1.0, %v3997_v52  ;;  %v3999_v51 = vpop.eup %3998 }
 0xf2d   :  { %v4001_v15 = vpop.eup %4000 }
 0xf2e   :  { %4004 = vrcp.f32 %v2989_v32  ;;  %v2996_v30 = vadd.f32 1.0, %v4001_v15 }
 0xf30   :  { %4006 = vrcp.f32 %v2996_v30 }
 0xf39   :  { %v4003_v40 = vpop.eup %4002 }
 0xf3a   :  { %v3000_v23 = vmul.f32 %v4003_v40, %v3999_v51 }
 0xf3b   :  { %v4005_v1 = vpop.eup %4004 }
 0xf3c   :  { %v2999_v27 = vmul.f32 %v4005_v1, %v5448_v63  ;;  %v4095_v63 = vld [vmem:[#allocation8 + $0x68] ss:$16 sps:$4 sm:$0xff]  }
 0xf3d   :  { %v4007_v18 = vpop.eup %4006 }
 0xf3e   :  { %v5526_v12 = vadd.f32 %v3000_v23, %v2999_v27  ;;  %v5743_v27 = vld [vmem:[#allocation30_spill] sm:$0xff] }
 0xf40   :  { %4008 = vtanh.f32 %v5526_v12 }
 0xf4d   :  { %v4009_v5 = vpop.eup %4008 }
 0xf4e   :  { %v3003_v13 = vmul.f32 %v4009_v5, %v4007_v18  ;;  %v2012_v18 = vadd.f32 %v5743_v27, %v5234_v37 }
 0xf50   :  { %v3008_v38 = vpack.c.bf16 %v3003_v13, %v3003_v13 }
 0xf52   :  { %3042 = vmatmul.mubr.bf16.vlgmr.msra.gmra.mxu1 %v3008_v38  ;;  %3083 = vmatmul.mubr.bf16.vlgmr.msra.gmra.mxu0 %v3008_v38  ;;  %v5744_v38 = vld [vmem:[#allocation36_spill] sm:$0xff] }
 0xf53   :  { %3125 = vmatpush1.bf16.msra.mxu1 %v5451_v56  ;;  %3166 = vmatpush1.bf16.msra.mxu0 %v5454_v47  ;;  %v4099_v56 = vld [vmem:[#allocation8 + $0x48] ss:$16 sps:$4 sm:$0xff]   ;;  %v4100_v47 = vld [vmem:[#allocation8 + $0x24] ss:$16 sps:$4 sm:$0xff]  }
 0xf54   :  { %3126 = vmatprep.subr.bf16.mxu1 %v5457_v29  ;;  %3167 = vmatprep.subr.bf16.mxu0 %v5460_v44  ;;  %v4101_v29 = vld [vmem:[#allocation8 + $0x2c] ss:$16 sps:$4 sm:$0xff]   ;;  %v4102_v44 = vld [vmem:[#allocation8 + $0x20] ss:$16 sps:$4 sm:$0xff]  }
 0xf55   :  { %3156 = vmatprep.mubr.bf16.mxu1 %v5671_v21  ;;  %3197 = vmatprep.mubr.bf16.mxu0 %v5671_v21  ;;  %v4094_v21 = vld [vmem:[#allocation8 + $0x60] ss:$16 sps:$4 sm:$0xff]  }
 0xf57   :  { %3127 = vmatpush1.bf16.msra.mxu1 %v5465_v42  ;;  %3168 = vmatpush1.bf16.msra.mxu0 %v5468_v3  ;;  %v4103_v42 = vld [vmem:[#allocation8 + $0x28] ss:$16 sps:$4 sm:$0xff]   ;;  %v4104_v3 = vld [vmem:[#allocation8 + $0x4] ss:$16 sps:$4 sm:$0xff]  }
 0xf58   :  { %3128 = vmatprep.subr.bf16.mxu1 %v5471_v7  ;;  %3169 = vmatprep.subr.bf16.mxu0 %v5474_v9  ;;  %v4105_v7 = vld [vmem:[#allocation8 + $0xc] ss:$16 sps:$4 sm:$0xff]   ;;  %v4106_v9 = vld [vmem:[#allocation8] ss:$16 sps:$4 sm:$0xff]  }
 0xf5b   :  { %3129 = vmatpush1.bf16.msra.mxu1 %v5477_v34  ;;  %3170 = vmatpush1.bf16.msra.mxu0 %v5480_v28  ;;  %v4107_v34 = vld [vmem:[#allocation8 + $0x8] ss:$16 sps:$4 sm:$0xff]   ;;  %v5738_v28 = vmov 0.0  }
 0xf5c   :  { %3130 = vmatprep.subr.bf16.mxu1 %v5483_v24  ;;  %3171 = vmatprep.subr.bf16.mxu0 %v5486_v48  ;;  %v5739_v24 = vld [vmem:[#allocation26_spill] sm:$0xff] }
 0xf5d   :  { %v2008_v48 = vadd.f32 %v5739_v24, %v5234_v37 }
 0xf5f   :  { %3131 = vmatpush1.bf16.msra.mxu1 %v5489_v2  ;;  %3172 = vmatpush1.bf16.msra.mxu0 %v5492_v61 }
 0xf60   :  { %3132 = vmatprep.subr.bf16.mxu1 %v5495_v10  ;;  %3173 = vmatprep.subr.bf16.mxu0 %v5498_v11  ;;  %v5740_v10 = vld [vmem:[#allocation27_spill] sm:$0xff] }
 0xf61   :  { %v2010_v11 = vadd.f32 %v5740_v10, %v5242_v54 }
 0xf63   :  { %3133 = vmatpush1.bf16.msra.mxu1 %v4094_v21  ;;  %3174 = vmatpush1.bf16.msra.mxu0 %v4095_v63  ;;  %v2014_v21 = vadd.f32 %v5744_v38, %v5242_v54 }
 0xf64   :  { %3134 = vmatprep.subr.bf16.mxu1 %v4096_v4  ;;  %3175 = vmatprep.subr.bf16.mxu0 %v4097_v57 }
 0xf67   :  { %3135 = vmatpush1.bf16.msra.mxu1 %v4098_v0  ;;  %3176 = vmatpush1.bf16.msra.mxu0 %v4099_v56 }
 0xf68   :  { %3136 = vmatprep.subr.bf16.mxu1 %v4100_v47  ;;  %3177 = vmatprep.subr.bf16.mxu0 %v4101_v29 }
 0xf6b   :  { %3137 = vmatpush1.bf16.msra.mxu1 %v4102_v44  ;;  %3178 = vmatpush1.bf16.msra.mxu0 %v4103_v42 }
 0xf6c   :  { %3138 = vmatprep.subr.bf16.mxu1 %v4104_v3  ;;  %3179 = vmatprep.subr.bf16.mxu0 %v4105_v7  ;;  %v5745_v3 = vld [vmem:[#allocation31_spill] sm:$0xff] }
 0xf6d   :  { %v2087_v37 = vadd.f32 %v5745_v3, %v5252_v36 }
 0xf6f   :  { %3139 = vmatpush1.bf16.msra.mxu1 %v4106_v9  ;;  %3180 = vmatpush1.bf16.msra.mxu0 %v4107_v34  ;;  %v5746_v9 = vld [vmem:[#allocation28_spill] sm:$0xff] }
 0xf70   :  { %3583 = vmatprep.subr.bf16.mxu1 %v5738_v28  ;;  %v2085_v34 = vadd.f32 %v5746_v9, %v5257_v46 }
0x1012   :  { %v3043_v2 = vpop.f32.mrf.mxu1  ;;  %v3084_v61 = vpop.f32.mrf.mxu0 }
0x1013   :  { %v3091_v16 = vadd.f32 %v3043_v2, %v2008_v48  ;;  %v3093_v14 = vadd.f32 %v3084_v61, %v2081_v41 }
0x1014   :  { %v3045_v43 = vpop.f32.mrf.mxu1  ;;  %v3086_v45 = vpop.f32.mrf.mxu0 }
0x1015   :  { %v3542_v8 = vmul.f32 -1.442695, %v3091_v16  ;;  %v3092_v59 = vadd.f32 %v3045_v43, %v2010_v11  ;;  %v3094_v58 = vadd.f32 %v3086_v45, %v2083_v25 }
0x1016   :  { %v3047_v50 = vpop.f32.mrf.mxu1  ;;  %v3088_v55 = vpop.f32.mrf.mxu0 }
0x1017   :  { %4010 = vpow2.f32 %v3542_v8  ;;  %v3543_v60 = vmul.f32 -1.442695, %v3092_v59  ;;  %v3544_v26 = vmul.f32 -1.442695, %v3094_v58  ;;  %v3762_v58 = vld [vmem:[%s5625_s13 + $0x38] sm:$0xff]  }
0x1018   :  { %v3048_v62 = vpop.f32.mrf.mxu1  ;;  %v3089_v31 = vpop.f32.mrf.mxu0 }
0x1019   :  { %4012 = vpow2.f32 %v3543_v60  ;;  %v5747_v62 = vld [vmem:[#allocation13_spill] sm:$0xff] }
0x101a   :  { %4014 = vtanh.f32 %v3093_v14 }
0x101b   :  { %4016 = vpow2.f32 %v3544_v26 }
0x1024   :  { %v4011_v17 = vpop.eup %4010 }
0x1025   :  { %v3098_v22 = vadd.f32 1.0, %v4011_v17 }
0x1026   :  { %v4013_v39 = vpop.eup %4012 }
0x1027   :  { %4018 = vrcp.f32 %v3098_v22  ;;  %v3104_v6 = vadd.f32 1.0, %v4013_v39  ;;  %v4015_v35 = vpop.eup %4014  ;;  %v3764_v39 = vld [vmem:[%s5625_s13 + $0x28] sm:$0xff]  }
0x1028   :  { %v4017_v19 = vpop.eup %4016 }
0x1029   :  { %4020 = vrcp.f32 %v3104_v6  ;;  %v3111_v32 = vadd.f32 1.0, %v4017_v19  ;;  %v3765_v6 = vld [vmem:[%s5625_s13 + $0x20] sm:$0xff]   ;;  %v3767_v19 = vld [vmem:[%s5625_s13 + $0x10] sm:$0xff]  }
0x102b   :  { %4022 = vrcp.f32 %v3111_v32 }
0x1034   :  { %v4019_v20 = vpop.eup %4018 }
0x1035   :  { %v3115_v53 = vmul.f32 %v4019_v20, %v4015_v35  ;;  %v3766_v35 = vld [vmem:[%s5625_s13 + $0x18] sm:$0xff]   ;;  %v3768_v20 = vld [vmem:[%s5625_s13 + $0x8] sm:$0xff]  }
0x1036   :  { %v4021_v52 = vpop.eup %4020 }
0x1037   :  { %v3114_v51 = vmul.f32 %v4021_v52, %v5526_v12 }
0x1038   :  { %v4023_v40 = vpop.eup %4022 }
0x1039   :  { %v3116_v15 = vadd.f32 %v3115_v53, %v3114_v51  ;;  %v3769_v53 = vld [vmem:[%s5625_s13] sm:$0xff]  }
0x103b   :  { %4024 = vtanh.f32 %v3116_v15 }
0x1048   :  { %v4025_v23 = vpop.eup %4024 }
0x1049   :  { %v3118_v1 = vmul.f32 %v4025_v23, %v4023_v40  ;;  %v3548_v40 = vld [vmem:[%s5623_s11] ss:$0 sm:$0xff] }
0x104b   :  { %v3123_v30 = vpack.c.bf16 %v3118_v1, %v3118_v1  ;;  %v3549_v1 = vld [vmem:[%s5624_s12] ss:$0 sm:$0xff] }
0x104d   :  { %3157 = vmatmul.mubr.bf16.vlgmr.msra.gmra.mxu1 %v3123_v30  ;;  %3198 = vmatmul.mubr.bf16.vlgmr.msra.gmra.mxu0 %v3123_v30 }
0x104e   :  { %3584 = vmatpush3.bf16.msra.mxu1 %v3762_v58  ;;  %3599 = vmatprep.mubr.msk.bf16.mxu1 %vm4179_vm2, %v5738_v28 }
0x104f   :  { %3585 = vmatprep.subr.bf16.mxu1 %v5738_v28 }
0x1052   :  { %3586 = vmatpush3.bf16.msra.mxu1 %v3763_v33 }
0x1053   :  { %3587 = vmatprep.subr.bf16.mxu1 %v5738_v28 }
0x1056   :  { %3588 = vmatpush3.bf16.msra.mxu1 %v3764_v39 }
0x1057   :  { %3589 = vmatprep.subr.bf16.mxu1 %v5738_v28 }
0x105a   :  { %3590 = vmatpush3.bf16.msra.mxu1 %v3765_v6 }
0x105b   :  { %3591 = vmatprep.subr.bf16.mxu1 %v5738_v28 }
0x105e   :  { %3592 = vmatpush3.bf16.msra.mxu1 %v3766_v35 }
0x105f   :  { %3593 = vmatprep.subr.bf16.mxu1 %v5738_v28 }
0x1062   :  { %3594 = vmatpush3.bf16.msra.mxu1 %v3767_v19 }
0x1063   :  { %3595 = vmatprep.subr.bf16.mxu1 %v5738_v28 }
0x1066   :  { %3596 = vmatpush3.bf16.msra.mxu1 %v3768_v20 }
0x1067   :  { %3597 = vmatprep.subr.bf16.mxu1 %v5738_v28  ;;  %v3550_v28 = vld [vmem:[%s5626_s14] ss:$0 sm:$0xff] }
0x106a   :  { %3598 = vmatpush3.bf16.msra.mxu1 %v3769_v53 }
0x110d   :  { %v3158_v5 = vpop.f32.mrf.mxu1  ;;  %v3199_v13 = vpop.f32.mrf.mxu0 }
0x110e   :  { %v3206_v63 = vadd.f32 %v3158_v5, %v2012_v18  ;;  %v3208_v54 = vadd.f32 %v3199_v13, %v2085_v34 }
0x110f   :  { %v3160_v4 = vpop.f32.mrf.mxu1  ;;  %v3201_v12 = vpop.f32.mrf.mxu0 }
0x1110   :  { %v3545_v57 = vmul.f32 -1.442695, %v3206_v63  ;;  %v3207_v0 = vadd.f32 %v3160_v4, %v2014_v21  ;;  %v3209_v7 = vadd.f32 %v3201_v12, %v2087_v37 }
0x1111   :  { %v3162_v56 = vpop.f32.mrf.mxu1  ;;  %v3203_v47 = vpop.f32.mrf.mxu0 }
0x1112   :  { %4026 = vpow2.f32 %v3545_v57  ;;  %v3546_v29 = vmul.f32 -1.442695, %v3207_v0  ;;  %v3547_v24 = vmul.f32 -1.442695, %v3209_v7 }
0x1113   :  { %v3163_v44 = vpop.f32.mrf.mxu1  ;;  %v3204_v42 = vpop.f32.mrf.mxu0 }
0x1114   :  { %4028 = vpow2.f32 %v3546_v29 }
0x1115   :  { %4030 = vtanh.f32 %v3208_v54 }
0x1116   :  { %4032 = vpow2.f32 %v3547_v24 }
0x111f   :  { %v4027_v48 = vpop.eup %4026 }
0x1120   :  { %v3213_v2 = vadd.f32 1.0, %v4027_v48 }
0x1121   :  { %v4029_v61 = vpop.eup %4028 }
0x1122   :  { %4034 = vrcp.f32 %v3213_v2  ;;  %v3219_v10 = vadd.f32 1.0, %v4029_v61  ;;  %v4031_v11 = vpop.eup %4030 }
0x1123   :  { %v4033_v16 = vpop.eup %4032 }
0x1124   :  { %4036 = vrcp.f32 %v3219_v10  ;;  %v3226_v36 = vadd.f32 1.0, %v4033_v16 }
0x1126   :  { %4038 = vrcp.f32 %v3226_v36 }
0x112f   :  { %v4035_v43 = vpop.eup %4034 }
0x1130   :  { %v3230_v45 = vmul.f32 %v4035_v43, %v4031_v11 }
0x1131   :  { %v4037_v8 = vpop.eup %4036 }
0x1132   :  { %v3229_v59 = vmul.f32 %v4037_v8, %v3116_v15 }
0x1133   :  { %v4039_v46 = vpop.eup %4038 }
0x1134   :  { %v3231_v50 = vadd.f32 %v3230_v45, %v3229_v59 }
0x1136   :  { %4040 = vtanh.f32 %v3231_v50 }
0x1143   :  { %v4041_v55 = vpop.eup %4040 }
0x1144   :  { %v3233_v60 = vmul.f32 %v4041_v55, %v4039_v46 }
0x1146   :  { %v3235_v31 = vadd.f32 %v3233_v60, %v5747_v62 }
0x1148   :  { %v3236_v25 = vmul.f32 %v5748_v49, %v3235_v31 }
0x114a   :  { %3237 = vadd.xlane.f32.xlu0 %v3236_v25 }
0x11d3   :  { %v3238_v41 = vpop.xlane.xlu0 %3237 }
0x11d4   :  { %v3239_v14 = vmul.f32 0.03125, %v3238_v41 }
0x11d6   :  { %v3240_v26 = vsub.f32 %v3235_v31, %v3239_v14 }
0x11d8   :  { %v3241_v17 = vmul.f32 %v5748_v49, %v3240_v26 }
0x11da   :  { %v3242_v22 = vmul.f32 %v3241_v17, %v3241_v17 }
0x11dc   :  { %3243 = vadd.xlane.f32.xlu1 %v3242_v22 }
0x1265   :  { %v3244_v52 = vpop.xlane.xlu1 %3243 }
0x1266   :  { %v3245_v32 = vmul.f32 0.03125, %v3244_v52 }
0x1268   :  { %v3246_v51 = vadd.f32 1e-05, %v3245_v32 }
0x126a   :  { %4042 = vrsqrt.f32 %v3246_v51 }
0x1277   :  { %v4043_v15 = vpop.eup %4042 }
0x1278   :  { %v3248_v23 = vmul.f32 %v4043_v15, %v3241_v17 }
0x127a   :  { %v3255_v30 = vmul.f32 %v3548_v40, %v3248_v23 }
0x127c   :  { %v3262_v27 = vadd.f32 %v3549_v1, %v3255_v30 }
0x127e   :  { %v3263_v18 = vpack.c.bf16 %v3262_v27, %v3262_v27 }
0x1280   :  { %3600 = vmatmul.mubr.bf16.vlgmr.msra.gmra.mxu1 %v3263_v18 }
0x1340   :  { %v3369_v5 = vpop.f32.mrf.mxu1 }
0x1341   :  { %v3370_v13 = vadd.f32 %v3550_v28, %v3369_v5 }
0x1342   :  { %v3601_v38 = vpop.f32.mrf.mxu1 }
0x1343   :  { %3376 = vst.msk [vmem:[%s5627_s15] sm:$0xff] %vm3375_vm3, %v3370_v13 }
0x1344   :  { %v3372_v21 = vpop.f32.mrf.mxu1 }
0x1346   :  { %v3602_v63 = vpop.f32.mrf.mxu1 }
0x1347   :  { %3381 = vsyncpa [#allocation5], 1 }
0x1348   :  { %3382 = vsyncpa [#allocation7], 1 }

</bundles_post_ra>
